<compile_context>
chip_gen: v7x
topology: tpu7x:2x2x1
jax: 0.10.0
libtpu: 0.0.40
codegen_flags: <defaults>
</compile_context>

<pallas_src>
import functools

import jax
import jax.numpy as jnp
from jax import lax
from jax.experimental import pallas as pl
from jax.experimental.pallas import tpu as pltpu


# ----------------------------- Pallas kernels ------------------------------

def _conv_kernel(x_ref, w_ref, shift_ref, *rest, kh, kw, wp, ms, cin, relu,
                 has_res):
    """Fused conv (+BN shift) (+residual) (+ReLU) for one image.

    x_ref:     (1, Hp*Wp, Cin)  row-major flattened, spatially padded, bf16
    w_ref:     (KH*KW*Cin, Cout) BN-scale-folded weights, bf16
    shift_ref: (1, Cout) f32 BN shift
    o_ref:     (1, Ms, Cout) bf16, Ms = OH*Wp (garbage W columns cropped in glue)
    patch_ref: (Ms, KH*KW*Cin) bf16 VMEM scratch (im2col built on-chip)
    """
    if has_res:
        res_ref, o_ref, patch_ref = rest
    else:
        o_ref, patch_ref = rest

    # Build the im2col patch matrix in VMEM: each (ki,kj) shifted window of the
    # flattened image is a contiguous slab -> plain 2-D slice copies, no HBM
    # inflation, no reshapes.
    for ki in range(kh):
        for kj in range(kw):
            idx = ki * kw + kj
            patch_ref[:, idx * cin:(idx + 1) * cin] = (
                x_ref[0, pl.ds(ki * wp + kj, ms), :])

    # One big MXU matmul per image (bf16 x bf16 -> f32 accumulate).
    acc = jnp.dot(patch_ref[...], w_ref[...],
                  preferred_element_type=jnp.float32)
    y = acc + shift_ref[...]
    if has_res:
        y = y + res_ref[0].astype(jnp.float32)
    if relu:
        y = jnp.maximum(y, 0.0)
    o_ref[0] = y.astype(o_ref.dtype)


def _maxpool3x3s2_kernel(x_ref, o_ref, *, oh, ow, c):
    """3x3 stride-2 maxpool on a 2x2 space-to-depth'd image (one image/step)."""
    m = None
    for (a, pi) in ((0, 0), (0, 1), (1, 0)):          # row offsets ki = 2a+pi
        for (bb, pj) in ((0, 0), (0, 1), (1, 0)):      # col offsets kj = 2b+pj
            ch = (pi * 2 + pj) * c
            v = x_ref[0, a:a + oh, bb:bb + ow, ch:ch + c]
            m = v if m is None else jnp.maximum(m, v)
    o_ref[0] = m


def _pool_mean_kernel(x_ref, o_ref, *, kk, c):
    """Non-overlapping kxk maxpool (space-to-depth'd) fused with channel mean."""
    m = x_ref[0, :, :, 0:c]
    for t in range(1, kk):
        m = jnp.maximum(m, x_ref[0, :, :, t * c:(t + 1) * c])
    o_ref[0] = jnp.mean(m.astype(jnp.float32), axis=-1, keepdims=True)


# ------------------------------- wrappers -----------------------------------

def conv_flat(x_pad, w, shift, oh, ow, *, relu=True, residual=None):
    """Fused stride-1 conv.  x_pad: (B,Hp,Wp,Cin) padded NHWC (bf16),
    w: (KH,KW,Cin,Cout) BN-scale-folded (bf16), shift: (Cout,) f32.
    Requires Hp >= oh+KH and Wp >= ow+KW-1.  Returns (B, oh, ow, Cout) bf16."""
    b, hp, wp, cin = x_pad.shape
    kh, kw, _, cout = w.shape
    assert hp >= oh + kh and wp >= ow + kw - 1
    ms = oh * wp

    x2 = x_pad.reshape(b, hp * wp, cin)
    wf = w.reshape(kh * kw * cin, cout)
    shift2 = shift.reshape(1, cout).astype(jnp.float32)

    in_specs = [
        pl.BlockSpec((1, hp * wp, cin), lambda i: (i, 0, 0)),
        pl.BlockSpec((kh * kw * cin, cout), lambda i: (0, 0)),
        pl.BlockSpec((1, cout), lambda i: (0, 0)),
    ]
    args = [x2, wf, shift2]
    has_res = residual is not None
    if has_res:
        resp = jnp.pad(residual, ((0, 0), (0, 0), (0, wp - ow), (0, 0)))
        resp = resp.reshape(b, ms, cout).astype(jnp.bfloat16)
        in_specs.append(pl.BlockSpec((1, ms, cout), lambda i: (i, 0, 0)))
        args.append(resp)

    kernel = functools.partial(_conv_kernel, kh=kh, kw=kw, wp=wp, ms=ms,
                               cin=cin, relu=relu, has_res=has_res)
    out = pl.pallas_call(
        kernel,
        out_shape=jax.ShapeDtypeStruct((b, ms, cout), jnp.bfloat16),
        grid=(b,),
        in_specs=in_specs,
        out_specs=pl.BlockSpec((1, ms, cout), lambda i: (i, 0, 0)),
        scratch_shapes=[pltpu.VMEM((ms, kh * kw * cin), jnp.bfloat16)],
        compiler_params=pltpu.CompilerParams(
            dimension_semantics=("parallel",)),
    )(*args)
    # (B, oh, Wp, Cout) with garbage columns [ow:Wp) -> crop in glue (1x data).
    return out.reshape(b, oh, wp, cout)[:, :, :ow, :]


def _pad_nhwc(x, top, bottom, left, right, value=0.0):
    return jnp.pad(x, ((0, 0), (top, bottom), (left, right), (0, 0)),
                   constant_values=value)


def conv1_s2_7x7(x, w7, shift, *, relu=True):
    """7x7 stride-2 pad-3 conv via 2x2 space-to-depth -> stride-1 4x4 conv."""
    b, h, wdt, cin = x.shape
    cout = w7.shape[-1]
    oh = (h + 6 - 7) // 2 + 1
    ow = (wdt + 6 - 7) // 2 + 1

    hp0, wp0 = h + 6, wdt + 6
    pad_b, pad_r = 3 + (hp0 % 2), 3 + (wp0 % 2)   # make H/W even for s2d
    x_pad = _pad_nhwc(x, 3, pad_b, 3, pad_r)
    hp, wp = h + 3 + pad_b, wdt + 3 + pad_r

    # space-to-depth: (B,Hp,Wp,C) -> (B,Hp/2,Wp/2,4C), channel = (pi,pj,c)
    xs = x_pad.reshape(b, hp // 2, 2, wp // 2, 2, cin)
    xs = xs.transpose(0, 1, 3, 2, 4, 5).reshape(b, hp // 2, wp // 2, 4 * cin)
    extra = max(0, oh + 4 - hp // 2)              # slab-read slack: Hp' >= oh+4
    if extra:
        xs = _pad_nhwc(xs, 0, extra, 0, 0)

    # weights: (7,7,Cin,Cout) -> zero-pad to 8x8 -> (4,4,4Cin,Cout), channel
    # order (pi,pj,c) matching the space-to-depth input layout.
    w8 = jnp.pad(w7, ((0, 1), (0, 1), (0, 0), (0, 0)))
    w4 = w8.reshape(4, 2, 4, 2, cin, cout).transpose(0, 2, 1, 3, 4, 5)
    w4 = w4.reshape(4, 4, 4 * cin, cout)

    return conv_flat(xs.astype(jnp.bfloat16), w4.astype(jnp.bfloat16), shift,
                     oh, ow, relu=relu)


def conv3x3(x, w, shift, *, relu=True, residual=None):
    """3x3 stride-1 pad-1 conv (SAME).  One extra bottom pad row gives the
    flattened-slab kernel its read slack (Hp = OH + 3)."""
    _, h, wdt, _ = x.shape
    x_pad = _pad_nhwc(x, 1, 2, 1, 1)
    return conv_flat(x_pad.astype(jnp.bfloat16), w.astype(jnp.bfloat16),
                     shift, h, wdt, relu=relu, residual=residual)


def maxpool_3x3_s2_p1(x):
    b, h, wdt, c = x.shape
    oh = (h + 2 - 3) // 2 + 1
    ow = (wdt + 2 - 3) // 2 + 1
    neg = -1e30
    hp0, wp0 = h + 2, wdt + 2
    pad_b, pad_r = 1 + (hp0 % 2), 1 + (wp0 % 2)
    x_pad = _pad_nhwc(x, 1, pad_b, 1, pad_r, value=neg)
    hp, wp = h + 1 + pad_b, wdt + 1 + pad_r

    xs = x_pad.reshape(b, hp // 2, 2, wp // 2, 2, c)
    xs = xs.transpose(0, 1, 3, 2, 4, 5).reshape(b, hp // 2, wp // 2, 4 * c)
    assert hp // 2 >= oh + 1 and wp // 2 >= ow + 1

    kernel = functools.partial(_maxpool3x3s2_kernel, oh=oh, ow=ow, c=c)
    return pl.pallas_call(
        kernel,
        out_shape=jax.ShapeDtypeStruct((b, oh, ow, c), x.dtype),
        grid=(b,),
        in_specs=[pl.BlockSpec((1, hp // 2, wp // 2, 4 * c),
                               lambda i: (i, 0, 0, 0))],
        out_specs=pl.BlockSpec((1, oh, ow, c), lambda i: (i, 0, 0, 0)),
        compiler_params=pltpu.CompilerParams(
            dimension_semantics=("parallel",)),
    )(xs)


def adaptive_maxpool_channel_mean(x, out_hw):
    """AdaptiveMaxPool2d((out_hw,out_hw)) (uniform case) fused with channel mean."""
    b, h, wdt, c = x.shape
    # TODO(synk): non-uniform AdaptiveMaxPool2d regions (H % out_hw != 0) not implemented.
    assert h % out_hw == 0 and wdt % out_hw == 0
    k, kw_ = h // out_hw, wdt // out_hw
    xs = x.reshape(b, out_hw, k, out_hw, kw_, c)
    xs = xs.transpose(0, 1, 3, 2, 4, 5).reshape(b, out_hw, out_hw, k * kw_ * c)

    kernel = functools.partial(_pool_mean_kernel, kk=k * kw_, c=c)
    out = pl.pallas_call(
        kernel,
        out_shape=jax.ShapeDtypeStruct((b, out_hw, out_hw, 1), jnp.float32),
        grid=(b,),
        in_specs=[pl.BlockSpec((1, out_hw, out_hw, k * kw_ * c),
                               lambda i: (i, 0, 0, 0))],
        out_specs=pl.BlockSpec((1, out_hw, out_hw, 1), lambda i: (i, 0, 0, 0)),
        compiler_params=pltpu.CompilerParams(
            dimension_semantics=("parallel",)),
    )(xs)
    return out[..., 0]


# ----------------------------- BN folding / params ---------------------------

def fold_bn(bn, eps=1e-5):
    # Inference-mode BatchNorm folding. TODO(synk): train-mode batch statistics
    # not implemented (reference forward is a stub, so eval semantics assumed).
    scale = bn["gamma"] / jnp.sqrt(bn["var"] + eps)
    shift = bn["beta"] - bn["mean"] * scale
    return scale, shift


def _kaiming(key, shape):
    fan_in = shape[1] * shape[2] * shape[3]
    std = (2.0 / fan_in) ** 0.5
    return std * jax.random.normal(key, shape, jnp.float32)


def _bn_params(key, c):
    k1, k2 = jax.random.split(key)
    return dict(gamma=1.0 + 0.1 * jax.random.normal(k1, (c,), jnp.float32),
                beta=0.1 * jax.random.normal(k2, (c,), jnp.float32),
                mean=jnp.zeros((c,), jnp.float32),
                var=jnp.ones((c,), jnp.float32))


def init_params(key, in_channels, width=64):
    ks = jax.random.split(key, 10)
    return {
        "conv1_w": _kaiming(ks[0], (width, in_channels, 7, 7)),
        "bn1": _bn_params(ks[1], width),
        "layer1_0": dict(conv1_w=_kaiming(ks[2], (width, width, 3, 3)),
                         bn1=_bn_params(ks[3], width),
                         conv2_w=_kaiming(ks[4], (width, width, 3, 3)),
                         bn2=_bn_params(ks[5], width)),
        "layer1_1": dict(conv1_w=_kaiming(ks[6], (width, width, 3, 3)),
                         bn1=_bn_params(ks[7], width),
                         conv2_w=_kaiming(ks[8], (width, width, 3, 3)),
                         bn2=_bn_params(ks[9], width)),
    }


# ------------------------------- forward ------------------------------------

def comb_resnet18_forward(x_nchw, params, num_targets):
    # interface is PyTorch NCHW; inside we run channels-last NHWC in bf16.
    x = jnp.transpose(x_nchw, (0, 2, 3, 1)).astype(jnp.bfloat16)

    # conv1 + bn1 + relu (7x7 s2 p3) via the fused stride-1 kernel.
    s, sh = fold_bn(params["bn1"])
    w7 = jnp.transpose(params["conv1_w"], (2, 3, 1, 0)) * s   # fold BN scale
    x = conv1_s2_7x7(x, w7, sh, relu=True)

    # maxpool 3x3 / stride 2 / pad 1
    x = maxpool_3x3_s2_p1(x)

    # layer1: two BasicBlocks (ReLU after the residual add, fused in-kernel).
    for blk in ("layer1_0", "layer1_1"):
        p = params[blk]
        identity = x
        s1, b1 = fold_bn(p["bn1"])
        w1 = jnp.transpose(p["conv1_w"], (2, 3, 1, 0)) * s1
        out = conv3x3(x, w1, b1, relu=True)
        s2, b2 = fold_bn(p["bn2"])
        w2 = jnp.transpose(p["conv2_w"], (2, 3, 1, 0)) * s2
        x = conv3x3(out, w2, b2, relu=True, residual=identity)

    out_hw = int(round(num_targets ** 0.5))
    return adaptive_maxpool_channel_mean(x, out_hw)


# ----------------------- pure-JAX reference (XLA) ----------------------------

def ref_forward(x_nchw, params, num_targets):
    f32 = jnp.float32
    x = jnp.transpose(x_nchw, (0, 2, 3, 1)).astype(jnp.bfloat16).astype(f32)

    def conv(xx, w, stride, pad):
        return lax.conv_general_dilated(
            xx, w.astype(jnp.bfloat16).astype(f32),
            window_strides=(stride, stride),
            padding=((pad, pad), (pad, pad)),
            dimension_numbers=("NHWC", "HWIO", "NHWC"))

    s, sh = fold_bn(params["bn1"])
    w7 = jnp.transpose(params["conv1_w"], (2, 3, 1, 0)) * s
    x = jnp.maximum(conv(x, w7, 2, 3) + sh, 0.0)
    x = x.astype(jnp.bfloat16).astype(f32)

    x = lax.reduce_window(x, -jnp.inf, lax.max, (1, 3, 3, 1), (1, 2, 2, 1),
                          ((0, 0), (1, 1), (1, 1), (0, 0)))

    for blk in ("layer1_0", "layer1_1"):
        p = params[blk]
        identity = x
        s1, b1 = fold_bn(p["bn1"])
        w1 = jnp.transpose(p["conv1_w"], (2, 3, 1, 0)) * s1
        out = jnp.maximum(conv(x, w1, 1, 1) + b1, 0.0)
        out = out.astype(jnp.bfloat16).astype(f32)
        s2, b2 = fold_bn(p["bn2"])
        w2 = jnp.transpose(p["conv2_w"], (2, 3, 1, 0)) * s2
        x = jnp.maximum(conv(out, w2, 1, 1) + b2 + identity, 0.0)
        x = x.astype(jnp.bfloat16).astype(f32)

    out_hw = int(round(num_targets ** 0.5))
    _, h, wdt, _ = x.shape
    k, kw_ = h // out_hw, wdt // out_hw
    x = lax.reduce_window(x, -jnp.inf, lax.max, (1, k, kw_, 1),
                          (1, k, kw_, 1), "VALID")
    return jnp.mean(x, axis=-1)


# --------------------------------- main --------------------------------------

if __name__ == "__main__":
    key = jax.random.PRNGKey(0)
    B, num_features, H, W = 2, 4, 16, 16
    num_targets = 16  # -> 4x4 output grid

    params = init_params(key, num_features)
    x = jax.random.normal(jax.random.fold_in(key, 999),
                          (B, num_features, H, W), jnp.float32)

    fwd = jax.jit(lambda xx, pp: comb_resnet18_forward(xx, pp, num_targets))
    out = fwd(x, params)
    jax.block_until_ready(out)

    out_hw = int(round(num_targets ** 0.5))
    assert out.shape == (B, out_hw, out_hw)
    assert bool(jnp.all(jnp.isfinite(out)))

    # numerical check against a pure-XLA reference with matching bf16 rounding
    ref = jax.jit(lambda xx, pp: ref_forward(xx, pp, num_targets))(x, params)
    jax.block_until_ready(ref)
    assert jnp.allclose(out, ref, atol=3e-2, rtol=3e-2), (
        "max abs err %e" % float(jnp.max(jnp.abs(out - ref))))

    print("KERNEL_OK")
</pallas_src>

<mosaic_0001>
module attributes {stable_mosaic.version = 11 : i64} {
  func.func @_conv_kernel(%arg0: i32, %arg1: memref<1x132x16xbf16, #tpu.memory_space<vmem>>, %arg2: memref<256x64xbf16, #tpu.memory_space<vmem>>, %arg3: memref<1x64xf32, #tpu.memory_space<vmem>>, %arg4: memref<1x88x64xbf16, #tpu.memory_space<vmem>>, %arg5: memref<88x256xbf16, #tpu.memory_space<vmem>>) attributes {dimension_semantics = [#tpu.dimension_semantics<parallel>], iteration_bounds = array<i64: 2>, scalar_prefetch = 0 : i64, scratch_operands = 1 : i64, tpu.core_type = #tpu.core_type<tc>, window_params = [{transform_indices = @transform_0, window_bounds = array<i64: 1, 132, 16>}, {pipeline_mode = #tpu.pipeline_mode<synchronous>, transform_indices = @transform_1, window_bounds = array<i64: 256, 64>}, {pipeline_mode = #tpu.pipeline_mode<synchronous>, transform_indices = @transform_2, window_bounds = array<i64: 1, 64>}, {transform_indices = @transform_3, window_bounds = array<i64: 1, 88, 64>}]} {
    %c0 = arith.constant 0 : index
    %c0_0 = arith.constant 0 : index
    %c0_1 = arith.constant 0 : index
    %0 = vector.load %arg1[%c0, %c0_0, %c0_1] : memref<1x132x16xbf16, #tpu.memory_space<vmem>>, vector<1x88x16xbf16>
    %1 = vector.shape_cast %0 : vector<1x88x16xbf16> to vector<88x16xbf16>
    %c0_2 = arith.constant 0 : index
    %c0_3 = arith.constant 0 : index
    %2 = vector.load %arg5[%c0_2, %c0_3] : memref<88x256xbf16, #tpu.memory_space<vmem>>, vector<88x16xbf16>
    tpu.vector_store %arg5[%c0_2, %c0_3], %1 {strides = array<i32>} : memref<88x256xbf16, #tpu.memory_space<vmem>>, vector<88x16xbf16>,
    %c0_4 = arith.constant 0 : index
    %c1 = arith.constant 1 : index
    %c0_5 = arith.constant 0 : index
    %3 = vector.load %arg1[%c0_4, %c1, %c0_5] : memref<1x132x16xbf16, #tpu.memory_space<vmem>>, vector<1x88x16xbf16>
    %4 = vector.shape_cast %3 : vector<1x88x16xbf16> to vector<88x16xbf16>
    %c0_6 = arith.constant 0 : index
    %c16 = arith.constant 16 : index
    %5 = vector.load %arg5[%c0_6, %c16] : memref<88x256xbf16, #tpu.memory_space<vmem>>, vector<88x16xbf16>
    tpu.vector_store %arg5[%c0_6, %c16], %4 {strides = array<i32>} : memref<88x256xbf16, #tpu.memory_space<vmem>>, vector<88x16xbf16>,
    %c0_7 = arith.constant 0 : index
    %c2 = arith.constant 2 : index
    %c0_8 = arith.constant 0 : index
    %6 = vector.load %arg1[%c0_7, %c2, %c0_8] : memref<1x132x16xbf16, #tpu.memory_space<vmem>>, vector<1x88x16xbf16>
    %7 = vector.shape_cast %6 : vector<1x88x16xbf16> to vector<88x16xbf16>
    %c0_9 = arith.constant 0 : index
    %c32 = arith.constant 32 : index
    %8 = vector.load %arg5[%c0_9, %c32] : memref<88x256xbf16, #tpu.memory_space<vmem>>, vector<88x16xbf16>
    tpu.vector_store %arg5[%c0_9, %c32], %7 {strides = array<i32>} : memref<88x256xbf16, #tpu.memory_space<vmem>>, vector<88x16xbf16>,
    %c0_10 = arith.constant 0 : index
    %c3 = arith.constant 3 : index
    %c0_11 = arith.constant 0 : index
    %9 = vector.load %arg1[%c0_10, %c3, %c0_11] : memref<1x132x16xbf16, #tpu.memory_space<vmem>>, vector<1x88x16xbf16>
    %10 = vector.shape_cast %9 : vector<1x88x16xbf16> to vector<88x16xbf16>
    %c0_12 = arith.constant 0 : index
    %c48 = arith.constant 48 : index
    %11 = vector.load %arg5[%c0_12, %c48] : memref<88x256xbf16, #tpu.memory_space<vmem>>, vector<88x16xbf16>
    tpu.vector_store %arg5[%c0_12, %c48], %10 {strides = array<i32>} : memref<88x256xbf16, #tpu.memory_space<vmem>>, vector<88x16xbf16>,
    %c0_13 = arith.constant 0 : index
    %c11 = arith.constant 11 : index
    %c0_14 = arith.constant 0 : index
    %12 = vector.load %arg1[%c0_13, %c11, %c0_14] : memref<1x132x16xbf16, #tpu.memory_space<vmem>>, vector<1x88x16xbf16>
    %13 = vector.shape_cast %12 : vector<1x88x16xbf16> to vector<88x16xbf16>
    %c0_15 = arith.constant 0 : index
    %c64 = arith.constant 64 : index
    %14 = vector.load %arg5[%c0_15, %c64] : memref<88x256xbf16, #tpu.memory_space<vmem>>, vector<88x16xbf16>
    tpu.vector_store %arg5[%c0_15, %c64], %13 {strides = array<i32>} : memref<88x256xbf16, #tpu.memory_space<vmem>>, vector<88x16xbf16>,
    %c0_16 = arith.constant 0 : index
    %c12 = arith.constant 12 : index
    %c0_17 = arith.constant 0 : index
    %15 = vector.load %arg1[%c0_16, %c12, %c0_17] : memref<1x132x16xbf16, #tpu.memory_space<vmem>>, vector<1x88x16xbf16>
    %16 = vector.shape_cast %15 : vector<1x88x16xbf16> to vector<88x16xbf16>
    %c0_18 = arith.constant 0 : index
    %c80 = arith.constant 80 : index
    %17 = vector.load %arg5[%c0_18, %c80] : memref<88x256xbf16, #tpu.memory_space<vmem>>, vector<88x16xbf16>
    tpu.vector_store %arg5[%c0_18, %c80], %16 {strides = array<i32>} : memref<88x256xbf16, #tpu.memory_space<vmem>>, vector<88x16xbf16>,
    %c0_19 = arith.constant 0 : index
    %c13 = arith.constant 13 : index
    %c0_20 = arith.constant 0 : index
    %18 = vector.load %arg1[%c0_19, %c13, %c0_20] : memref<1x132x16xbf16, #tpu.memory_space<vmem>>, vector<1x88x16xbf16>
    %19 = vector.shape_cast %18 : vector<1x88x16xbf16> to vector<88x16xbf16>
    %c0_21 = arith.constant 0 : index
    %c96 = arith.constant 96 : index
    %20 = vector.load %arg5[%c0_21, %c96] : memref<88x256xbf16, #tpu.memory_space<vmem>>, vector<88x16xbf16>
    tpu.vector_store %arg5[%c0_21, %c96], %19 {strides = array<i32>} : memref<88x256xbf16, #tpu.memory_space<vmem>>, vector<88x16xbf16>,
    %c0_22 = arith.constant 0 : index
    %c14 = arith.constant 14 : index
    %c0_23 = arith.constant 0 : index
    %21 = vector.load %arg1[%c0_22, %c14, %c0_23] : memref<1x132x16xbf16, #tpu.memory_space<vmem>>, vector<1x88x16xbf16>
    %22 = vector.shape_cast %21 : vector<1x88x16xbf16> to vector<88x16xbf16>
    %c0_24 = arith.constant 0 : index
    %c112 = arith.constant 112 : index
    %23 = vector.load %arg5[%c0_24, %c112] : memref<88x256xbf16, #tpu.memory_space<vmem>>, vector<88x16xbf16>
    tpu.vector_store %arg5[%c0_24, %c112], %22 {strides = array<i32>} : memref<88x256xbf16, #tpu.memory_space<vmem>>, vector<88x16xbf16>,
    %c0_25 = arith.constant 0 : index
    %c22 = arith.constant 22 : index
    %c0_26 = arith.constant 0 : index
    %24 = vector.load %arg1[%c0_25, %c22, %c0_26] : memref<1x132x16xbf16, #tpu.memory_space<vmem>>, vector<1x88x16xbf16>
    %25 = vector.shape_cast %24 : vector<1x88x16xbf16> to vector<88x16xbf16>
    %c0_27 = arith.constant 0 : index
    %c128 = arith.constant 128 : index
    %26 = vector.load %arg5[%c0_27, %c128] : memref<88x256xbf16, #tpu.memory_space<vmem>>, vector<88x16xbf16>
    tpu.vector_store %arg5[%c0_27, %c128], %25 {strides = array<i32>} : memref<88x256xbf16, #tpu.memory_space<vmem>>, vector<88x16xbf16>,
    %c0_28 = arith.constant 0 : index
    %c23 = arith.constant 23 : index
    %c0_29 = arith.constant 0 : index
    %27 = vector.load %arg1[%c0_28, %c23, %c0_29] : memref<1x132x16xbf16, #tpu.memory_space<vmem>>, vector<1x88x16xbf16>
    %28 = vector.shape_cast %27 : vector<1x88x16xbf16> to vector<88x16xbf16>
    %c0_30 = arith.constant 0 : index
    %c144 = arith.constant 144 : index
    %29 = vector.load %arg5[%c0_30, %c144] : memref<88x256xbf16, #tpu.memory_space<vmem>>, vector<88x16xbf16>
    tpu.vector_store %arg5[%c0_30, %c144], %28 {strides = array<i32>} : memref<88x256xbf16, #tpu.memory_space<vmem>>, vector<88x16xbf16>,
    %c0_31 = arith.constant 0 : index
    %c24 = arith.constant 24 : index
    %c0_32 = arith.constant 0 : index
    %30 = vector.load %arg1[%c0_31, %c24, %c0_32] : memref<1x132x16xbf16, #tpu.memory_space<vmem>>, vector<1x88x16xbf16>
    %31 = vector.shape_cast %30 : vector<1x88x16xbf16> to vector<88x16xbf16>
    %c0_33 = arith.constant 0 : index
    %c160 = arith.constant 160 : index
    %32 = vector.load %arg5[%c0_33, %c160] : memref<88x256xbf16, #tpu.memory_space<vmem>>, vector<88x16xbf16>
    tpu.vector_store %arg5[%c0_33, %c160], %31 {strides = array<i32>} : memref<88x256xbf16, #tpu.memory_space<vmem>>, vector<88x16xbf16>,
    %c0_34 = arith.constant 0 : index
    %c25 = arith.constant 25 : index
    %c0_35 = arith.constant 0 : index
    %33 = vector.load %arg1[%c0_34, %c25, %c0_35] : memref<1x132x16xbf16, #tpu.memory_space<vmem>>, vector<1x88x16xbf16>
    %34 = vector.shape_cast %33 : vector<1x88x16xbf16> to vector<88x16xbf16>
    %c0_36 = arith.constant 0 : index
    %c176 = arith.constant 176 : index
    %35 = vector.load %arg5[%c0_36, %c176] : memref<88x256xbf16, #tpu.memory_space<vmem>>, vector<88x16xbf16>
    tpu.vector_store %arg5[%c0_36, %c176], %34 {strides = array<i32>} : memref<88x256xbf16, #tpu.memory_space<vmem>>, vector<88x16xbf16>,
    %c0_37 = arith.constant 0 : index
    %c33 = arith.constant 33 : index
    %c0_38 = arith.constant 0 : index
    %36 = vector.load %arg1[%c0_37, %c33, %c0_38] : memref<1x132x16xbf16, #tpu.memory_space<vmem>>, vector<1x88x16xbf16>
    %37 = vector.shape_cast %36 : vector<1x88x16xbf16> to vector<88x16xbf16>
    %c0_39 = arith.constant 0 : index
    %c192 = arith.constant 192 : index
    %38 = vector.load %arg5[%c0_39, %c192] : memref<88x256xbf16, #tpu.memory_space<vmem>>, vector<88x16xbf16>
    tpu.vector_store %arg5[%c0_39, %c192], %37 {strides = array<i32>} : memref<88x256xbf16, #tpu.memory_space<vmem>>, vector<88x16xbf16>,
    %c0_40 = arith.constant 0 : index
    %c34 = arith.constant 34 : index
    %c0_41 = arith.constant 0 : index
    %39 = vector.load %arg1[%c0_40, %c34, %c0_41] : memref<1x132x16xbf16, #tpu.memory_space<vmem>>, vector<1x88x16xbf16>
    %40 = vector.shape_cast %39 : vector<1x88x16xbf16> to vector<88x16xbf16>
    %c0_42 = arith.constant 0 : index
    %c208 = arith.constant 208 : index
    %41 = vector.load %arg5[%c0_42, %c208] : memref<88x256xbf16, #tpu.memory_space<vmem>>, vector<88x16xbf16>
    tpu.vector_store %arg5[%c0_42, %c208], %40 {strides = array<i32>} : memref<88x256xbf16, #tpu.memory_space<vmem>>, vector<88x16xbf16>,
    %c0_43 = arith.constant 0 : index
    %c35 = arith.constant 35 : index
    %c0_44 = arith.constant 0 : index
    %42 = vector.load %arg1[%c0_43, %c35, %c0_44] : memref<1x132x16xbf16, #tpu.memory_space<vmem>>, vector<1x88x16xbf16>
    %43 = vector.shape_cast %42 : vector<1x88x16xbf16> to vector<88x16xbf16>
    %c0_45 = arith.constant 0 : index
    %c224 = arith.constant 224 : index
    %44 = vector.load %arg5[%c0_45, %c224] : memref<88x256xbf16, #tpu.memory_space<vmem>>, vector<88x16xbf16>
    tpu.vector_store %arg5[%c0_45, %c224], %43 {strides = array<i32>} : memref<88x256xbf16, #tpu.memory_space<vmem>>, vector<88x16xbf16>,
    %c0_46 = arith.constant 0 : index
    %c36 = arith.constant 36 : index
    %c0_47 = arith.constant 0 : index
    %45 = vector.load %arg1[%c0_46, %c36, %c0_47] : memref<1x132x16xbf16, #tpu.memory_space<vmem>>, vector<1x88x16xbf16>
    %46 = vector.shape_cast %45 : vector<1x88x16xbf16> to vector<88x16xbf16>
    %c0_48 = arith.constant 0 : index
    %c240 = arith.constant 240 : index
    %47 = vector.load %arg5[%c0_48, %c240] : memref<88x256xbf16, #tpu.memory_space<vmem>>, vector<88x16xbf16>
    tpu.vector_store %arg5[%c0_48, %c240], %46 {strides = array<i32>} : memref<88x256xbf16, #tpu.memory_space<vmem>>, vector<88x16xbf16>,
    %c0_49 = arith.constant 0 : index
    %c0_50 = arith.constant 0 : index
    %48 = vector.load %arg5[%c0_49, %c0_50] : memref<88x256xbf16, #tpu.memory_space<vmem>>, vector<88x256xbf16>
    %c0_51 = arith.constant 0 : index
    %c0_52 = arith.constant 0 : index
    %49 = vector.load %arg2[%c0_51, %c0_52] : memref<256x64xbf16, #tpu.memory_space<vmem>>, vector<256x64xbf16>
    %cst = arith.constant dense<0.000000e+00> : vector<88x64xf32>
    %50 = tpu.matmul %48, %49, %cst {dimension_numbers = #tpu.dot_dimension_numbers<[1], [0], [0], [1], [0, 0, 1, 1], [], []>} : vector<88x256xbf16>, vector<256x64xbf16>, vector<88x64xf32> -> vector<88x64xf32>
    %c0_53 = arith.constant 0 : index
    %c0_54 = arith.constant 0 : index
    %51 = vector.load %arg3[%c0_53, %c0_54] : memref<1x64xf32, #tpu.memory_space<vmem>>, vector<1x64xf32>
    %52 = vector.broadcast %51 : vector<1x64xf32> to vector<88x64xf32>
    %53 = arith.addf %50, %52 : vector<88x64xf32>
    %cst_55 = arith.constant 0.000000e+00 : f32
    %54 = vector.broadcast %cst_55 : f32 to vector<88x64xf32>
    %55 = arith.maximumf %53, %54 : vector<88x64xf32>
    %56 = arith.truncf %55 : vector<88x64xf32> to vector<88x64xbf16>
    %c0_56 = arith.constant 0 : index
    %c0_57 = arith.constant 0 : index
    %c0_58 = arith.constant 0 : index
    %57 = vector.load %arg4[%c0_56, %c0_57, %c0_58] : memref<1x88x64xbf16, #tpu.memory_space<vmem>>, vector<1x88x64xbf16>
    %58 = vector.shape_cast %57 : vector<1x88x64xbf16> to vector<88x64xbf16>
    %59 = vector.shape_cast %56 : vector<88x64xbf16> to vector<1x88x64xbf16>
    tpu.vector_store %arg4[%c0_56, %c0_57, %c0_58], %59 {strides = array<i32>} : memref<1x88x64xbf16, #tpu.memory_space<vmem>>, vector<1x88x64xbf16>,
    return
  }
  func.func @transform_0(%arg0: i32) -> (i32, i32, i32) {
    %c0_i32 = arith.constant 0 : i32
    %c0_i32_0 = arith.constant 0 : i32
    %c0_i32_1 = arith.constant 0 : i32
    return %arg0, %c0_i32, %c0_i32_0 : i32, i32, i32
  }
  func.func @transform_1(%arg0: i32) -> (i32, i32) {
    %c0_i32 = arith.constant 0 : i32
    %c0_i32_0 = arith.constant 0 : i32
    %c0_i32_1 = arith.constant 0 : i32
    return %c0_i32, %c0_i32_0 : i32, i32
  }
  func.func @transform_2(%arg0: i32) -> (i32, i32) {
    %c0_i32 = arith.constant 0 : i32
    %c0_i32_0 = arith.constant 0 : i32
    %c0_i32_1 = arith.constant 0 : i32
    return %c0_i32, %c0_i32_0 : i32, i32
  }
  func.func @transform_3(%arg0: i32) -> (i32, i32, i32) {
    %c0_i32 = arith.constant 0 : i32
    %c0_i32_0 = arith.constant 0 : i32
    %c0_i32_1 = arith.constant 0 : i32
    return %arg0, %c0_i32, %c0_i32_0 : i32, i32, i32
  }
}

module attributes {stable_mosaic.version = 11 : i64} {
  func.func @_maxpool3x3s2_kernel(%arg0: i32, %arg1: memref<1x5x5x256xbf16, #tpu.memory_space<vmem>>, %arg2: memref<1x4x4x64xbf16, #tpu.memory_space<vmem>>) attributes {dimension_semantics = [#tpu.dimension_semantics<parallel>], iteration_bounds = array<i64: 2>, scalar_prefetch = 0 : i64, scratch_operands = 0 : i64, tpu.core_type = #tpu.core_type<tc>, window_params = [{transform_indices = @transform_0, window_bounds = array<i64: 1, 5, 5, 256>}, {transform_indices = @transform_1, window_bounds = array<i64: 1, 4, 4, 64>}]} {
    %c0 = arith.constant 0 : index
    %c0_0 = arith.constant 0 : index
    %c0_1 = arith.constant 0 : index
    %c0_2 = arith.constant 0 : index
    %0 = vector.load %arg1[%c0, %c0_0, %c0_1, %c0_2] : memref<1x5x5x256xbf16, #tpu.memory_space<vmem>>, vector<1x4x4x64xbf16>
    %1 = vector.shape_cast %0 : vector<1x4x4x64xbf16> to vector<4x4x64xbf16>
    %c0_3 = arith.constant 0 : index
    %c0_4 = arith.constant 0 : index
    %c0_5 = arith.constant 0 : index
    %c64 = arith.constant 64 : index
    %2 = vector.load %arg1[%c0_3, %c0_4, %c0_5, %c64] : memref<1x5x5x256xbf16, #tpu.memory_space<vmem>>, vector<1x4x4x64xbf16>
    %3 = vector.shape_cast %2 : vector<1x4x4x64xbf16> to vector<4x4x64xbf16>
    %4 = arith.maximumf %1, %3 : vector<4x4x64xbf16>
    %c0_6 = arith.constant 0 : index
    %c0_7 = arith.constant 0 : index
    %c1 = arith.constant 1 : index
    %c0_8 = arith.constant 0 : index
    %5 = vector.load %arg1[%c0_6, %c0_7, %c1, %c0_8] : memref<1x5x5x256xbf16, #tpu.memory_space<vmem>>, vector<1x4x4x64xbf16>
    %6 = vector.shape_cast %5 : vector<1x4x4x64xbf16> to vector<4x4x64xbf16>
    %7 = arith.maximumf %4, %6 : vector<4x4x64xbf16>
    %c0_9 = arith.constant 0 : index
    %c0_10 = arith.constant 0 : index
    %c0_11 = arith.constant 0 : index
    %c128 = arith.constant 128 : index
    %8 = vector.load %arg1[%c0_9, %c0_10, %c0_11, %c128] : memref<1x5x5x256xbf16, #tpu.memory_space<vmem>>, vector<1x4x4x64xbf16>
    %9 = vector.shape_cast %8 : vector<1x4x4x64xbf16> to vector<4x4x64xbf16>
    %10 = arith.maximumf %7, %9 : vector<4x4x64xbf16>
    %c0_12 = arith.constant 0 : index
    %c0_13 = arith.constant 0 : index
    %c0_14 = arith.constant 0 : index
    %c192 = arith.constant 192 : index
    %11 = vector.load %arg1[%c0_12, %c0_13, %c0_14, %c192] : memref<1x5x5x256xbf16, #tpu.memory_space<vmem>>, vector<1x4x4x64xbf16>
    %12 = vector.shape_cast %11 : vector<1x4x4x64xbf16> to vector<4x4x64xbf16>
    %13 = arith.maximumf %10, %12 : vector<4x4x64xbf16>
    %c0_15 = arith.constant 0 : index
    %c0_16 = arith.constant 0 : index
    %c1_17 = arith.constant 1 : index
    %c128_18 = arith.constant 128 : index
    %14 = vector.load %arg1[%c0_15, %c0_16, %c1_17, %c128_18] : memref<1x5x5x256xbf16, #tpu.memory_space<vmem>>, vector<1x4x4x64xbf16>
    %15 = vector.shape_cast %14 : vector<1x4x4x64xbf16> to vector<4x4x64xbf16>
    %16 = arith.maximumf %13, %15 : vector<4x4x64xbf16>
    %c0_19 = arith.constant 0 : index
    %c1_20 = arith.constant 1 : index
    %c0_21 = arith.constant 0 : index
    %c0_22 = arith.constant 0 : index
    %17 = vector.load %arg1[%c0_19, %c1_20, %c0_21, %c0_22] : memref<1x5x5x256xbf16, #tpu.memory_space<vmem>>, vector<1x4x4x64xbf16>
    %18 = vector.shape_cast %17 : vector<1x4x4x64xbf16> to vector<4x4x64xbf16>
    %19 = arith.maximumf %16, %18 : vector<4x4x64xbf16>
    %c0_23 = arith.constant 0 : index
    %c1_24 = arith.constant 1 : index
    %c0_25 = arith.constant 0 : index
    %c64_26 = arith.constant 64 : index
    %20 = vector.load %arg1[%c0_23, %c1_24, %c0_25, %c64_26] : memref<1x5x5x256xbf16, #tpu.memory_space<vmem>>, vector<1x4x4x64xbf16>
    %21 = vector.shape_cast %20 : vector<1x4x4x64xbf16> to vector<4x4x64xbf16>
    %22 = arith.maximumf %19, %21 : vector<4x4x64xbf16>
    %c0_27 = arith.constant 0 : index
    %c1_28 = arith.constant 1 : index
    %c1_29 = arith.constant 1 : index
    %c0_30 = arith.constant 0 : index
    %23 = vector.load %arg1[%c0_27, %c1_28, %c1_29, %c0_30] : memref<1x5x5x256xbf16, #tpu.memory_space<vmem>>, vector<1x4x4x64xbf16>
    %24 = vector.shape_cast %23 : vector<1x4x4x64xbf16> to vector<4x4x64xbf16>
    %25 = arith.maximumf %22, %24 : vector<4x4x64xbf16>
    %c0_31 = arith.constant 0 : index
    %c0_32 = arith.constant 0 : index
    %c0_33 = arith.constant 0 : index
    %c0_34 = arith.constant 0 : index
    %26 = vector.load %arg2[%c0_31, %c0_32, %c0_33, %c0_34] : memref<1x4x4x64xbf16, #tpu.memory_space<vmem>>, vector<1x4x4x64xbf16>
    %27 = vector.shape_cast %26 : vector<1x4x4x64xbf16> to vector<4x4x64xbf16>
    %28 = vector.shape_cast %25 : vector<4x4x64xbf16> to vector<1x4x4x64xbf16>
    tpu.vector_store %arg2[%c0_31, %c0_32, %c0_33, %c0_34], %28 {strides = array<i32>} : memref<1x4x4x64xbf16, #tpu.memory_space<vmem>>, vector<1x4x4x64xbf16>,
    return
  }
  func.func @transform_0(%arg0: i32) -> (i32, i32, i32, i32) {
    %c0_i32 = arith.constant 0 : i32
    %c0_i32_0 = arith.constant 0 : i32
    %c0_i32_1 = arith.constant 0 : i32
    %c0_i32_2 = arith.constant 0 : i32
    return %arg0, %c0_i32, %c0_i32_0, %c0_i32_1 : i32, i32, i32, i32
  }
  func.func @transform_1(%arg0: i32) -> (i32, i32, i32, i32) {
    %c0_i32 = arith.constant 0 : i32
    %c0_i32_0 = arith.constant 0 : i32
    %c0_i32_1 = arith.constant 0 : i32
    %c0_i32_2 = arith.constant 0 : i32
    return %arg0, %c0_i32, %c0_i32_0, %c0_i32_1 : i32, i32, i32, i32
  }
}

module attributes {stable_mosaic.version = 11 : i64} {
  func.func @_conv_kernel(%arg0: i32, %arg1: memref<1x42x64xbf16, #tpu.memory_space<vmem>>, %arg2: memref<576x64xbf16, #tpu.memory_space<vmem>>, %arg3: memref<1x64xf32, #tpu.memory_space<vmem>>, %arg4: memref<1x24x64xbf16, #tpu.memory_space<vmem>>, %arg5: memref<24x576xbf16, #tpu.memory_space<vmem>>) attributes {dimension_semantics = [#tpu.dimension_semantics<parallel>], iteration_bounds = array<i64: 2>, scalar_prefetch = 0 : i64, scratch_operands = 1 : i64, tpu.core_type = #tpu.core_type<tc>, window_params = [{transform_indices = @transform_0, window_bounds = array<i64: 1, 42, 64>}, {pipeline_mode = #tpu.pipeline_mode<synchronous>, transform_indices = @transform_1, window_bounds = array<i64: 576, 64>}, {pipeline_mode = #tpu.pipeline_mode<synchronous>, transform_indices = @transform_2, window_bounds = array<i64: 1, 64>}, {transform_indices = @transform_3, window_bounds = array<i64: 1, 24, 64>}]} {
    %c0 = arith.constant 0 : index
    %c0_0 = arith.constant 0 : index
    %c0_1 = arith.constant 0 : index
    %0 = vector.load %arg1[%c0, %c0_0, %c0_1] : memref<1x42x64xbf16, #tpu.memory_space<vmem>>, vector<1x24x64xbf16>
    %1 = vector.shape_cast %0 : vector<1x24x64xbf16> to vector<24x64xbf16>
    %c0_2 = arith.constant 0 : index
    %c0_3 = arith.constant 0 : index
    %2 = vector.load %arg5[%c0_2, %c0_3] : memref<24x576xbf16, #tpu.memory_space<vmem>>, vector<24x64xbf16>
    tpu.vector_store %arg5[%c0_2, %c0_3], %1 {strides = array<i32>} : memref<24x576xbf16, #tpu.memory_space<vmem>>, vector<24x64xbf16>,
    %c0_4 = arith.constant 0 : index
    %c1 = arith.constant 1 : index
    %c0_5 = arith.constant 0 : index
    %3 = vector.load %arg1[%c0_4, %c1, %c0_5] : memref<1x42x64xbf16, #tpu.memory_space<vmem>>, vector<1x24x64xbf16>
    %4 = vector.shape_cast %3 : vector<1x24x64xbf16> to vector<24x64xbf16>
    %c0_6 = arith.constant 0 : index
    %c64 = arith.constant 64 : index
    %5 = vector.load %arg5[%c0_6, %c64] : memref<24x576xbf16, #tpu.memory_space<vmem>>, vector<24x64xbf16>
    tpu.vector_store %arg5[%c0_6, %c64], %4 {strides = array<i32>} : memref<24x576xbf16, #tpu.memory_space<vmem>>, vector<24x64xbf16>,
    %c0_7 = arith.constant 0 : index
    %c2 = arith.constant 2 : index
    %c0_8 = arith.constant 0 : index
    %6 = vector.load %arg1[%c0_7, %c2, %c0_8] : memref<1x42x64xbf16, #tpu.memory_space<vmem>>, vector<1x24x64xbf16>
    %7 = vector.shape_cast %6 : vector<1x24x64xbf16> to vector<24x64xbf16>
    %c0_9 = arith.constant 0 : index
    %c128 = arith.constant 128 : index
    %8 = vector.load %arg5[%c0_9, %c128] : memref<24x576xbf16, #tpu.memory_space<vmem>>, vector<24x64xbf16>
    tpu.vector_store %arg5[%c0_9, %c128], %7 {strides = array<i32>} : memref<24x576xbf16, #tpu.memory_space<vmem>>, vector<24x64xbf16>,
    %c0_10 = arith.constant 0 : index
    %c6 = arith.constant 6 : index
    %c0_11 = arith.constant 0 : index
    %9 = vector.load %arg1[%c0_10, %c6, %c0_11] : memref<1x42x64xbf16, #tpu.memory_space<vmem>>, vector<1x24x64xbf16>
    %10 = vector.shape_cast %9 : vector<1x24x64xbf16> to vector<24x64xbf16>
    %c0_12 = arith.constant 0 : index
    %c192 = arith.constant 192 : index
    %11 = vector.load %arg5[%c0_12, %c192] : memref<24x576xbf16, #tpu.memory_space<vmem>>, vector<24x64xbf16>
    tpu.vector_store %arg5[%c0_12, %c192], %10 {strides = array<i32>} : memref<24x576xbf16, #tpu.memory_space<vmem>>, vector<24x64xbf16>,
    %c0_13 = arith.constant 0 : index
    %c7 = arith.constant 7 : index
    %c0_14 = arith.constant 0 : index
    %12 = vector.load %arg1[%c0_13, %c7, %c0_14] : memref<1x42x64xbf16, #tpu.memory_space<vmem>>, vector<1x24x64xbf16>
    %13 = vector.shape_cast %12 : vector<1x24x64xbf16> to vector<24x64xbf16>
    %c0_15 = arith.constant 0 : index
    %c256 = arith.constant 256 : index
    %14 = vector.load %arg5[%c0_15, %c256] : memref<24x576xbf16, #tpu.memory_space<vmem>>, vector<24x64xbf16>
    tpu.vector_store %arg5[%c0_15, %c256], %13 {strides = array<i32>} : memref<24x576xbf16, #tpu.memory_space<vmem>>, vector<24x64xbf16>,
    %c0_16 = arith.constant 0 : index
    %c8 = arith.constant 8 : index
    %c0_17 = arith.constant 0 : index
    %15 = vector.load %arg1[%c0_16, %c8, %c0_17] : memref<1x42x64xbf16, #tpu.memory_space<vmem>>, vector<1x24x64xbf16>
    %16 = vector.shape_cast %15 : vector<1x24x64xbf16> to vector<24x64xbf16>
    %c0_18 = arith.constant 0 : index
    %c320 = arith.constant 320 : index
    %17 = vector.load %arg5[%c0_18, %c320] : memref<24x576xbf16, #tpu.memory_space<vmem>>, vector<24x64xbf16>
    tpu.vector_store %arg5[%c0_18, %c320], %16 {strides = array<i32>} : memref<24x576xbf16, #tpu.memory_space<vmem>>, vector<24x64xbf16>,
    %c0_19 = arith.constant 0 : index
    %c12 = arith.constant 12 : index
    %c0_20 = arith.constant 0 : index
    %18 = vector.load %arg1[%c0_19, %c12, %c0_20] : memref<1x42x64xbf16, #tpu.memory_space<vmem>>, vector<1x24x64xbf16>
    %19 = vector.shape_cast %18 : vector<1x24x64xbf16> to vector<24x64xbf16>
    %c0_21 = arith.constant 0 : index
    %c384 = arith.constant 384 : index
    %20 = vector.load %arg5[%c0_21, %c384] : memref<24x576xbf16, #tpu.memory_space<vmem>>, vector<24x64xbf16>
    tpu.vector_store %arg5[%c0_21, %c384], %19 {strides = array<i32>} : memref<24x576xbf16, #tpu.memory_space<vmem>>, vector<24x64xbf16>,
    %c0_22 = arith.constant 0 : index
    %c13 = arith.constant 13 : index
    %c0_23 = arith.constant 0 : index
    %21 = vector.load %arg1[%c0_22, %c13, %c0_23] : memref<1x42x64xbf16, #tpu.memory_space<vmem>>, vector<1x24x64xbf16>
    %22 = vector.shape_cast %21 : vector<1x24x64xbf16> to vector<24x64xbf16>
    %c0_24 = arith.constant 0 : index
    %c448 = arith.constant 448 : index
    %23 = vector.load %arg5[%c0_24, %c448] : memref<24x576xbf16, #tpu.memory_space<vmem>>, vector<24x64xbf16>
    tpu.vector_store %arg5[%c0_24, %c448], %22 {strides = array<i32>} : memref<24x576xbf16, #tpu.memory_space<vmem>>, vector<24x64xbf16>,
    %c0_25 = arith.constant 0 : index
    %c14 = arith.constant 14 : index
    %c0_26 = arith.constant 0 : index
    %24 = vector.load %arg1[%c0_25, %c14, %c0_26] : memref<1x42x64xbf16, #tpu.memory_space<vmem>>, vector<1x24x64xbf16>
    %25 = vector.shape_cast %24 : vector<1x24x64xbf16> to vector<24x64xbf16>
    %c0_27 = arith.constant 0 : index
    %c512 = arith.constant 512 : index
    %26 = vector.load %arg5[%c0_27, %c512] : memref<24x576xbf16, #tpu.memory_space<vmem>>, vector<24x64xbf16>
    tpu.vector_store %arg5[%c0_27, %c512], %25 {strides = array<i32>} : memref<24x576xbf16, #tpu.memory_space<vmem>>, vector<24x64xbf16>,
    %c0_28 = arith.constant 0 : index
    %c0_29 = arith.constant 0 : index
    %27 = vector.load %arg5[%c0_28, %c0_29] : memref<24x576xbf16, #tpu.memory_space<vmem>>, vector<24x576xbf16>
    %c0_30 = arith.constant 0 : index
    %c0_31 = arith.constant 0 : index
    %28 = vector.load %arg2[%c0_30, %c0_31] : memref<576x64xbf16, #tpu.memory_space<vmem>>, vector<576x64xbf16>
    %cst = arith.constant dense<0.000000e+00> : vector<24x64xf32>
    %29 = tpu.matmul %27, %28, %cst {dimension_numbers = #tpu.dot_dimension_numbers<[1], [0], [0], [1], [0, 0, 1, 1], [], []>} : vector<24x576xbf16>, vector<576x64xbf16>, vector<24x64xf32> -> vector<24x64xf32>
    %c0_32 = arith.constant 0 : index
    %c0_33 = arith.constant 0 : index
    %30 = vector.load %arg3[%c0_32, %c0_33] : memref<1x64xf32, #tpu.memory_space<vmem>>, vector<1x64xf32>
    %31 = vector.broadcast %30 : vector<1x64xf32> to vector<24x64xf32>
    %32 = arith.addf %29, %31 : vector<24x64xf32>
    %cst_34 = arith.constant 0.000000e+00 : f32
    %33 = vector.broadcast %cst_34 : f32 to vector<24x64xf32>
    %34 = arith.maximumf %32, %33 : vector<24x64xf32>
    %35 = arith.truncf %34 : vector<24x64xf32> to vector<24x64xbf16>
    %c0_35 = arith.constant 0 : index
    %c0_36 = arith.constant 0 : index
    %c0_37 = arith.constant 0 : index
    %36 = vector.load %arg4[%c0_35, %c0_36, %c0_37] : memref<1x24x64xbf16, #tpu.memory_space<vmem>>, vector<1x24x64xbf16>
    %37 = vector.shape_cast %36 : vector<1x24x64xbf16> to vector<24x64xbf16>
    %38 = vector.shape_cast %35 : vector<24x64xbf16> to vector<1x24x64xbf16>
    tpu.vector_store %arg4[%c0_35, %c0_36, %c0_37], %38 {strides = array<i32>} : memref<1x24x64xbf16, #tpu.memory_space<vmem>>, vector<1x24x64xbf16>,
    return
  }
  func.func @transform_0(%arg0: i32) -> (i32, i32, i32) {
    %c0_i32 = arith.constant 0 : i32
    %c0_i32_0 = arith.constant 0 : i32
    %c0_i32_1 = arith.constant 0 : i32
    return %arg0, %c0_i32, %c0_i32_0 : i32, i32, i32
  }
  func.func @transform_1(%arg0: i32) -> (i32, i32) {
    %c0_i32 = arith.constant 0 : i32
    %c0_i32_0 = arith.constant 0 : i32
    %c0_i32_1 = arith.constant 0 : i32
    return %c0_i32, %c0_i32_0 : i32, i32
  }
  func.func @transform_2(%arg0: i32) -> (i32, i32) {
    %c0_i32 = arith.constant 0 : i32
    %c0_i32_0 = arith.constant 0 : i32
    %c0_i32_1 = arith.constant 0 : i32
    return %c0_i32, %c0_i32_0 : i32, i32
  }
  func.func @transform_3(%arg0: i32) -> (i32, i32, i32) {
    %c0_i32 = arith.constant 0 : i32
    %c0_i32_0 = arith.constant 0 : i32
    %c0_i32_1 = arith.constant 0 : i32
    return %arg0, %c0_i32, %c0_i32_0 : i32, i32, i32
  }
}

module attributes {stable_mosaic.version = 11 : i64} {
  func.func @_conv_kernel(%arg0: i32, %arg1: memref<1x42x64xbf16, #tpu.memory_space<vmem>>, %arg2: memref<576x64xbf16, #tpu.memory_space<vmem>>, %arg3: memref<1x64xf32, #tpu.memory_space<vmem>>, %arg4: memref<1x24x64xbf16, #tpu.memory_space<vmem>>, %arg5: memref<1x24x64xbf16, #tpu.memory_space<vmem>>, %arg6: memref<24x576xbf16, #tpu.memory_space<vmem>>) attributes {dimension_semantics = [#tpu.dimension_semantics<parallel>], iteration_bounds = array<i64: 2>, scalar_prefetch = 0 : i64, scratch_operands = 1 : i64, tpu.core_type = #tpu.core_type<tc>, window_params = [{transform_indices = @transform_0, window_bounds = array<i64: 1, 42, 64>}, {pipeline_mode = #tpu.pipeline_mode<synchronous>, transform_indices = @transform_1, window_bounds = array<i64: 576, 64>}, {pipeline_mode = #tpu.pipeline_mode<synchronous>, transform_indices = @transform_2, window_bounds = array<i64: 1, 64>}, {transform_indices = @transform_3, window_bounds = array<i64: 1, 24, 64>}, {transform_indices = @transform_4, window_bounds = array<i64: 1, 24, 64>}]} {
    %c0 = arith.constant 0 : index
    %c0_0 = arith.constant 0 : index
    %c0_1 = arith.constant 0 : index
    %0 = vector.load %arg1[%c0, %c0_0, %c0_1] : memref<1x42x64xbf16, #tpu.memory_space<vmem>>, vector<1x24x64xbf16>
    %1 = vector.shape_cast %0 : vector<1x24x64xbf16> to vector<24x64xbf16>
    %c0_2 = arith.constant 0 : index
    %c0_3 = arith.constant 0 : index
    %2 = vector.load %arg6[%c0_2, %c0_3] : memref<24x576xbf16, #tpu.memory_space<vmem>>, vector<24x64xbf16>
    tpu.vector_store %arg6[%c0_2, %c0_3], %1 {strides = array<i32>} : memref<24x576xbf16, #tpu.memory_space<vmem>>, vector<24x64xbf16>,
    %c0_4 = arith.constant 0 : index
    %c1 = arith.constant 1 : index
    %c0_5 = arith.constant 0 : index
    %3 = vector.load %arg1[%c0_4, %c1, %c0_5] : memref<1x42x64xbf16, #tpu.memory_space<vmem>>, vector<1x24x64xbf16>
    %4 = vector.shape_cast %3 : vector<1x24x64xbf16> to vector<24x64xbf16>
    %c0_6 = arith.constant 0 : index
    %c64 = arith.constant 64 : index
    %5 = vector.load %arg6[%c0_6, %c64] : memref<24x576xbf16, #tpu.memory_space<vmem>>, vector<24x64xbf16>
    tpu.vector_store %arg6[%c0_6, %c64], %4 {strides = array<i32>} : memref<24x576xbf16, #tpu.memory_space<vmem>>, vector<24x64xbf16>,
    %c0_7 = arith.constant 0 : index
    %c2 = arith.constant 2 : index
    %c0_8 = arith.constant 0 : index
    %6 = vector.load %arg1[%c0_7, %c2, %c0_8] : memref<1x42x64xbf16, #tpu.memory_space<vmem>>, vector<1x24x64xbf16>
    %7 = vector.shape_cast %6 : vector<1x24x64xbf16> to vector<24x64xbf16>
    %c0_9 = arith.constant 0 : index
    %c128 = arith.constant 128 : index
    %8 = vector.load %arg6[%c0_9, %c128] : memref<24x576xbf16, #tpu.memory_space<vmem>>, vector<24x64xbf16>
    tpu.vector_store %arg6[%c0_9, %c128], %7 {strides = array<i32>} : memref<24x576xbf16, #tpu.memory_space<vmem>>, vector<24x64xbf16>,
    %c0_10 = arith.constant 0 : index
    %c6 = arith.constant 6 : index
    %c0_11 = arith.constant 0 : index
    %9 = vector.load %arg1[%c0_10, %c6, %c0_11] : memref<1x42x64xbf16, #tpu.memory_space<vmem>>, vector<1x24x64xbf16>
    %10 = vector.shape_cast %9 : vector<1x24x64xbf16> to vector<24x64xbf16>
    %c0_12 = arith.constant 0 : index
    %c192 = arith.constant 192 : index
    %11 = vector.load %arg6[%c0_12, %c192] : memref<24x576xbf16, #tpu.memory_space<vmem>>, vector<24x64xbf16>
    tpu.vector_store %arg6[%c0_12, %c192], %10 {strides = array<i32>} : memref<24x576xbf16, #tpu.memory_space<vmem>>, vector<24x64xbf16>,
    %c0_13 = arith.constant 0 : index
    %c7 = arith.constant 7 : index
    %c0_14 = arith.constant 0 : index
    %12 = vector.load %arg1[%c0_13, %c7, %c0_14] : memref<1x42x64xbf16, #tpu.memory_space<vmem>>, vector<1x24x64xbf16>
    %13 = vector.shape_cast %12 : vector<1x24x64xbf16> to vector<24x64xbf16>
    %c0_15 = arith.constant 0 : index
    %c256 = arith.constant 256 : index
    %14 = vector.load %arg6[%c0_15, %c256] : memref<24x576xbf16, #tpu.memory_space<vmem>>, vector<24x64xbf16>
    tpu.vector_store %arg6[%c0_15, %c256], %13 {strides = array<i32>} : memref<24x576xbf16, #tpu.memory_space<vmem>>, vector<24x64xbf16>,
    %c0_16 = arith.constant 0 : index
    %c8 = arith.constant 8 : index
    %c0_17 = arith.constant 0 : index
    %15 = vector.load %arg1[%c0_16, %c8, %c0_17] : memref<1x42x64xbf16, #tpu.memory_space<vmem>>, vector<1x24x64xbf16>
    %16 = vector.shape_cast %15 : vector<1x24x64xbf16> to vector<24x64xbf16>
    %c0_18 = arith.constant 0 : index
    %c320 = arith.constant 320 : index
    %17 = vector.load %arg6[%c0_18, %c320] : memref<24x576xbf16, #tpu.memory_space<vmem>>, vector<24x64xbf16>
    tpu.vector_store %arg6[%c0_18, %c320], %16 {strides = array<i32>} : memref<24x576xbf16, #tpu.memory_space<vmem>>, vector<24x64xbf16>,
    %c0_19 = arith.constant 0 : index
    %c12 = arith.constant 12 : index
    %c0_20 = arith.constant 0 : index
    %18 = vector.load %arg1[%c0_19, %c12, %c0_20] : memref<1x42x64xbf16, #tpu.memory_space<vmem>>, vector<1x24x64xbf16>
    %19 = vector.shape_cast %18 : vector<1x24x64xbf16> to vector<24x64xbf16>
    %c0_21 = arith.constant 0 : index
    %c384 = arith.constant 384 : index
    %20 = vector.load %arg6[%c0_21, %c384] : memref<24x576xbf16, #tpu.memory_space<vmem>>, vector<24x64xbf16>
    tpu.vector_store %arg6[%c0_21, %c384], %19 {strides = array<i32>} : memref<24x576xbf16, #tpu.memory_space<vmem>>, vector<24x64xbf16>,
    %c0_22 = arith.constant 0 : index
    %c13 = arith.constant 13 : index
    %c0_23 = arith.constant 0 : index
    %21 = vector.load %arg1[%c0_22, %c13, %c0_23] : memref<1x42x64xbf16, #tpu.memory_space<vmem>>, vector<1x24x64xbf16>
    %22 = vector.shape_cast %21 : vector<1x24x64xbf16> to vector<24x64xbf16>
    %c0_24 = arith.constant 0 : index
    %c448 = arith.constant 448 : index
    %23 = vector.load %arg6[%c0_24, %c448] : memref<24x576xbf16, #tpu.memory_space<vmem>>, vector<24x64xbf16>
    tpu.vector_store %arg6[%c0_24, %c448], %22 {strides = array<i32>} : memref<24x576xbf16, #tpu.memory_space<vmem>>, vector<24x64xbf16>,
    %c0_25 = arith.constant 0 : index
    %c14 = arith.constant 14 : index
    %c0_26 = arith.constant 0 : index
    %24 = vector.load %arg1[%c0_25, %c14, %c0_26] : memref<1x42x64xbf16, #tpu.memory_space<vmem>>, vector<1x24x64xbf16>
    %25 = vector.shape_cast %24 : vector<1x24x64xbf16> to vector<24x64xbf16>
    %c0_27 = arith.constant 0 : index
    %c512 = arith.constant 512 : index
    %26 = vector.load %arg6[%c0_27, %c512] : memref<24x576xbf16, #tpu.memory_space<vmem>>, vector<24x64xbf16>
    tpu.vector_store %arg6[%c0_27, %c512], %25 {strides = array<i32>} : memref<24x576xbf16, #tpu.memory_space<vmem>>, vector<24x64xbf16>,
    %c0_28 = arith.constant 0 : index
    %c0_29 = arith.constant 0 : index
    %27 = vector.load %arg6[%c0_28, %c0_29] : memref<24x576xbf16, #tpu.memory_space<vmem>>, vector<24x576xbf16>
    %c0_30 = arith.constant 0 : index
    %c0_31 = arith.constant 0 : index
    %28 = vector.load %arg2[%c0_30, %c0_31] : memref<576x64xbf16, #tpu.memory_space<vmem>>, vector<576x64xbf16>
    %cst = arith.constant dense<0.000000e+00> : vector<24x64xf32>
    %29 = tpu.matmul %27, %28, %cst {dimension_numbers = #tpu.dot_dimension_numbers<[1], [0], [0], [1], [0, 0, 1, 1], [], []>} : vector<24x576xbf16>, vector<576x64xbf16>, vector<24x64xf32> -> vector<24x64xf32>
    %c0_32 = arith.constant 0 : index
    %c0_33 = arith.constant 0 : index
    %30 = vector.load %arg3[%c0_32, %c0_33] : memref<1x64xf32, #tpu.memory_space<vmem>>, vector<1x64xf32>
    %31 = vector.broadcast %30 : vector<1x64xf32> to vector<24x64xf32>
    %32 = arith.addf %29, %31 : vector<24x64xf32>
    %c0_34 = arith.constant 0 : index
    %c0_35 = arith.constant 0 : index
    %c0_36 = arith.constant 0 : index
    %33 = vector.load %arg4[%c0_34, %c0_35, %c0_36] : memref<1x24x64xbf16, #tpu.memory_space<vmem>>, vector<1x24x64xbf16>
    %34 = vector.shape_cast %33 : vector<1x24x64xbf16> to vector<24x64xbf16>
    %35 = arith.extf %34 : vector<24x64xbf16> to vector<24x64xf32>
    %36 = arith.addf %32, %35 : vector<24x64xf32>
    %cst_37 = arith.constant 0.000000e+00 : f32
    %37 = vector.broadcast %cst_37 : f32 to vector<24x64xf32>
    %38 = arith.maximumf %36, %37 : vector<24x64xf32>
    %39 = arith.truncf %38 : vector<24x64xf32> to vector<24x64xbf16>
    %c0_38 = arith.constant 0 : index
    %c0_39 = arith.constant 0 : index
    %c0_40 = arith.constant 0 : index
    %40 = vector.load %arg5[%c0_38, %c0_39, %c0_40] : memref<1x24x64xbf16, #tpu.memory_space<vmem>>, vector<1x24x64xbf16>
    %41 = vector.shape_cast %40 : vector<1x24x64xbf16> to vector<24x64xbf16>
    %42 = vector.shape_cast %39 : vector<24x64xbf16> to vector<1x24x64xbf16>
    tpu.vector_store %arg5[%c0_38, %c0_39, %c0_40], %42 {strides = array<i32>} : memref<1x24x64xbf16, #tpu.memory_space<vmem>>, vector<1x24x64xbf16>,
    return
  }
  func.func @transform_0(%arg0: i32) -> (i32, i32, i32) {
    %c0_i32 = arith.constant 0 : i32
    %c0_i32_0 = arith.constant 0 : i32
    %c0_i32_1 = arith.constant 0 : i32
    return %arg0, %c0_i32, %c0_i32_0 : i32, i32, i32
  }
  func.func @transform_1(%arg0: i32) -> (i32, i32) {
    %c0_i32 = arith.constant 0 : i32
    %c0_i32_0 = arith.constant 0 : i32
    %c0_i32_1 = arith.constant 0 : i32
    return %c0_i32, %c0_i32_0 : i32, i32
  }
  func.func @transform_2(%arg0: i32) -> (i32, i32) {
    %c0_i32 = arith.constant 0 : i32
    %c0_i32_0 = arith.constant 0 : i32
    %c0_i32_1 = arith.constant 0 : i32
    return %c0_i32, %c0_i32_0 : i32, i32
  }
  func.func @transform_3(%arg0: i32) -> (i32, i32, i32) {
    %c0_i32 = arith.constant 0 : i32
    %c0_i32_0 = arith.constant 0 : i32
    %c0_i32_1 = arith.constant 0 : i32
    return %arg0, %c0_i32, %c0_i32_0 : i32, i32, i32
  }
  func.func @transform_4(%arg0: i32) -> (i32, i32, i32) {
    %c0_i32 = arith.constant 0 : i32
    %c0_i32_0 = arith.constant 0 : i32
    %c0_i32_1 = arith.constant 0 : i32
    return %arg0, %c0_i32, %c0_i32_0 : i32, i32, i32
  }
}

module attributes {stable_mosaic.version = 11 : i64} {
  func.func @_pool_mean_kernel(%arg0: i32, %arg1: memref<1x4x4x64xbf16, #tpu.memory_space<vmem>>, %arg2: memref<1x4x4x1xf32, #tpu.memory_space<vmem>>) attributes {dimension_semantics = [#tpu.dimension_semantics<parallel>], iteration_bounds = array<i64: 2>, scalar_prefetch = 0 : i64, scratch_operands = 0 : i64, tpu.core_type = #tpu.core_type<tc>, window_params = [{transform_indices = @transform_0, window_bounds = array<i64: 1, 4, 4, 64>}, {transform_indices = @transform_1, window_bounds = array<i64: 1, 4, 4, 1>}]} {
    %c0 = arith.constant 0 : index
    %c0_0 = arith.constant 0 : index
    %c0_1 = arith.constant 0 : index
    %c0_2 = arith.constant 0 : index
    %0 = vector.load %arg1[%c0, %c0_0, %c0_1, %c0_2] : memref<1x4x4x64xbf16, #tpu.memory_space<vmem>>, vector<1x4x4x64xbf16>
    %1 = vector.shape_cast %0 : vector<1x4x4x64xbf16> to vector<4x4x64xbf16>
    %2 = arith.extf %1 : vector<4x4x64xbf16> to vector<4x4x64xf32>
    %cst = arith.constant dense<0.000000e+00> : vector<4x4xf32>
    %3 = vector.multi_reduction <add>, %2, %cst [2] : vector<4x4x64xf32> to vector<4x4xf32>
    %4 = vector.shape_cast %3 : vector<4x4xf32> to vector<4x4x1xf32>
    %cst_3 = arith.constant 6.400000e+01 : f32
    %5 = vector.broadcast %cst_3 : f32 to vector<4x4x1xf32>
    %6 = arith.divf %4, %5 : vector<4x4x1xf32>
    %c0_4 = arith.constant 0 : index
    %c0_5 = arith.constant 0 : index
    %c0_6 = arith.constant 0 : index
    %c0_7 = arith.constant 0 : index
    %7 = vector.load %arg2[%c0_4, %c0_5, %c0_6, %c0_7] : memref<1x4x4x1xf32, #tpu.memory_space<vmem>>, vector<1x4x4x1xf32>
    %8 = vector.shape_cast %7 : vector<1x4x4x1xf32> to vector<4x4x1xf32>
    %9 = vector.shape_cast %6 : vector<4x4x1xf32> to vector<1x4x4x1xf32>
    tpu.vector_store %arg2[%c0_4, %c0_5, %c0_6, %c0_7], %9 {strides = array<i32>} : memref<1x4x4x1xf32, #tpu.memory_space<vmem>>, vector<1x4x4x1xf32>,
    return
  }
  func.func @transform_0(%arg0: i32) -> (i32, i32, i32, i32) {
    %c0_i32 = arith.constant 0 : i32
    %c0_i32_0 = arith.constant 0 : i32
    %c0_i32_1 = arith.constant 0 : i32
    %c0_i32_2 = arith.constant 0 : i32
    return %arg0, %c0_i32, %c0_i32_0, %c0_i32_1 : i32, i32, i32, i32
  }
  func.func @transform_1(%arg0: i32) -> (i32, i32, i32, i32) {
    %c0_i32 = arith.constant 0 : i32
    %c0_i32_0 = arith.constant 0 : i32
    %c0_i32_1 = arith.constant 0 : i32
    %c0_i32_2 = arith.constant 0 : i32
    return %arg0, %c0_i32, %c0_i32_0, %c0_i32_1 : i32, i32, i32, i32
  }
}

</mosaic_0001>

<bundles_post_ra>
// kernel: _lambda_.8
= control target key start
LH: loop header
LB: loop body
LE: loop exit
PB: predicated region body
PF: predicated region fallthrough
CT: control target
= control target key end

     0   :  { %s450_s6 = smov 0   ;;  %s549_s0 = inlined_call_operand.vmem [shape: bf16[2,5,5,256], index: 0, kind: input, shape index: {}]   ;;  %s550_s1 = inlined_call_operand.vmem [shape: bf16[2,4,4,64], index: 1, kind: output, shape index: {}]  }
   0x1 LB: > { %s402_s7 = sadd.s32 4294967295, %s437_s6   ;;  %p406_p0 = scmp.ge.s32.totalorder %s437_s6, 1  ;;  %s437_s6 = sphi %s450_s6, %s11_s6  }
   0x2   : > { %p87_p1 = scmp.lt.s32.totalorder %s437_s6, 3 }
   0x4   : > { %p88_p2 = pnand %p406_p0, %p87_p1 }
   0x5   : > { %p107_p3 = scmp.lt.s32.totalorder (!%p88_p2), %s402_s7, 1  ;;  %s439_s12 = smov (!%p88_p2), 64   ;;  %vm342_vm0 = vcmask (!%p88_p2), 517120  }
   0x6   : > { %91 = sbr.rel (%p88_p2) target bundleno = 158 (0x9e), region = 24 }
   0xd   : > { %s552_s7 = smov (!%p107_p3, %s402_s7), 1 }
   0xe   : > { %s421_s8 = smul.u32 40, %s552_s7  ;;  %s420_s13 = sshll.u32 %s552_s7, 3 }
   0xf   : > { %s116_s16 = scalar_lea.vmem %s550_s1, %s420_s13 }
  0x10   : > { %s464_s11 = scalar_lea.vmem %s549_s0, %s421_s8 }
  0x11   : > { %v467_v0 = vld [vmem:[%s464_s11 + $0x10] sm:$0x3]  ;;  %v470_v1 = vld [vmem:[%s464_s11] sm:$0x3]  ;;  %v475_v2 = vld [vmem:[%s464_s11 + $0x18] sm:$0x3] }
  0x12   : > { %129 = vrot.lane.b32.xlu1 %v467_v0, %s439_s12  ;;  %125 = vrot.lane.b32.xlu0 %v470_v1, %s439_s12  ;;  %v478_v3 = vld [vmem:[%s464_s11 + $0x8] sm:$0x3]  ;;  %v483_v4 = vld [vmem:[%s464_s11 + $0xc] sm:$0x3] }
  0x13   : > { %v486_v5 = vld [vmem:[%s464_s11 + $0x4] sm:$0x3]  ;;  %v491_v6 = vld [vmem:[%s464_s11 + $0x1c] sm:$0x3]  ;;  %v494_v7 = vld [vmem:[%s464_s11 + $0x14] sm:$0x3] }
  0x14   : > { %v499_v8 = vld [vmem:[%s464_s11 + $0x10] sm:$0x3]  ;;  %v502_v9 = vld [vmem:[%s464_s11 + $0x8] sm:$0x3]  ;;  %v507_v10 = vld [vmem:[%s464_s11 + $0x20] sm:$0x3] }
  0x15   : > { %v510_v11 = vld [vmem:[%s464_s11 + $0x18] sm:$0x3]  ;;  %v141_v12 = vld [vmem:[%s464_s11] sm:$0x7]  ;;  %v143_v13 = vld [vmem:[%s464_s11 + $0x10] sm:$0x7] }
  0x16   : > { %131 = vrot.lane.b32.xlu1 %v475_v2, %s439_s12  ;;  %127 = vrot.lane.b32.xlu0 %v478_v3, %s439_s12  ;;  %v146_v14 = vshrl.u32 %v141_v12, 16  ;;  %v149_v15 = vshll.u32 %v141_v12, 16  ;;  %v144_v16 = vld [vmem:[%s464_s11 + $0x18] sm:$0x7]  ;;  %v142_v17 = vld [vmem:[%s464_s11 + $0x8] sm:$0x7] }
  0x17   : > { %v164_v18 = vshrl.u32 %v143_v13, 16  ;;  %v167_v19 = vshll.u32 %v143_v13, 16  ;;  %v173_v20 = vshrl.u32 %v144_v16, 16  ;;  %v217_v21 = vld [vmem:[%s464_s11 + $0x4] sm:$0x7]  ;;  %v176_v24 = vshll.u32 %v144_v16, 16 }
  0x18   : > { %v148_v22 = vrot.slane %v146_v14, 4  ;;  %v151_v23 = vrot.slane %v149_v15, 5  ;;  %v155_v25 = vshrl.u32 %v142_v17, 16  ;;  %v158_v26 = vshll.u32 %v142_v17, 16  ;;  %v218_v27 = vld [vmem:[%s464_s11 + $0xc] sm:$0x7] }
  0x19   : > { %v222_v28 = vshrl.u32 %v217_v21, 16  ;;  %v225_v29 = vshll.u32 %v217_v21, 16  ;;  %v220_v30 = vld [vmem:[%s464_s11 + $0x1c] sm:$0x7]  ;;  %v166_v31 = vrot.slane %v164_v18, 4  ;;  %v169_v32 = vrot.slane %v167_v19, 5 }
  0x1a   : > { %203 = vrot.lane.b32.xlu1 %v483_v4, %s439_s12  ;;  %201 = vrot.lane.b32.xlu0 %v486_v5, %s439_s12  ;;  %v175_v33 = vrot.slane %v173_v20, 4  ;;  %v219_v34 = vld [vmem:[%s464_s11 + $0x14] sm:$0x7]  ;;  %v152_v35 = vor.u32 %v151_v23, %v148_v22  ;;  %v178_v36 = vrot.slane %v176_v24, 5  ;;  %v231_v37 = vshrl.u32 %v218_v27, 16 }
  0x1b   : > { %v234_v38 = vshll.u32 %v218_v27, 16  ;;  %v157_v39 = vrot.slane %v155_v25, 4  ;;  %v160_v40 = vrot.slane %v158_v26, 5  ;;  %v249_v41 = vshrl.u32 %v220_v30, 16  ;;  %v415_v47 = vld [vmem:[%s464_s11 + $0x10] sm:$0x7] }
  0x1c   : > { %v252_v42 = vshll.u32 %v220_v30, 16  ;;  %v224_v43 = vrot.slane %v222_v28, 4  ;;  %v227_v44 = vrot.slane %v225_v29, 5  ;;  %v240_v45 = vshrl.u32 %v219_v34, 16  ;;  %v414_v53 = vld [vmem:[%s464_s11 + $0x8] sm:$0x7] }
  0x1d   : > { %v243_v46 = vshll.u32 %v219_v34, 16  ;;  %v170_v48 = vor.u32 %v169_v32, %v166_v31  ;;  %v153_v49 = vrot.slane %v152_v35, 4  ;;  %v179_v50 = vor.u32 %v178_v36, %v175_v33  ;;  %v417_v18 = vld [vmem:[%s464_s11 + $0x20] sm:$0x7]  ;;  %v416_v23 = vld [vmem:[%s464_s11 + $0x18] sm:$0x7] }
  0x1e   : > { %207 = vrot.lane.b32.xlu1 %v491_v6, %s439_s12  ;;  %205 = vrot.lane.b32.xlu0 %v494_v7, %s439_s12  ;;  %v233_v51 = vrot.slane %v231_v37, 4  ;;  %v236_v52 = vrot.slane %v234_v38, 5  ;;  %v161_v54 = vor.u32 %v160_v40, %v157_v39  ;;  %v251_v55 = vrot.slane %v249_v41, 4 }
  0x1f   : > { %v254_v56 = vrot.slane %v252_v42, 5  ;;  %v308_v57 = vshrl.u32 %v415_v47, 16  ;;  %v228_v60 = vor.u32 %v227_v44, %v224_v43  ;;  %v242_v61 = vrot.slane %v240_v45, 4 }
  0x20   : > { %v245_v62 = vrot.slane %v243_v46, 5  ;;  %v311_v63 = vshll.u32 %v415_v47, 16  ;;  %v299_v13 = vshrl.u32 %v414_v53, 16  ;;  %v171_v14 = vrot.slane %v170_v48, 4 }
  0x21   : > { %v180_v15 = vrot.slane %v179_v50, 4  ;;  %v237_v16 = vor.u32 %v236_v52, %v233_v51  ;;  %v302_v17 = vshll.u32 %v414_v53, 16  ;;  %v162_v21 = vrot.slane %v161_v54, 4 }
  0x22   : > { %280 = vrot.lane.b32.xlu1 %v499_v8, %s439_s12  ;;  %278 = vrot.lane.b32.xlu0 %v502_v9, %s439_s12  ;;  %v310_v22 = vrot.slane %v308_v57, 4  ;;  %v229_v26 = vrot.slane %v228_v60, 4  ;;  %v255_v27 = vor.u32 %v254_v56, %v251_v55  ;;  %v246_v28 = vor.u32 %v245_v62, %v242_v61 }
  0x23   : > { %v313_v29 = vrot.slane %v311_v63, 5  ;;  %v301_v31 = vrot.slane %v299_v13, 4  ;;  %v326_v32 = vshrl.u32 %v417_v18, 16  ;;  %v304_v33 = vrot.slane %v302_v17, 5 }
  0x24   : > { %v329_v34 = vshll.u32 %v417_v18, 16  ;;  %v317_v35 = vshrl.u32 %v416_v23, 16  ;;  %v238_v40 = vrot.slane %v237_v16, 4  ;;  %v256_v43 = vrot.slane %v255_v27, 4 }
  0x25   : > { %v247_v44 = vrot.slane %v246_v28, 4  ;;  %v328_v46 = vrot.slane %v326_v32, 4  ;;  %v305_v47 = vor.u32 %v304_v33, %v301_v31 }
  0x26   : > { %284 = vrot.lane.b32.xlu1 %v507_v10, %s439_s12  ;;  %282 = vrot.lane.b32.xlu0 %v510_v11, %s439_s12  ;;  %v331_v48 = vrot.slane %v329_v34, 5 }
  0x28   : > { %v332_v60 = vor.u32 %v331_v48, %v328_v46 }
  0x2a   : > { %v333_v16 = vrot.slane %v332_v60, 4 }
  0x84   : > { %v130_v58 = vpop.permute.xlu1 %129  ;;  %v126_v59 = vpop.permute.xlu0 %125 }
  0x85   : > { %v137_v12 = vmax.bf16 %v126_v59, %v470_v1  ;;  %v139_v19 = vmax.bf16 %v130_v58, %v467_v0  ;;  %v320_v0 = vshll.u32 %v416_v23, 16  ;;  %v306_v59 = vrot.slane %v305_v47, 4 }
  0x87   : > { %v185_v20 = vmax.bf16 %v153_v49, %v137_v12  ;;  %v187_v36 = vmax.bf16 %v171_v14, %v139_v19  ;;  %v319_v49 = vrot.slane %v317_v35, 4  ;;  %v322_v50 = vrot.slane %v320_v0, 5 }
  0x88   : > { %v132_v24 = vpop.permute.xlu1 %131  ;;  %v128_v25 = vpop.permute.xlu0 %127 }
  0x89   : > { %v140_v1 = vmax.bf16 %v132_v24, %v475_v2  ;;  %v138_v30 = vmax.bf16 %v128_v25, %v478_v3  ;;  %v193_v39 = vmax.bf16 %v486_v5, %v185_v20  ;;  %v314_v3 = vor.u32 %v313_v29, %v310_v22 }
  0x8a   : > { %v195_v5 = vmax.bf16 %v494_v7, %v187_v36  ;;  %v323_v61 = vor.u32 %v322_v50, %v319_v49 }
  0x8b   : > { %v188_v37 = vmax.bf16 %v180_v15, %v140_v1  ;;  %v186_v38 = vmax.bf16 %v162_v21, %v138_v30 }
  0x8c   : > { %v204_v41 = vpop.permute.xlu1 %203  ;;  %v202_v42 = vpop.permute.xlu0 %201  ;;  %v324_v17 = vrot.slane %v323_v61, 4 }
  0x8d   : > { %v194_v2 = vmax.bf16 %v483_v4, %v186_v38  ;;  %v213_v45 = vmax.bf16 %v202_v42, %v193_v39  ;;  %v196_v53 = vmax.bf16 %v491_v6, %v188_v37  ;;  %v315_v4 = vrot.slane %v314_v3, 4 }
  0x8f   : > { %v214_v51 = vmax.bf16 %v204_v41, %v194_v2  ;;  %v261_v52 = vmax.bf16 %v229_v26, %v213_v45 }
  0x90   : > { %v208_v54 = vpop.permute.xlu1 %207  ;;  %v206_v55 = vpop.permute.xlu0 %205 }
  0x91   : > { %v262_v56 = vmax.bf16 %v238_v40, %v214_v51  ;;  %v216_v57 = vmax.bf16 %v208_v54, %v196_v53  ;;  %v215_v58 = vmax.bf16 %v206_v55, %v195_v5  ;;  %v270_v13 = vmax.bf16 %v502_v9, %v261_v52 }
  0x93   : > { %v264_v62 = vmax.bf16 %v256_v43, %v216_v57  ;;  %v263_v63 = vmax.bf16 %v247_v44, %v215_v58  ;;  %v271_v12 = vmax.bf16 %v499_v8, %v262_v56 }
  0x94   : > { %v281_v14 = vpop.permute.xlu1 %280  ;;  %v279_v6 = vpop.permute.xlu0 %278 }
  0x95   : > { %v291_v15 = vmax.bf16 %v281_v14, %v271_v12  ;;  %v290_v7 = vmax.bf16 %v279_v6, %v270_v13  ;;  %v273_v20 = vmax.bf16 %v507_v10, %v264_v62  ;;  %v272_v21 = vmax.bf16 %v510_v11, %v263_v63 }
  0x97   : > { %v339_v18 = vmax.bf16 %v315_v4, %v291_v15  ;;  %v338_v19 = vmax.bf16 %v306_v59, %v290_v7 }
  0x98   : > { %v285_v8 = vpop.permute.xlu1 %284  ;;  %v283_v22 = vpop.permute.xlu0 %282 }
  0x99   : > { %344 = vst.msk [vmem:[%s116_s16 + $0x2] sm:$0x3] %vm342_vm0, %v339_v18  ;;  %343 = vst.msk [vmem:[%s116_s16] sm:$0x3] %vm342_vm0, %v338_v19  ;;  %v293_v9 = vmax.bf16 %v285_v8, %v273_v20  ;;  %v292_v23 = vmax.bf16 %v283_v22, %v272_v21 }
  0x9b   : > { %v341_v24 = vmax.bf16 %v333_v16, %v293_v9  ;;  %v340_v25 = vmax.bf16 %v324_v17, %v292_v23 }
  0x9d   : > { %346 = vst.msk [vmem:[%s116_s16 + $0x6] sm:$0x3] %vm342_vm0, %v341_v24  ;;  %345 = vst.msk [vmem:[%s116_s16 + $0x4] sm:$0x3] %vm342_vm0, %v340_v25 }
  0x9e PF: > { %s11_s6 = sadd.s32 1, %s437_s6  }
  0x9f   : > { %p8_p4 = scmp.ge.s32.totalorder %s11_s6, 4  }
  0xa1   :  { %10 = sbr.rel (!%p8_p4) target bundleno = 1 (0x1), region = 55 }

// kernel: _lambda_.7
= control target key start
LH: loop header
LB: loop body
LE: loop exit
PB: predicated region body
PF: predicated region fallthrough
CT: control target
= control target key end

     0   :  { %s2873_s12 = smov 0   ;;  %s4397_s0 = inlined_call_operand.vmem [shape: bf16[2,132,16], index: 0, kind: input, shape index: {}]   ;;  %s4398_s1 = inlined_call_operand.vmem [shape: bf16[256,64], index: 1, kind: input, shape index: {}]   ;;  %s4399_s2 = inlined_call_operand.vmem [shape: f32[1,64], index: 2, kind: input, shape index: {}]   ;;  %s4400_s3 = inlined_call_operand.vmem [shape: bf16[2,88,64], index: 3, kind: output, shape index: {}]  }
   0x1 LB: > { %s2650_s13 = sadd.s32 4294967295, %s2844_s12   ;;  %p2654_p0 = scmp.ge.s32.totalorder %s2844_s12, 1  ;;  %s2844_s12 = sphi %s2873_s12, %s13_s12  }
   0x2   : > { %p137_p1 = scmp.lt.s32.totalorder %s2844_s12, 3 }
   0x4   : > { %p138_p2 = pnand %p2654_p0, %p137_p1 }
   0x6   : > { %141 = sbr.rel (%p138_p2) target bundleno = 676 (0x2a4), region = 32 }
   0xd   : > { %p161_p3 = scmp.lt.s32.totalorder %s2650_s13, 1  ;;  %vm393_vm0 = vcmask 1042432   ;;  %vm394_vm1 = vcmask 1046532   ;;  %vm1310_vm2 = vsmask.f32 256  ;;  %s2846_s18 = smov 32  }
   0xe   : > { %vm1311_vm3 = vsmask.f32 4368  ;;  %vm207_vm4 = vsmask.f32 3328  ;;  %vm208_vm5 = vsmask.f32 7440  ;;  %vm2897_vm6 = vmor %vm393_vm0, %vm394_vm1 }
   0xf   : > { %s4543_s13 = smov (!%p161_p3, %s2650_s13), 1  ;;  %vm2921_vm7 = vmor %vm1310_vm2, %vm1311_vm3  ;;  %vm487_vm8 = vsmask.f32 2304  ;;  %vm488_vm10 = vsmask.f32 6416  ;;  %s2847_s19 = smov 16  }
  0x10   : > { %s2785_s14 = smul.u32 68, %s4543_s13  ;;  %vm2934_vm9 = vmor %vm207_vm4, %vm208_vm5  ;;  %s2848_s20 = smov 48   ;;  %vm852_vm12 = vcmask 1041408   ;;  %vm853_vm13 = vcmask 1045508   ;;  %vm946_vm15 = vsmask.f32 1280 }
  0x11   : > { %vm2971_vm11 = vmor %vm487_vm8, %vm488_vm10  ;;  %s2849_s21 = smov 64   ;;  %s2850_s22 = smov 80   ;;  %vm947_vm0 = vsmask.f32 5392  ;;  %vm183_vm2 = vcmask 125952   ;;  %vm1136_vm3 = vcmask 1040384  }
  0x12   : > { %s2887_s17 = scalar_lea.vmem %s4397_s0, %s2785_s14  ;;  %vm3079_vm14 = vmor %vm852_vm12, %vm853_vm13  ;;  %s2851_s4 = smov 96   ;;  %vm1137_vm4 = vcmask 1044484   ;;  %vm357_vm8 = vcmask 257152   ;;  %vm463_vm10 = vcmask 388352   ;;  %vm641_vm12 = vcmask 519552  }
  0x13   : > { %v1461_v0 = vld [vmem:[%s2887_s17 + $0x10] sm:$0xf]  ;;  %v1460_v1 = vld [vmem:[%s2887_s17 + $0xc] sm:$0xf]  ;;  %v370_v2 = vld [vmem:[%s2887_s17 + $0x4] sm:$0xf] }
  0x14   : > { %1484 = vrot.lane.b32.xlu1 %v1461_v0, %s2846_s18  ;;  %1482 = vrot.lane.b32.xlu0 %v1460_v1, %s2846_s18  ;;  %v2895_v3 = vld [vmem:[%s2887_s17 + $0x8] sm:$0xf]  ;;  %v398_v5 = vrot.slane %v370_v2, 5  ;;  %v369_v6 = vld [vmem:[%s2887_s17] sm:$0xe]  ;;  %vm3173_vm1 = vmor %vm946_vm15, %vm947_vm0  ;;  %s2852_s27 = smov 112  }
  0x15   : > { %v4406_v7 = vrot.slane %v2895_v3, 5  ;;  %v2657_v8 = vrot.slane %v369_v6, 9  ;;  %v1298_v9 = vld [vmem:[%s2887_s17 + $0x8] sm:$0x8]  ;;  %v1299_v10 = vld [vmem:[%s2887_s17 + $0xc] sm:$0xf]  ;;  %vm3287_vm5 = vmor %vm1136_vm3, %vm1137_vm4 }
  0x16   : > { %v400_v11 = vrot.slane %v398_v5, 4  ;;  %v1314_v12 = vshrl.u32 %v1298_v9, 16  ;;  %v1319_v13 = vshrl.u32 %v1299_v10, 16  ;;  %v1322_v14 = vshll.u32 %v1299_v10, 16  ;;  %v195_v15 = vld [vmem:[%s2887_s17] sm:$0xf] }
  0x17   : > { %v399_v16 = vsel %vm2897_vm6, %v2657_v8, %v398_v5  ;;  %v196_v17 = vld [vmem:[%s2887_s17 + $0x4] sm:$0xf]  ;;  %v211_v18 = vshrl.u32 %v195_v15, 16  ;;  %v214_v19 = vshll.u32 %v195_v15, 16  ;;  %v1300_v20 = vld [vmem:[%s2887_s17 + $0x10] sm:$0xf] }
  0x18   : > { %v402_v21 = vsel %vm2897_vm6, %v400_v11, %v4406_v7  ;;  %430 = vrot.lane.b32.xlu0 %v399_v16, %s2846_s18  ;;  %v2661_v22 = vrot.slane %v1314_v12, 11  ;;  %v1321_v23 = vrot.slane %v1319_v13, 7  ;;  %v220_v24 = vshll.u32 %v196_v17, 16  ;;  %v2916_v25 = vld [vmem:[%s2887_s17 + $0x8] sm:$0xf] }
  0x19   : > { %432 = vrot.lane.b32.xlu1 %v402_v21, %s2846_s18  ;;  %v213_v27 = vrot.slane %v211_v18, 4  ;;  %v216_v28 = vrot.slane %v214_v19, 5  ;;  %v224_v29 = vshrl.u32 %v196_v17, 16  ;;  %v1328_v30 = vshrl.u32 %v1300_v20, 16  ;;  %v202_v31 = vld [vmem:[%s2887_s17 + $0x1c] sm:$0xf] }
  0x1a   : > { %v1324_v32 = vor.u32 %v1322_v14, %v1321_v23  ;;  %v222_v33 = vrot.slane %v220_v24, 5  ;;  %v1326_v34 = vrot.slane %v1321_v23, 4  ;;  %v1331_v35 = vshll.u32 %v1300_v20, 16  ;;  %v203_v40 = vld [vmem:[%s2887_s17 + $0x20] sm:$0xf] }
  0x1b   : > { %v217_v36 = vor.u32 %v216_v28, %v213_v27  ;;  %v2926_v37 = vrot.slane %v1328_v30, 7  ;;  %v226_v38 = vrot.slane %v224_v29, 4  ;;  %v230_v39 = vshll.u32 %v2916_v25, 16  ;;  %v201_v45 = vld [vmem:[%s2887_s17 + $0x18] sm:$0xf] }
  0x1c   : > { %v1325_v41 = vsel %vm2921_vm7, %v2661_v22, %v1324_v32  ;;  %v280_v43 = vshll.u32 %v202_v31, 16  ;;  %v284_v44 = vshrl.u32 %v202_v31, 16  ;;  %v476_v50 = vld [vmem:[%s2887_s17 + $0x4] sm:$0xf]  ;;  %v290_v53 = vshll.u32 %v203_v40, 16 }
  0x1d   : > { %1416 = vrot.lane.b32.xlu1 %v1325_v41, %s2847_s19  ;;  %v218_v46 = vrot.slane %v217_v36, 4  ;;  %v1333_v47 = vor.u32 %v1331_v35, %v2926_v37  ;;  %v227_v48 = vor.u32 %v226_v38, %v222_v33  ;;  %v2941_v49 = vrot.slane %v230_v39, 5  ;;  %v477_v54 = vld [vmem:[%s2887_s17 + $0x8] sm:$0xf]  ;;  %v475_v63 = vld [vmem:[%s2887_s17] sm:$0xe] }
  0x1e   : > { %v282_v51 = vrot.slane %v280_v43, 5  ;;  %v286_v52 = vrot.slane %v284_v44, 4  ;;  %v270_v58 = vshll.u32 %v201_v45, 16  ;;  %v2950_v60 = vrot.slane %v290_v53, 5  ;;  %v1305_v6 = vld [vmem:[%s2887_s17 + $0x24] sm:$0xf] }
  0x1f   : > { %v223_v55 = vsel %vm2934_vm9, %v218_v46, %v222_v33  ;;  %v1334_v56 = vsel %vm2921_vm7, %v1326_v34, %v1333_v47  ;;  %v228_v57 = vrot.slane %v227_v48, 4  ;;  %v274_v61 = vshrl.u32 %v201_v45, 16  ;;  %v1306_v12 = vld [vmem:[%s2887_s17 + $0x28] sm:$0xf]  ;;  %v1304_v21 = vld [vmem:[%s2887_s17 + $0x20] sm:$0xf] }
  0x20   : > { %324 = vrot.lane.b32.xlu0 %v223_v55, %s2847_s19  ;;  %v287_v59 = vor.u32 %v286_v52, %v282_v51  ;;  %v500_v62 = vshrl.u32 %v476_v50, 16  ;;  %v2957_v1 = vrot.slane %v270_v58, 5  ;;  %v503_v2 = vshll.u32 %v476_v50, 16  ;;  %v1527_v28 = vld [vmem:[%s2887_s17 + $0x10] sm:$0xf] }
  0x21   : > { %1418 = vrot.lane.b32.xlu1 %v1334_v56, %s2847_s19  ;;  %v233_v0 = vsel %vm2934_vm9, %v228_v57, %v2941_v49  ;;  %v510_v5 = vshrl.u32 %v477_v54, 16  ;;  %v276_v9 = vrot.slane %v274_v61, 4  ;;  %v513_v11 = vshll.u32 %v477_v54, 16  ;;  %v1528_v39 = vld [vmem:[%s2887_s17 + $0x14] sm:$0xf] }
  0x22   : > { %4446 = vst [vmem:[#allocation3_spill] sm:$0xff] %v2957_v1  ;;  %v288_v8 = vrot.slane %v287_v59, 4  ;;  %v502_v10 = vrot.slane %v500_v62, 5  ;;  %v505_v13 = vrot.slane %v503_v2, 6  ;;  %v491_v15 = vshrl.u32 %v475_v63, 16 }
  0x23   : > { %v512_v14 = vrot.slane %v510_v5, 5  ;;  %v494_v16 = vshll.u32 %v475_v63, 16  ;;  %v277_v18 = vor.u32 %v276_v9, %v2957_v1  ;;  %v515_v19 = vrot.slane %v513_v11, 6  ;;  %v1526_v50 = vld [vmem:[%s2887_s17 + $0xc] sm:$0xf] }
  0x24   : > { %326 = vrot.lane.b32.xlu0 %v233_v0, %s2847_s19  ;;  %v293_v17 = vsel %vm2934_vm9, %v288_v8, %v2950_v60  ;;  %v1373_v20 = vshrl.u32 %v1305_v6, 16  ;;  %v506_v22 = vor.u32 %v505_v13, %v502_v10  ;;  %v493_v23 = vrot.slane %v491_v15, 5  ;;  %v2991_v52 = vld [vmem:[%s2887_s17 + $0x1c] sm:$0xf]  ;;  %v2995_v56 = vld [vmem:[%s2887_s17 + $0x18] sm:$0xf] }
  0x25   : > { %338 = vrot.lane.b32.xlu1 %v293_v17, %s2847_s19  ;;  %v496_v24 = vrot.slane %v494_v16, 6  ;;  %v1382_v27 = vshrl.u32 %v1306_v12, 16  ;;  %v278_v29 = vrot.slane %v277_v18, 4  ;;  %v2975_v31 = vor.u32 %v515_v19, %v512_v14  ;;  %4450 = vst [vmem:[#allocation5_spill] sm:$0xff] %v2995_v56  ;;  %v3003_v61 = vld [vmem:[%s2887_s17 + $0x20] sm:$0xf] }
  0x26   : > { %v1375_v32 = vrot.slane %v1373_v20, 7  ;;  %v1385_v33 = vshll.u32 %v1306_v12, 16  ;;  %v508_v34 = vrot.slane %v506_v22, 4  ;;  %v1364_v38 = vshrl.u32 %v1304_v21, 16  ;;  %v654_v62 = vld [vmem:[%s2887_s17 + $0x8] sm:$0xf] }
  0x27   : > { %v497_v35 = vor.u32 %v496_v24, %v493_v23  ;;  %v2977_v36 = vrot.slane %v1382_v27, 7  ;;  %v283_v40 = vsel %vm2934_vm9, %v278_v29, %v282_v51  ;;  %v1376_v43 = vshll.u32 %v1305_v6, 16  ;;  %v655_v5 = vld [vmem:[%s2887_s17 + $0xc] sm:$0xf]  ;;  %v653_v19 = vld [vmem:[%s2887_s17 + $0x4] sm:$0xe] }
  0x28   : > { %v1380_v41 = vrot.slane %v1375_v32, 4  ;;  %v1548_v44 = vshll.u32 %v1527_v28, 16  ;;  %336 = vrot.lane.b32.xlu0 %v283_v40, %s2847_s19  ;;  %v517_v45 = vsel %vm2971_vm11, %v508_v34, %v2975_v31  ;;  %v2987_v48 = vrot.slane %v1364_v38, 7  ;;  %v1697_v24 = vld [vmem:[%s2887_s17 + $0x14] sm:$0xf] }
  0x29   : > { %v498_v46 = vrot.slane %v497_v35, 4  ;;  %v1387_v47 = vor.u32 %v1385_v33, %v2977_v36  ;;  %610 = vrot.lane.b32.xlu1 %v517_v45, %s2848_s20  ;;  %v1378_v51 = vor.u32 %v1376_v43, %v1375_v32  ;;  %v1552_v54 = vshrl.u32 %v1527_v28, 16  ;;  %v1698_v38 = vld [vmem:[%s2887_s17 + $0x18] sm:$0xf] }
  0x2a   : > { %4449 = vst [vmem:[#allocation4_spill] sm:$0xff] %v2987_v48  ;;  %v1550_v53 = vrot.slane %v1548_v44, 5  ;;  %v1558_v55 = vshll.u32 %v1528_v39, 16  ;;  %v1371_v59 = vrot.slane %v2987_v48, 4  ;;  %v1539_v0 = vshrl.u32 %v1526_v50, 16 }
  0x2b   : > { %v507_v57 = vsel %vm2971_vm11, %v498_v46, %v506_v22  ;;  %v1388_v58 = vsel %vm2921_vm7, %v1380_v41, %v1387_v47  ;;  %v1554_v63 = vrot.slane %v1552_v54, 4  ;;  %v1542_v2 = vshll.u32 %v1526_v50, 16  ;;  %v1696_v44 = vld [vmem:[%s2887_s17 + $0x10] sm:$0xf] }
  0x2c   : > { %608 = vrot.lane.b32.xlu0 %v507_v57, %s2848_s20  ;;  %v1379_v6 = vsel %vm2921_vm7, %v1371_v59, %v1378_v51  ;;  %v3010_v8 = vrot.slane %v1558_v55, 5  ;;  %v416_v9 = vrot.slane %v2991_v52, 5  ;;  %v4402_v10 = vrot.slane %v2995_v56, 5  ;;  %v482_v52 = vld [vmem:[%s2887_s17 + $0x1c] sm:$0xf] }
  0x2d   : > { %1430 = vrot.lane.b32.xlu1 %v1388_v58, %s2847_s19  ;;  %v1555_v11 = vor.u32 %v1554_v63, %v1550_v53  ;;  %v1541_v12 = vrot.slane %v1539_v0, 4  ;;  %v1544_v13 = vrot.slane %v1542_v2, 5  ;;  %v675_v14 = vshrl.u32 %v654_v62, 16  ;;  %v483_v58 = vld [vmem:[%s2887_s17 + $0x20] sm:$0xf] }
  0x2e   : > { %v418_v15 = vrot.slane %v416_v9, 4  ;;  %v4405_v16 = vrot.slane %v3003_v61, 5  ;;  %v678_v17 = vshll.u32 %v654_v62, 16  ;;  %v685_v18 = vshrl.u32 %v655_v5, 16 }
  0x2f   : > { %v1556_v20 = vrot.slane %v1555_v11, 4  ;;  %v1545_v21 = vor.u32 %v1544_v13, %v1541_v12  ;;  %v677_v22 = vrot.slane %v675_v14, 5  ;;  %v688_v23 = vshll.u32 %v655_v5, 16  ;;  %v481_v11 = vld [vmem:[%s2887_s17 + $0x18] sm:$0xf] }
  0x30   : > { %1428 = vrot.lane.b32.xlu0 %v1379_v6, %s2847_s19  ;;  %v415_v27 = vrot.slane %v4402_v10, 4  ;;  %v680_v28 = vrot.slane %v678_v17, 6  ;;  %v687_v29 = vrot.slane %v685_v18, 5  ;;  %v666_v35 = vshrl.u32 %v653_v19, 16 }
  0x31   : > { %v1561_v32 = vsel %vm2934_vm9, %v1556_v20, %v3010_v8  ;;  %v1546_v33 = vrot.slane %v1545_v21, 4  ;;  %v690_v34 = vrot.slane %v688_v23, 6  ;;  %v669_v40 = vshll.u32 %v653_v19, 16 }
  0x32   : > { %1654 = vrot.lane.b32.xlu1 %v1561_v32, %s2848_s20  ;;  %v681_v39 = vor.u32 %v680_v28, %v677_v22  ;;  %v1718_v41 = vshll.u32 %v1697_v24, 16  ;;  %v1722_v43 = vshrl.u32 %v1697_v24, 16  ;;  %v420_v46 = vsel %vm2897_vm6, %v418_v15, %v4405_v16  ;;  %v829_v22 = vld [vmem:[%s2887_s17 + $0x8] sm:$0xf] }
  0x33   : > { %v1551_v45 = vsel %vm2934_vm9, %v1546_v33, %v1550_v53  ;;  %v3033_v47 = vor.u32 %v690_v34, %v687_v29  ;;  %v668_v50 = vrot.slane %v666_v35, 5  ;;  %v671_v54 = vrot.slane %v669_v40, 6  ;;  %v1533_v29 = vld [vmem:[%s2887_s17 + $0x28] sm:$0xf]  ;;  %v1466_v40 = vld [vmem:[%s2887_s17 + $0x24] sm:$0xf] }
  0x34   : > { %1652 = vrot.lane.b32.xlu0 %v1551_v45, %s2848_s20  ;;  %v683_v51 = vrot.slane %v681_v39, 4  ;;  %v3037_v55 = vrot.slane %v1718_v41, 5  ;;  %v1724_v57 = vrot.slane %v1722_v43, 4  ;;  %v417_v53 = vsel %vm2897_vm6, %v415_v27, %v416_v9  ;;  %v1467_v32 = vld [vmem:[%s2887_s17 + $0x28] sm:$0xf] }
  0x35   : > { %v1728_v59 = vshll.u32 %v1698_v38, 16  ;;  %v1709_v62 = vshrl.u32 %v1696_v44, 16  ;;  %v1712_v63 = vshll.u32 %v1696_v44, 16  ;;  %v672_v2 = vor.u32 %v671_v54, %v668_v50  ;;  %v3061_v45 = vld [vmem:[%s2887_s17 + $0xc] sm:$0xf] }
  0x36   : > { %444 = vrot.lane.b32.xlu1 %v420_v46, %s2846_s18  ;;  %v692_v0 = vsel %vm2971_vm11, %v683_v51, %v3033_v47  ;;  %v1725_v5 = vor.u32 %v1724_v57, %v3037_v55  ;;  %v560_v6 = vshrl.u32 %v482_v52, 16  ;;  %v563_v14 = vshll.u32 %v482_v52, 16  ;;  %v1532_v50 = vld [vmem:[%s2887_s17 + $0x24] sm:$0xf]  ;;  %v1534_v54 = vld [vmem:[%s2887_s17 + $0x2c] sm:$0xf] }
  0x37   : > { %v1711_v12 = vrot.slane %v1709_v62, 4  ;;  %v1714_v13 = vrot.slane %v1712_v63, 5  ;;  %v570_v15 = vshrl.u32 %v483_v58, 16  ;;  %v673_v9 = vrot.slane %v672_v2, 4  ;;  %v660_v63 = vld [vmem:[%s2887_s17 + $0x20] sm:$0xf] }
  0x38   : > { %442 = vrot.lane.b32.xlu0 %v417_v53, %s2846_s18  ;;  %v562_v17 = vrot.slane %v560_v6, 5  ;;  %v573_v18 = vshll.u32 %v483_v58, 16  ;;  %v565_v20 = vrot.slane %v563_v14, 6  ;;  %v550_v21 = vshrl.u32 %v481_v11, 16 }
  0x39   : > { %v1715_v19 = vor.u32 %v1714_v13, %v1711_v12  ;;  %v682_v23 = vsel %vm2971_vm11, %v673_v9, %v681_v39  ;;  %v1726_v24 = vrot.slane %v1725_v5, 4  ;;  %v3053_v27 = vrot.slane %v1728_v59, 5  ;;  %v828_v39 = vld [vmem:[%s2887_s17 + $0x4] sm:$0xc] }
  0x3a   : > { %785 = vrot.lane.b32.xlu1 %v692_v0, %s2849_s21  ;;  %v553_v28 = vshll.u32 %v481_v11, 16  ;;  %v566_v33 = vor.u32 %v565_v20, %v562_v17  ;;  %v572_v34 = vrot.slane %v570_v15, 5  ;;  %v575_v35 = vrot.slane %v573_v18, 6  ;;  %v661_v15 = vld [vmem:[%s2887_s17 + $0x24] sm:$0xf] }
  0x3b   : > { %v552_v38 = vrot.slane %v550_v21, 5  ;;  %v857_v43 = vrot.slane %v829_v22, 6  ;;  %v1716_v44 = vrot.slane %v1715_v19, 4  ;;  %v1608_v46 = vshll.u32 %v1533_v29, 16  ;;  %v659_v20 = vld [vmem:[%s2887_s17 + $0x1c] sm:$0xf] }
  0x3c   : > { %783 = vrot.lane.b32.xlu0 %v682_v23, %s2849_s21  ;;  %v555_v41 = vrot.slane %v553_v28, 6  ;;  %v1731_v52 = vsel %vm2934_vm9, %v1726_v24, %v3053_v27  ;;  %v1612_v57 = vshrl.u32 %v1533_v29, 16  ;;  %v568_v58 = vrot.slane %v566_v33, 4  ;;  %v3100_v23 = vld [vmem:[%s2887_s17 + $0x14] sm:$0xf] }
  0x3d   : > { %v3071_v53 = vor.u32 %v575_v35, %v572_v34  ;;  %v2658_v59 = vrot.slane %v828_v39, 10  ;;  %v3073_v62 = vrot.slane %v1608_v46, 5  ;;  %v859_v2 = vrot.slane %v857_v43, 4  ;;  %v935_v35 = vld [vmem:[%s2887_s17 + $0x8] sm:$0xf] }
  0x3e   : > { %1496 = vrot.lane.b32.xlu1 %v1467_v32, %s2846_s18  ;;  %v3068_v51 = vor.u32 %v555_v41, %v552_v38  ;;  %v4404_v5 = vrot.slane %v3061_v45, 6  ;;  %v1614_v6 = vrot.slane %v1612_v57, 4  ;;  %v1598_v11 = vshll.u32 %v1532_v50, 16  ;;  %v3112_v41 = vld [vmem:[%s2887_s17 + $0x18] sm:$0xf] }
  0x3f   : > { %v1721_v12 = vsel %vm2934_vm9, %v1716_v44, %v3037_v55  ;;  %v1602_v14 = vshrl.u32 %v1532_v50, 16  ;;  %v1618_v17 = vshll.u32 %v1534_v54, 16  ;;  %v735_v19 = vshrl.u32 %v660_v63, 16  ;;  %v936_v57 = vld [vmem:[%s2887_s17 + $0xc] sm:$0xf] }
  0x40   : > { %4451 = vst [vmem:[#allocation6_spill] sm:$0xff] %v3068_v51  ;;  %1494 = vrot.lane.b32.xlu0 %v1466_v40, %s2846_s18  ;;  %v558_v13 = vrot.slane %v3068_v51, 4  ;;  %v1615_v9 = vor.u32 %v1614_v6, %v3073_v62  ;;  %v3091_v18 = vrot.slane %v1598_v11, 5  ;;  %v577_v55 = vsel %vm2971_vm11, %v568_v58, %v3071_v53  ;;  %v1974_v51 = vld [vmem:[%s2887_s17 + $0x28] sm:$0xf] }
  0x41   : > { %v858_v21 = vsel %vm3079_vm14, %v2658_v59, %v857_v43  ;;  %v1604_v22 = vrot.slane %v1602_v14, 4  ;;  %v738_v24 = vshll.u32 %v660_v63, 16  ;;  %v861_v28 = vsel %vm3079_vm14, %v859_v2, %v4404_v5  ;;  %v1866_v43 = vld [vmem:[%s2887_s17 + $0x10] sm:$0xe]  ;;  %v934_v2 = vld [vmem:[%s2887_s17 + $0x4] sm:$0xc] }
  0x42   : > { %1824 = vrot.lane.b32.xlu1 %v1731_v52, %s2849_s21  ;;  %4454 = vst [vmem:[#allocation7_spill] sm:$0xff] %v3091_v18  ;;  %v737_v29 = vrot.slane %v735_v19, 5  ;;  %v745_v32 = vshrl.u32 %v661_v15, 16  ;;  %v748_v34 = vshll.u32 %v661_v15, 16  ;;  %v567_v38 = vsel %vm2971_vm11, %v558_v13, %v566_v33  ;;  %v1703_v14 = vld [vmem:[%s2887_s17 + $0x2c] sm:$0xf] }
  0x43   : > { %v1605_v40 = vor.u32 %v1604_v22, %v3091_v18  ;;  %v740_v39 = vrot.slane %v738_v24, 6  ;;  %v725_v44 = vshrl.u32 %v659_v20, 16  ;;  %v1616_v46 = vrot.slane %v1615_v9, 4 }
  0x44   : > { %1822 = vrot.lane.b32.xlu0 %v1721_v12, %s2849_s21  ;;  %v3116_v50 = vrot.slane %v1618_v17, 5  ;;  %v1892_v52 = vrot.slane %v3100_v23, 5  ;;  %v728_v54 = vshll.u32 %v659_v20, 16  ;;  %v747_v33 = vrot.slane %v745_v32, 5 }
  0x45   : > { %v1606_v58 = vrot.slane %v1605_v40, 4  ;;  %v750_v59 = vrot.slane %v748_v34, 6  ;;  %v959_v63 = vshrl.u32 %v935_v35, 16  ;;  %v3122_v6 = vor.u32 %v740_v39, %v737_v29 }
  0x46   : > { %622 = vrot.lane.b32.xlu1 %v577_v55, %s2848_s20  ;;  %v727_v11 = vrot.slane %v725_v44, 5  ;;  %v730_v12 = vrot.slane %v728_v54, 6  ;;  %v962_v13 = vshll.u32 %v935_v35, 16  ;;  %v4403_v15 = vrot.slane %v3112_v41, 5 }
  0x47   : > { %v2662_v9 = vrot.slane %v1866_v43, 9  ;;  %v969_v17 = vshrl.u32 %v936_v57, 16  ;;  %v972_v19 = vshll.u32 %v936_v57, 16  ;;  %v1894_v20 = vrot.slane %v1892_v52, 4  ;;  %v1702_v43 = vld [vmem:[%s2887_s17 + $0x28] sm:$0xf] }
  0x48   : > { %620 = vrot.lane.b32.xlu0 %v567_v38, %s2848_s20  ;;  %v961_v55 = vrot.slane %v959_v63, 6  ;;  %v964_v22 = vrot.slane %v962_v13, 7  ;;  %v950_v23 = vshrl.u32 %v934_v2, 16  ;;  %v1621_v24 = vsel %vm2934_vm9, %v1616_v46, %v3116_v50  ;;  %v1969_v57 = vld [vmem:[%s2887_s17 + $0x14] sm:$0xf]  ;;  %v2802_v13 = vld [vmem:[%s4398_s1 + $0x40] sm:$0xff]  }
  0x49   : > { %v3130_v29 = vor.u32 %v750_v59, %v747_v33  ;;  %v953_v32 = vshll.u32 %v934_v2, 16  ;;  %v1778_v34 = vshll.u32 %v1703_v14, 16  ;;  %v743_v35 = vrot.slane %v3122_v6, 4  ;;  %v1704_v33 = vld [vmem:[%s2887_s17 + $0x30] sm:$0xf]  ;;  %2717 = vmatprep.subr.bf16.mxu0 %v2802_v13  ;;  %2769 = vmatprep.subr.bf16.mxu1 %v2802_v13 }
  0x4a   : > { %891 = vrot.lane.b32.xlu1 %v861_v28, %s2850_s22  ;;  %v1611_v28 = vsel %vm2934_vm9, %v1606_v58, %v3073_v62  ;;  %v3137_v38 = vor.u32 %v730_v12, %v727_v11  ;;  %v1782_v40 = vshrl.u32 %v1703_v14, 16  ;;  %v971_v39 = vrot.slane %v969_v17, 6  ;;  %v1970_v12 = vld [vmem:[%s2887_s17 + $0x18] sm:$0xf] }
  0x4b   : > { %v974_v44 = vrot.slane %v972_v19, 7  ;;  %v952_v46 = vrot.slane %v950_v23, 6  ;;  %v955_v54 = vrot.slane %v953_v32, 7  ;;  %v3145_v62 = vrot.slane %v1778_v34, 5 }
  0x4c   : > { %889 = vrot.lane.b32.xlu0 %v858_v21, %s2850_s22  ;;  %4455 = vst [vmem:[#allocation8_spill] sm:$0xff] %v3137_v38  ;;  %v3142_v21 = vor.u32 %v964_v22, %v961_v55  ;;  %v1784_v58 = vrot.slane %v1782_v40, 4  ;;  %v1896_v59 = vsel %vm2897_vm6, %v1894_v20, %v4403_v15  ;;  %v1893_v63 = vsel %vm2897_vm6, %v2662_v9, %v1892_v52  ;;  %v1968_v55 = vld [vmem:[%s2887_s17 + $0x10] sm:$0xe]  ;;  %v2810_v15 = vld [vmem:[%s4398_s1 + $0x60] sm:$0xff]  }
  0x4d   : > { %v1768_v2 = vshll.u32 %v1702_v43, 16  ;;  %v1772_v11 = vshrl.u32 %v1702_v43, 16  ;;  %v752_v14 = vsel %vm2971_vm11, %v743_v35, %v3130_v29  ;;  %v733_v17 = vrot.slane %v3137_v38, 4 }
  0x4e   : > { %1666 = vrot.lane.b32.xlu1 %v1621_v24, %s2848_s20  ;;  %v1990_v19 = vshrl.u32 %v1969_v57, 16  ;;  %v1993_v20 = vshll.u32 %v1969_v57, 16  ;;  %v3163_v22 = vor.u32 %v974_v44, %v971_v39  ;;  %v956_v52 = vor.u32 %v955_v54, %v952_v46 }
  0x4f   : > { %v3165_v9 = vrot.slane %v1768_v2, 5  ;;  %v1774_v23 = vrot.slane %v1772_v11, 4  ;;  %v967_v24 = vrot.slane %v3142_v21, 4  ;;  %v1785_v32 = vor.u32 %v1784_v58, %v3145_v62  ;;  %v2803_v11 = vld [vmem:[%s4398_s1] sm:$0xff]  }
  0x50   : > { %1664 = vrot.lane.b32.xlu0 %v1611_v28, %s2848_s20  ;;  %v1788_v34 = vshll.u32 %v1704_v33, 16  ;;  %v2000_v28 = vshrl.u32 %v1970_v12, 16  ;;  %v1992_v35 = vrot.slane %v1990_v19, 5  ;;  %v1995_v40 = vrot.slane %v1993_v20, 6  ;;  %v172_v19 = vld [vmem:[%s2887_s17] sm:$0xf]  ;;  %2718 = vmatpush3.bf16.msra.mxu0 %v2803_v11 }
  0x51   : > { %4456 = vst [vmem:[#allocation9_spill] sm:$0xff] %v3165_v9  ;;  %v2003_v43 = vshll.u32 %v1970_v12, 16  ;;  %v1981_v57 = vshrl.u32 %v1968_v55, 16  ;;  %v1984_v44 = vshll.u32 %v1968_v55, 16  ;;  %v742_v46 = vsel %vm2971_vm11, %v733_v17, %v3122_v6  ;;  %v3198_v20 = vld [vmem:[%s2887_s17 + $0x20] sm:$0xf]  ;;  %2777 = vmatpush3.bf16.msra.mxu1 %v2803_v11 }
  0x52   : > { %1926 = vrot.lane.b32.xlu1 %v1896_v59, %s2850_s22  ;;  %v957_v54 = vrot.slane %v956_v52, 4  ;;  %v1775_v33 = vor.u32 %v1774_v23, %v3165_v9  ;;  %v1786_v59 = vrot.slane %v1785_v32, 4  ;;  %v976_v6 = vsel %vm3173_vm1, %v967_v24, %v3163_v22  ;;  %v3201_v55 = vld [vmem:[%s2887_s17 + $0x1c] sm:$0xf]  ;;  %184 = vst.msk [vmem:[#allocation2] sm:$0xf] %vm183_vm2, %v172_v19 }
  0x53   : > { %v1983_v58 = vrot.slane %v1981_v57, 5  ;;  %v1986_v2 = vrot.slane %v1984_v44, 6  ;;  %v3190_v12 = vor.u32 %v1995_v40, %v1992_v35  ;;  %v2002_v13 = vrot.slane %v2000_v28, 5  ;;  %4459 = vst [vmem:[#allocation10_spill] sm:$0xff] %v3201_v55  ;;  %v2805_v32 = vld [vmem:[%s4398_s1 + $0x8] sm:$0xff]   ;;  %v2808_v19 = vld [vmem:[%s4398_s1 + $0x58] sm:$0xff]  }
  0x54   : > { %1924 = vrot.lane.b32.xlu0 %v1893_v63, %s2850_s22  ;;  %v3182_v63 = vrot.slane %v1788_v34, 5  ;;  %v2005_v17 = vrot.slane %v2003_v43, 6  ;;  %v966_v52 = vsel %vm3173_vm1, %v957_v54, %v3142_v21  ;;  %v1776_v23 = vrot.slane %v1775_v33, 4  ;;  %v3215_v21 = vld [vmem:[%s2887_s17 + $0x24] sm:$0xf]  ;;  %v2806_v33 = vld [vmem:[%s4398_s1 + $0x50] sm:$0xff]  }
  0x55   : > { %v1987_v24 = vor.u32 %v1986_v2, %v1983_v58  ;;  %v3218_v28 = vld [vmem:[%s2887_s17 + $0x8] sm:$0xf]  ;;  %v173_v35 = vld [vmem:[%s2887_s17 + $0x4] sm:$0xf]  ;;  %v1998_v40 = vrot.slane %v3190_v12, 4  ;;  %v875_v57 = vrot.slane %v3198_v20, 6 }
  0x56   : > { %797 = vrot.lane.b32.xlu1 %v752_v14, %s2849_s21  ;;  %v2804_v14 = vld [vmem:[%s4398_s1 + $0x48] sm:$0xff]   ;;  %v1791_v34 = vsel %vm2934_vm9, %v1786_v59, %v3182_v63  ;;  %v3222_v43 = vor.u32 %v2005_v17, %v2002_v13  ;;  %v4401_v44 = vrot.slane %v3201_v55, 6  ;;  %185 = vst.msk [vmem:[#allocation2 + $0x8] sm:$0xf] %vm183_vm2, %v173_v35  ;;  %v1112_v58 = vld [vmem:[%s2887_s17 + $0x4] sm:$0x8]  ;;  %v1781_v11 = vsel %vm2934_vm9, %v1776_v23, %v3145_v62 }
  0x57   : > { %2719 = vmatprep.subr.bf16.mxu0 %v2804_v14  ;;  %2770 = vmatprep.subr.bf16.mxu1 %v2804_v14  ;;  %v3230_v54 = vld [vmem:[%s2887_s17 + $0x2c] sm:$0xf]  ;;  %v179_v59 = vld [vmem:[%s2887_s17 + $0x1c] sm:$0xf]  ;;  %v2807_v2 = vld [vmem:[%s4398_s1 + $0x10] sm:$0xff]   ;;  %v1141_v13 = vrot.slane %v3218_v28, 7 }
  0x58   : > { %795 = vrot.lane.b32.xlu0 %v742_v46, %s2849_s21  ;;  %v3227_v46 = vld [vmem:[%s2887_s17 + $0xc] sm:$0xf]  ;;  %2720 = vmatpush3.bf16.msra.mxu0 %v2805_v32  ;;  %191 = vst.msk [vmem:[#allocation2 + $0x38] sm:$0xf] %vm183_vm2, %v179_v59  ;;  %v178_v17 = vld [vmem:[%s2887_s17 + $0x18] sm:$0xf] }
  0x59   : > { %2721 = vmatprep.subr.bf16.mxu0 %v2806_v33  ;;  %2778 = vmatpush3.bf16.msra.mxu1 %v2805_v32  ;;  %v3253_v62 = vld [vmem:[%s2887_s17 + $0x30] sm:$0xf]  ;;  %v4407_v14 = vrot.slane %v3230_v54, 5  ;;  %v3257_v20 = vld [vmem:[%s2887_s17 + $0x28] sm:$0xf]  ;;  %v877_v23 = vrot.slane %v875_v57, 4 }
  0x5a   : > { %1069 = vrot.lane.b32.xlu1 %v976_v6, %s2851_s4  ;;  %v1988_v6 = vrot.slane %v1987_v24, 4  ;;  %4460 = vst [vmem:[#allocation11_spill] sm:$0xff] %v3257_v20  ;;  %190 = vst.msk [vmem:[#allocation2 + $0x30] sm:$0xf] %vm183_vm2, %v178_v17  ;;  %2771 = vmatprep.subr.bf16.mxu1 %v2806_v33  ;;  %v4410_v24 = vrot.slane %v3215_v21, 6  ;;  %v874_v32 = vrot.slane %v4401_v44, 4 }
  0x5b   : > { %v3270_v35 = vld [vmem:[%s2887_s17 + $0x14] sm:$0xf]  ;;  %v942_v33 = vld [vmem:[%s2887_s17 + $0x24] sm:$0xf]  ;;  %v1143_v17 = vrot.slane %v1141_v13, 4  ;;  %v2659_v44 = vrot.slane %v1112_v58, 11 }
  0x5c   : > { %1067 = vrot.lane.b32.xlu0 %v966_v52, %s2851_s4  ;;  %v2007_v52 = vsel %vm2971_vm11, %v1998_v40, %v3222_v43  ;;  %2722 = vmatpush3.bf16.msra.mxu0 %v2807_v2  ;;  %v2809_v40 = vld [vmem:[%s4398_s1 + $0x18] sm:$0xff]   ;;  %v1997_v59 = vsel %vm2971_vm11, %v1988_v6, %v3190_v12  ;;  %v1912_v12 = vrot.slane %v4407_v14, 4  ;;  %v1975_v28 = vld [vmem:[%s2887_s17 + $0x2c] sm:$0xf]  ;;  %v199_v14 = vld [vmem:[%s2887_s17 + $0x10] sm:$0xf] }
  0x5d   : > { %2723 = vmatprep.subr.bf16.mxu0 %v2808_v19  ;;  %2779 = vmatpush3.bf16.msra.mxu1 %v2807_v2  ;;  %v3295_v6 = vld [vmem:[%s2887_s17 + $0x18] sm:$0xf]  ;;  %v879_v2 = vsel %vm3079_vm14, %v877_v23, %v4410_v24  ;;  %v1029_v58 = vshrl.u32 %v942_v33, 16  ;;  %v1032_v55 = vshll.u32 %v942_v33, 16  ;;  %v2811_v23 = vld [vmem:[%s4398_s1 + $0x20] sm:$0xff]   ;;  %v4465_v10 = vrot.slane %v3253_v62, 5 }
  0x5e   : > { %1836 = vrot.lane.b32.xlu1 %v1791_v34, %s2849_s21  ;;  %v941_v34 = vld [vmem:[%s2887_s17 + $0x20] sm:$0xf]  ;;  %2772 = vmatprep.subr.bf16.mxu1 %v2808_v19  ;;  %v2050_v18 = vshrl.u32 %v1975_v28, 16  ;;  %v198_v24 = vld [vmem:[%s2887_s17 + $0xc] sm:$0xf]  ;;  %vm816_vm13 = vcmask 650752  }
  0x5f   : > { %v1019_v16 = vshrl.u32 %v941_v34, 16  ;;  %v1022_v7 = vshll.u32 %v941_v34, 16  ;;  %v4463_v34 = vrot.slane %v3227_v46, 7  ;;  %v1914_v38 = vsel %vm2897_vm6, %v1912_v12, %v4465_v10 }
  0x60   : > { %1834 = vrot.lane.b32.xlu0 %v1781_v11, %s2849_s21  ;;  %v940_v11 = vld [vmem:[%s2887_s17 + $0x1c] sm:$0xf]  ;;  %2724 = vmatpush3.bf16.msra.mxu0 %v2809_v40  ;;  %v1034_v56 = vrot.slane %v1032_v55, 7  ;;  %v2040_v10 = vshrl.u32 %v1974_v51, 16  ;;  %v2052_v55 = vrot.slane %v2050_v18, 5  ;;  %vm922_vm15 = vcmask 781952  }
  0x61   : > { %v1009_v9 = vshrl.u32 %v940_v11, 16  ;;  %v1012_v19 = vshll.u32 %v940_v11, 16  ;;  %v1976_v11 = vld [vmem:[%s2887_s17 + $0x30] sm:$0xf]  ;;  %2725 = vmatprep.subr.bf16.mxu0 %v2810_v15  ;;  %2780 = vmatpush3.bf16.msra.mxu1 %v2809_v40  ;;  %v254_v40 = vshrl.u32 %v199_v14, 16  ;;  %vm1100_vm0 = vcmask 913152  }
  0x62   : > { %2100 = vrot.lane.b32.xlu1 %v2007_v52, %s2851_s4  ;;  %v876_v52 = vsel %vm3079_vm14, %v874_v32, %v875_v57  ;;  %v1145_v57 = vsel %vm3287_vm5, %v1143_v17, %v4463_v34  ;;  %v1142_v32 = vsel %vm3287_vm5, %v2659_v44, %v1141_v13  ;;  %v1021_v17 = vrot.slane %v1019_v16, 6  ;;  %2773 = vmatprep.subr.bf16.mxu1 %v2810_v15 }
  0x63   : > { %v1024_v34 = vrot.slane %v1022_v7, 7  ;;  %v4466_v44 = vrot.slane %v3270_v35, 6  ;;  %v1011_v48 = vrot.slane %v1009_v9, 6  ;;  %v1014_v1 = vrot.slane %v1012_v19, 7  ;;  %v2812_v7 = vld [vmem:[%s4398_s1 + $0x68] sm:$0xff]  }
  0x64   : > { %2098 = vrot.lane.b32.xlu0 %v1997_v59, %s2851_s4  ;;  %v4464_v59 = vrot.slane %v3257_v20, 5  ;;  %v250_v20 = vshll.u32 %v199_v14, 16  ;;  %2726 = vmatpush3.bf16.msra.mxu0 %v2811_v23  ;;  %v2043_v16 = vshll.u32 %v1974_v51, 16  ;;  %v2142_v14 = vld [vmem:[%s2887_s17 + $0x10] sm:$0xc]  ;;  %v2060_v9 = vshrl.u32 %v1976_v11, 16 }
  0x65   : > { %v2170_v13 = vrot.slane %v4466_v44, 4  ;;  %2781 = vmatpush3.bf16.msra.mxu1 %v2811_v23  ;;  %v1025_v12 = vor.u32 %v1024_v34, %v1021_v17  ;;  %2727 = vmatprep.subr.bf16.mxu0 %v2812_v7  ;;  %v240_v19 = vshll.u32 %v198_v24, 16  ;;  %v244_v44 = vshrl.u32 %v198_v24, 16 }
  0x66   : > { %v1909_v33 = vrot.slane %v4464_v59, 4  ;;  %903 = vrot.lane.b32.xlu1 %v879_v2, %s2850_s22  ;;  %v2053_v59 = vshll.u32 %v1975_v28, 16  ;;  %v1031_v2 = vrot.slane %v1029_v58, 6  ;;  %v3333_v15 = vrot.slane %v250_v20, 5  ;;  %v2813_v20 = vld [vmem:[%s4398_s1 + $0x28] sm:$0xff]   ;;  %2774 = vmatprep.subr.bf16.mxu1 %v2812_v7 }
  0x67   : > { %v3335_v28 = vrot.slane %v254_v40, 4  ;;  %v2063_v58 = vshll.u32 %v1976_v11, 16  ;;  %v234_v23 = vshrl.u32 %v2916_v25, 16  ;;  %v3346_v18 = vor.u32 %v1014_v1, %v1011_v48 }
  0x68   : > { %901 = vrot.lane.b32.xlu0 %v876_v52, %s2850_s22  ;;  %4467 = vst [vmem:[#allocation12_spill] sm:$0xff] %v3333_v15  ;;  %v2055_v52 = vrot.slane %v2053_v59, 6  ;;  %v2663_v11 = vrot.slane %v2142_v14, 10  ;;  %v2042_v17 = vrot.slane %v2040_v10, 5  ;;  %v2045_v34 = vrot.slane %v2043_v16, 6  ;;  %2728 = vmatpush3.bf16.msra.mxu0 %v2813_v20  ;;  %v2814_v59 = vld [vmem:[%s4398_s1 + $0x70] sm:$0xff]  }
  0x69   : > { %4468 = vst [vmem:[#allocation13_spill] sm:$0xff] %v3335_v28  ;;  %4469 = vst [vmem:[#allocation14_spill] sm:$0xff] %v3346_v18  ;;  %2782 = vmatpush3.bf16.msra.mxu1 %v2813_v20  ;;  %v4471_v25 = vrot.slane %v3295_v6, 6  ;;  %v1027_v48 = vrot.slane %v1025_v12, 4  ;;  %v2065_v7 = vrot.slane %v2063_v58, 6  ;;  %v246_v10 = vrot.slane %v244_v44, 4  ;;  %2729 = vmatprep.subr.bf16.mxu0 %v2814_v59 }
  0x6a   : > { %1175 = vrot.lane.b32.xlu1 %v1145_v57, %s2852_s27  ;;  %v4470_v57 = vrot.slane %v3230_v54, 5  ;;  %v2062_v54 = vrot.slane %v2060_v9, 5  ;;  %v2056_v40 = vor.u32 %v2055_v52, %v2052_v55  ;;  %v1219_v16 = vld [vmem:[%s2887_s17 + $0xc] sm:$0xf]  ;;  %v4472_v14 = vrot.slane %v3270_v35, 6  ;;  %2775 = vmatprep.subr.bf16.mxu1 %v2814_v59 }
  0x6b   : > { %v2172_v1 = vsel %vm3079_vm14, %v2170_v13, %v4471_v25  ;;  %v236_v13 = vrot.slane %v234_v23, 4  ;;  %v3375_v9 = vor.u32 %v2045_v34, %v2042_v17  ;;  %v3378_v58 = vld [vmem:[%s2887_s17 + $0x20] sm:$0xf]  ;;  %v3381_v52 = vld [vmem:[%s2887_s17 + $0x1c] sm:$0xf]  ;;  %v1244_v23 = vrot.slane %v1219_v16, 7 }
  0x6c   : > { %1173 = vrot.lane.b32.xlu0 %v1142_v32, %s2852_s27  ;;  %v1911_v24 = vsel %vm2897_vm6, %v1909_v33, %v4470_v57  ;;  %v3357_v32 = vor.u32 %v1034_v56, %v1031_v2  ;;  %v1218_v33 = vld [vmem:[%s2887_s17 + $0x8] sm:$0x8]  ;;  %v1017_v56 = vrot.slane %v3346_v18, 4  ;;  %v3369_v2 = vld [vmem:[%s2887_s17 + $0x10] sm:$0xf]  ;;  %v2169_v55 = vsel %vm3079_vm14, %v2663_v11, %v4472_v14  ;;  %4474 = vst [vmem:[#allocation16_spill] sm:$0xff] %v3381_v52 }
  0x6d   : > { %4473 = vst [vmem:[#allocation15_spill] sm:$0xff] %v3375_v9  ;;  %v2660_v44 = vrot.slane %v1218_v33, 11  ;;  %v1302_v35 = vld [vmem:[%s2887_s17 + $0x18] sm:$0xf]  ;;  %v205_v57 = vld [vmem:[%s2887_s17 + $0x28] sm:$0xf]  ;;  %v3392_v11 = vor.u32 %v2065_v7, %v2062_v54 }
  0x6e   : > { %1938 = vrot.lane.b32.xlu1 %v1914_v38, %s2850_s22  ;;  %v3363_v38 = vrot.slane %v240_v19, 5  ;;  %v3384_v19 = vld [vmem:[%s2887_s17 + $0x14] sm:$0xf]  ;;  %v1036_v20 = vsel %vm3173_vm1, %v1027_v48, %v3357_v32  ;;  %v4419_v34 = vrot.slane %v3369_v2, 7  ;;  %v237_v48 = vor.u32 %v236_v13, %v2941_v49  ;;  %v2816_v14 = vld [vmem:[%s4398_s1 + $0x78] sm:$0xff]  }
  0x6f   : > { %4475 = vst [vmem:[#allocation17_spill] sm:$0xff] %v3392_v11  ;;  %v2815_v25 = vld [vmem:[%s4398_s1 + $0x30] sm:$0xff]   ;;  %v1245_v33 = vsel %vm3287_vm5, %v2660_v44, %v1244_v23  ;;  %v1246_v54 = vrot.slane %v1244_v23, 4  ;;  %v2048_v59 = vrot.slane %v3375_v9, 4  ;;  %v1337_v7 = vshrl.u32 %v3384_v19, 16  ;;  %v2817_v23 = vld [vmem:[%s4398_s1 + $0x38] sm:$0xff]  }
  0x70   : > { %1936 = vrot.lane.b32.xlu0 %v1911_v24, %s2850_s22  ;;  %v2058_v24 = vrot.slane %v2056_v40, 4  ;;  %v247_v17 = vor.u32 %v246_v10, %v3363_v38  ;;  %1287 = vst.msk [vmem:[#allocation2 + $0x4] sm:$0xf] %vm183_vm2, %v1245_v33  ;;  %v310_v10 = vshll.u32 %v205_v57, 16  ;;  %v314_v16 = vshrl.u32 %v205_v57, 16  ;;  %2730 = vmatpush3.bf16.msra.mxu0 %v2815_v25 }
  0x71   : > { %2783 = vmatpush3.bf16.msra.mxu1 %v2815_v25  ;;  %v4418_v49 = vrot.slane %v3381_v52, 7  ;;  %v1248_v13 = vsel %vm3287_vm5, %v1246_v54, %v4419_v34  ;;  %v3431_v57 = vld [vmem:[%s2887_s17 + $0x24] sm:$0xf]  ;;  %2731 = vmatprep.subr.bf16.mxu0 %v2816_v14  ;;  %v1339_v25 = vrot.slane %v1337_v7, 7  ;;  %v3436_v33 = vld [vmem:[%s2887_s17 + $0x2c] sm:$0xf] }
  0x72   : > { %2202 = vrot.lane.b32.xlu1 %v2172_v1, %s2852_s27  ;;  %v1026_v1 = vsel %vm3173_vm1, %v1017_v56, %v1025_v12  ;;  %v1159_v12 = vrot.slane %v3378_v58, 7  ;;  %v1346_v56 = vshrl.u32 %v1302_v35, 16  ;;  %v248_v44 = vrot.slane %v247_v17, 4  ;;  %1288 = vst.msk [vmem:[#allocation2 + $0xc] sm:$0xf] %vm183_vm2, %v1248_v13  ;;  %4477 = vst [vmem:[#allocation19_spill] sm:$0xff] %v3431_v57  ;;  %2776 = vmatprep.subr.bf16.mxu1 %v2816_v14 }
  0x73   : > { %v3422_v58 = vrot.slane %v310_v10, 5  ;;  %v238_v17 = vrot.slane %v237_v48, 4  ;;  %v1225_v10 = vld [vmem:[%s2887_s17 + $0x24] sm:$0xf]  ;;  %v1158_v13 = vrot.slane %v4418_v49, 4  ;;  %v2186_v51 = vrot.slane %v3436_v33, 6 }
  0x74   : > { %2200 = vrot.lane.b32.xlu0 %v2169_v55, %s2852_s27  ;;  %v2067_v55 = vsel %vm2971_vm11, %v2058_v24, %v3392_v11  ;;  %v2057_v24 = vsel %vm2971_vm11, %v2048_v59, %v2056_v40  ;;  %2732 = vmatpush3.bf16.msra.mxu0 %v2817_v23  ;;  %v3445_v40 = vld [vmem:[%s2887_s17 + $0x28] sm:$0xf]  ;;  %v253_v48 = vsel %vm2934_vm9, %v248_v44, %v3333_v15  ;;  %v1161_v59 = vrot.slane %v1159_v12, 4  ;;  %v3454_v14 = vld [vmem:[%s2887_s17 + $0x30] sm:$0xf] }
  0x75   : > { %2784 = vmatpush3.bf16.msra.mxu1 %v2817_v23  ;;  %4479 = vst [vmem:[#allocation21_spill] sm:$0xff] %v3454_v14  ;;  %v1340_v44 = vshll.u32 %v3384_v19, 16  ;;  %v3465_v23 = vld [vmem:[%s2887_s17 + $0x28] sm:$0xf]  ;;  %v1530_v54 = vld [vmem:[%s2887_s17 + $0x1c] sm:$0xf]  ;;  %v1160_v19 = vsel %vm3287_vm5, %v1158_v13, %v1159_v12 }
  0x76   : > { %1081 = vrot.lane.b32.xlu1 %v1036_v20, %s2851_s4  ;;  %v3424_v20 = vrot.slane %v314_v16, 4  ;;  %v1349_v16 = vshll.u32 %v1302_v35, 16  ;;  %v3458_v35 = vld [vmem:[%s2887_s17 + $0x20] sm:$0xf]  ;;  %4481 = vst [vmem:[#allocation23_spill] sm:$0xff] %v3465_v23  ;;  %v1262_v34 = vrot.slane %v1225_v10, 7 }
  0x77   : > { %4480 = vst [vmem:[#allocation22_spill] sm:$0xff] %v3458_v35  ;;  %v4482_v52 = vrot.slane %v3431_v57, 7  ;;  %v1578_v9 = vshll.u32 %v1530_v54, 16  ;;  %v1342_v18 = vor.u32 %v1340_v44, %v1339_v25  ;;  %v2188_v13 = vrot.slane %v2186_v51, 4  ;;  %v1462_v15 = vld [vmem:[%s2887_s17 + $0x14] sm:$0xf] }
  0x78   : > { %4476 = vst [vmem:[#allocation18_spill] sm:$0xff] %v3424_v20  ;;  %1079 = vrot.lane.b32.xlu0 %v1026_v1, %s2851_s4  ;;  %v3442_v1 = vrot.slane %v1346_v56, 7  ;;  %v243_v56 = vsel %vm2934_vm9, %v238_v17, %v3363_v38  ;;  %v1335_v17 = vrot.slane %v2926_v37, 4  ;;  %v1264_v7 = vrot.slane %v1262_v34, 4 }
  0x79   : > { %v1163_v38 = vsel %vm3287_vm5, %v1161_v59, %v4482_v52  ;;  %v1582_v37 = vshrl.u32 %v1530_v54, 16  ;;  %v4484_v10 = vrot.slane %v3445_v40, 7  ;;  %v4488_v20 = vrot.slane %v2895_v3, 5 }
  0x7a   : > { %2112 = vrot.lane.b32.xlu1 %v2067_v55, %s2851_s4  ;;  %4478 = vst [vmem:[#allocation20_spill] sm:$0xff] %v3442_v1  ;;  %v1344_v55 = vrot.slane %v1339_v25, 4  ;;  %v1351_v49 = vor.u32 %v1349_v16, %v3442_v1  ;;  %v4423_v16 = vrot.slane %v3458_v35, 7  ;;  %vm1206_vm3 = vcmask 1044352  }
  0x7b   : > { %v1266_v25 = vsel %vm3287_vm5, %v1264_v7, %v4484_v10  ;;  %v1343_v7 = vsel %vm2921_vm7, %v1335_v17, %v1342_v18  ;;  %v4487_v18 = vrot.slane %v3454_v14, 6  ;;  %v403_v14 = vrot.slane %v4488_v20, 4 }
  0x7c   : > { %2110 = vrot.lane.b32.xlu0 %v2057_v24, %s2851_s4  ;;  %v3472_v24 = vld [vmem:[%s2887_s17 + $0xc] sm:$0xf]  ;;  %v1261_v12 = vrot.slane %v4423_v16, 4  ;;  %v1352_v59 = vsel %vm2921_vm7, %v1344_v55, %v1351_v49  ;;  %1294 = vst.msk [vmem:[#allocation2 + $0x3c] sm:$0xf] %vm183_vm2, %v1266_v25  ;;  %v3506_v16 = vrot.slane %v1582_v37, 4 }
  0x7d   : > { %v404_v52 = vrot.slane %v3472_v24, 5  ;;  %v478_v24 = vld [vmem:[%s2887_s17 + $0xc] sm:$0xf]  ;;  %v2832_v49 = vld [vmem:[%s2887_s17 + $0x20] sm:$0xf]  ;;  %v2190_v17 = vsel %vm3079_vm14, %v2188_v13, %v4487_v18 }
  0x7e   : > { %330 = vrot.lane.b32.xlu1 %v253_v48, %s2847_s19  ;;  %v204_v48 = vld [vmem:[%s2887_s17 + $0x24] sm:$0xf]  ;;  %v1263_v54 = vsel %vm3287_vm5, %v1261_v12, %v1262_v34  ;;  %4485 = vst [vmem:[#allocation25_spill] sm:$0xff] %v3506_v16  ;;  %v294_v55 = vshrl.u32 %v2832_v49, 16  ;;  %v520_v25 = vshrl.u32 %v478_v24, 16 }
  0x7f   : > { %v300_v33 = vshll.u32 %v204_v48, 16  ;;  %v304_v44 = vshrl.u32 %v204_v48, 16  ;;  %1293 = vst.msk [vmem:[#allocation2 + $0x34] sm:$0xf] %vm183_vm2, %v1263_v54  ;;  %v406_v12 = vrot.slane %v404_v52, 4 }
  0x80   : > { %328 = vrot.lane.b32.xlu0 %v243_v56, %s2847_s19  ;;  %v3494_v56 = vld [vmem:[%s2887_s17 + $0x10] sm:$0xf]  ;;  %v3531_v16 = vld [vmem:[%s2887_s17 + $0x2c] sm:$0xf]  ;;  %v296_v1 = vrot.slane %v294_v55, 4 }
  0x81   : > { %4483 = vst [vmem:[#allocation24_spill] sm:$0xff] %v3494_v56  ;;  %v3525_v54 = vrot.slane %v300_v33, 5  ;;  %v306_v49 = vrot.slane %v304_v44, 4  ;;  %v1529_v13 = vld [vmem:[%s2887_s17 + $0x18] sm:$0xf]  ;;  %v4489_v44 = vrot.slane %v3494_v56, 5 }
  0x82   : > { %1187 = vrot.lane.b32.xlu1 %v1163_v38, %s2852_s27  ;;  %v3504_v38 = vrot.slane %v1578_v9, 5  ;;  %v4486_v9 = vrot.slane %v3465_v23, 6  ;;  %v523_v23 = vshll.u32 %v478_v24, 16 }
  0x83   : > { %v408_v24 = vsel %vm2897_vm6, %v406_v12, %v4489_v44  ;;  %v405_v12 = vsel %vm2897_vm6, %v403_v14, %v404_v52  ;;  %v1572_v44 = vshrl.u32 %v1529_v13, 16 }
  0x84   : > { %1185 = vrot.lane.b32.xlu0 %v1160_v19, %s2852_s27  ;;  %v2185_v10 = vrot.slane %v4486_v9, 4  ;;  %v1700_v9 = vld [vmem:[%s2887_s17 + $0x20] sm:$0xf]  ;;  %v479_v19 = vld [vmem:[%s2887_s17 + $0x10] sm:$0xf]  ;;  %v525_v3 = vrot.slane %v523_v23, 6 }
  0x85   : > { %v1748_v18 = vshll.u32 %v1700_v9, 16  ;;  %v1752_v57 = vshrl.u32 %v1700_v9, 16  ;;  %v530_v20 = vshrl.u32 %v479_v19, 16  ;;  %v533_v55 = vshll.u32 %v479_v19, 16 }
  0x86   : > { %v3513_v48 = vpop.permute.xlu1 %1484  ;;  %v1483_v34 = vpop.permute.xlu0 %1482  ;;  %1422 = vrot.lane.b32.xlu1 %v1352_v59, %s2847_s19  ;;  %v3534_v59 = vld [vmem:[%s2887_s17 + $0x30] sm:$0xf]  ;;  %v2187_v37 = vsel %vm3079_vm14, %v2185_v10, %v2186_v51  ;;  %v307_v51 = vor.u32 %v306_v49, %v3525_v54  ;;  %v297_v9 = vor.u32 %v296_v1, %v2950_v60  ;;  %v1391_v23 = vshrl.u32 %v3531_v16, 16  ;;  %v2833_v1 = vld [vmem:[%s2887_s17 + $0x14] sm:$0xf] }
  0x87   : > { %v3550_v10 = vrot.slane %v1748_v18, 5  ;;  %v1400_v19 = vshrl.u32 %v3534_v59, 16  ;;  %v1568_v49 = vshll.u32 %v1529_v13, 16  ;;  %v532_v18 = vrot.slane %v530_v20, 5 }
  0x88   : > { %1420 = vrot.lane.b32.xlu0 %v1343_v7, %s2847_s19  ;;  %v522_v7 = vrot.slane %v520_v25, 5  ;;  %v1463_v25 = vld [vmem:[%s2887_s17 + $0x18] sm:$0xf]  ;;  %v308_v14 = vrot.slane %v307_v51, 4  ;;  %v535_v60 = vrot.slane %v533_v55, 6  ;;  %v1562_v56 = vshrl.u32 %v2833_v1, 16 }
  0x89   : > { %v298_v28 = vrot.slane %v297_v9, 4  ;;  %v1393_v13 = vrot.slane %v1391_v23, 7  ;;  %v3568_v11 = vrot.slane %v1400_v19, 7  ;;  %v3574_v51 = vrot.slane %v1568_v49, 5 }
  0x8a   : > { %2214 = vrot.lane.b32.xlu1 %v2190_v17, %s2852_s27  ;;  %v431_v35 = vpop.permute.xlu0 %430  ;;  %v3552_v17 = vrot.slane %v1752_v57, 4  ;;  %v526_v52 = vor.u32 %v525_v3, %v522_v7  ;;  %v1403_v57 = vshll.u32 %v3534_v59, 16  ;;  %v1574_v3 = vrot.slane %v1572_v44, 4 }
  0x8b   : > { %v3542_v33 = vpop.permute.xlu1 %432  ;;  %v3580_v55 = vor.u32 %v535_v60, %v532_v18  ;;  %v518_v59 = vrot.slane %v2975_v31, 4  ;;  %v303_v19 = vsel %vm2934_vm9, %v298_v28, %v3525_v54  ;;  %v1398_v49 = vrot.slane %v1393_v13, 4  ;;  %v3598_v18 = vld [vmem:[%s2887_s17 + $0x24] sm:$0xf] }
  0x8c   : > { %2212 = vrot.lane.b32.xlu0 %v2187_v37, %s2852_s27  ;;  %v528_v20 = vrot.slane %v526_v52, 4  ;;  %v1564_v44 = vrot.slane %v1562_v56, 4 }
  0x8d   : > { %v527_v1 = vsel %vm2971_vm11, %v518_v59, %v526_v52  ;;  %v3626_v59 = vld [vmem:[%s2887_s17 + $0x28] sm:$0xf] }
  0x8e   : > { %436 = vrot.lane.b32.xlu1 %v408_v24, %s2846_s18  ;;  %v537_v56 = vsel %vm2971_vm11, %v528_v20, %v3580_v55 }
  0x8f   : > { %v1417_v37 = vpop.permute.xlu1 %1416 }
  0x90   : > { %1449 = vst.msk [vmem:[#allocation2 + $0x4] sm:$0xf] %vm357_vm8, %v1417_v37  ;;  %434 = vrot.lane.b32.xlu0 %v405_v12, %s2846_s18  ;;  %v1536_v37 = vld [vmem:[%s2887_s17 + $0x34] sm:$0xf]  ;;  %v656_v12 = vld [vmem:[%s2887_s17 + $0x10] sm:$0xf] }
  0x91   : > { %1515 = vst.msk [vmem:[#allocation2 + $0x4] sm:$0xf] %vm463_vm10, %v1483_v34  ;;  %v313_v34 = vsel %vm2934_vm9, %v308_v14, %v3422_v58  ;;  %v1642_v9 = vshrl.u32 %v1536_v37, 16  ;;  %v1575_v14 = vor.u32 %v1574_v3, %v3574_v51  ;;  %v695_v54 = vshrl.u32 %v656_v12, 16 }
  0x92   : > { %v325_v24 = vpop.permute.xlu0 %324  ;;  %1488 = vrot.lane.b32.xlu1 %v1463_v25, %s2846_s18  ;;  %v1638_v25 = vshll.u32 %v1536_v37, 16 }
  0x93   : > { %358 = vst.msk [vmem:[#allocation2] sm:$0xf] %vm357_vm8, %v325_v24  ;;  %v1419_v7 = vpop.permute.xlu1 %1418  ;;  %v3602_v28 = vrot.slane %v1642_v9, 4  ;;  %v657_v24 = vld [vmem:[%s2887_s17 + $0x14] sm:$0xf]  ;;  %v1576_v52 = vrot.slane %v1575_v14, 4 }
  0x94   : > { %1450 = vst.msk [vmem:[#allocation2 + $0xc] sm:$0xf] %vm357_vm8, %v1419_v7  ;;  %1486 = vrot.lane.b32.xlu0 %v1462_v15, %s2846_s18  ;;  %v175_v15 = vld [vmem:[%s2887_s17 + $0xc] sm:$0xf]  ;;  %v3600_v60 = vrot.slane %v1638_v25, 5  ;;  %v1389_v7 = vrot.slane %v2977_v36, 4 }
  0x95   : > { %464 = vst.msk [vmem:[#allocation2] sm:$0xf] %vm463_vm10, %v431_v35  ;;  %1516 = vst.msk [vmem:[#allocation2 + $0xc] sm:$0xf] %vm463_vm10, %v3513_v48  ;;  %v1394_v35 = vshll.u32 %v3531_v16, 16  ;;  %v1405_v48 = vor.u32 %v1403_v57, %v3568_v11  ;;  %v698_v57 = vshll.u32 %v656_v12, 16 }
  0x96   : > { %v327_v23 = vpop.permute.xlu0 %326  ;;  %342 = vrot.lane.b32.xlu1 %v313_v34, %s2847_s19  ;;  %187 = vst.msk [vmem:[#allocation2 + $0x18] sm:$0xf] %vm183_vm2, %v175_v15  ;;  %v174_v16 = vld [vmem:[%s2887_s17 + $0x8] sm:$0xf]  ;;  %v422_v34 = vrot.slane %v3598_v18, 5  ;;  %v697_v9 = vrot.slane %v695_v54, 5 }
  0x97   : > { %359 = vst.msk [vmem:[#allocation2 + $0x8] sm:$0xf] %vm357_vm8, %v327_v23  ;;  %v339_v31 = vpop.permute.xlu1 %338  ;;  %v1396_v3 = vor.u32 %v1394_v35, %v1393_v13  ;;  %v1406_v12 = vsel %vm2921_vm7, %v1398_v49, %v1405_v48  ;;  %v700_v36 = vrot.slane %v698_v57, 6  ;;  %v705_v13 = vshrl.u32 %v657_v24, 16  ;;  %v1706_v15 = vld [vmem:[%s2887_s17 + $0x38] sm:$0xf] }
  0x98   : > { %365 = vst.msk [vmem:[#allocation2 + $0x38] sm:$0xf] %vm357_vm8, %v339_v31  ;;  %340 = vrot.lane.b32.xlu0 %v303_v19, %s2847_s19  ;;  %v708_v23 = vshll.u32 %v657_v24, 16  ;;  %v424_v35 = vrot.slane %v422_v34, 4  ;;  %v484_v24 = vld [vmem:[%s2887_s17 + $0x24] sm:$0xf] }
  0x99   : > { %465 = vst.msk [vmem:[#allocation2 + $0x8] sm:$0xf] %vm463_vm10, %v3542_v33  ;;  %v1565_v33 = vor.u32 %v1564_v44, %v3010_v8  ;;  %v1699_v8 = vld [vmem:[%s2887_s17 + $0x1c] sm:$0xf]  ;;  %v1397_v19 = vsel %vm2921_vm7, %v1389_v7, %v1396_v3  ;;  %v4436_v44 = vrot.slane %v3626_v59, 5  ;;  %v707_v54 = vrot.slane %v705_v13, 5 }
  0x9a   : > { %186 = vst.msk [vmem:[#allocation2 + $0x10] sm:$0xf] %vm183_vm2, %v174_v16  ;;  %v337_v20 = vpop.permute.xlu0 %336  ;;  %614 = vrot.lane.b32.xlu1 %v537_v56, %s2848_s20  ;;  %v1738_v48 = vshll.u32 %v1699_v8, 16  ;;  %v1742_v14 = vshrl.u32 %v1699_v8, 16  ;;  %v1581_v16 = vsel %vm2934_vm9, %v1576_v52, %v3504_v38  ;;  %v701_v56 = vor.u32 %v700_v36, %v697_v9 }
  0x9b   : > { %364 = vst.msk [vmem:[#allocation2 + $0x30] sm:$0xf] %vm357_vm8, %v337_v20  ;;  %v611_v25 = vpop.permute.xlu1 %610  ;;  %v1566_v49 = vrot.slane %v1565_v33, 4  ;;  %v710_v57 = vrot.slane %v708_v23, 6  ;;  %v1808_v7 = vshll.u32 %v1706_v15, 16  ;;  %v1812_v3 = vshrl.u32 %v1706_v15, 16 }
  0x9c   : > { %612 = vrot.lane.b32.xlu0 %v527_v1, %s2848_s20  ;;  %643 = vst.msk [vmem:[#allocation2 + $0x8] sm:$0xf] %vm641_vm12, %v611_v25  ;;  %v181_v1 = vld [vmem:[%s2887_s17 + $0x24] sm:$0xf]  ;;  %v180_v33 = vld [vmem:[%s2887_s17 + $0x20] sm:$0xf]  ;;  %v426_v25 = vsel %vm2897_vm6, %v424_v35, %v4436_v44 }
  0x9d   : > { %193 = vst.msk [vmem:[#allocation2 + $0x48] sm:$0xf] %vm183_vm2, %v181_v1  ;;  %v2834_v20 = vld [vmem:[%s2887_s17 + $0x18] sm:$0xf]  ;;  %v1571_v52 = vsel %vm2934_vm9, %v1566_v49, %v3574_v51  ;;  %v4490_v9 = vrot.slane %v3003_v61, 5  ;;  %v3659_v23 = vrot.slane %v1738_v48, 5  ;;  %v3666_v49 = vor.u32 %v710_v57, %v707_v54 }
  0x9e   : > { %v609_v31 = vpop.permute.xlu0 %608  ;;  %1434 = vrot.lane.b32.xlu1 %v1406_v12, %s2847_s19  ;;  %v1732_v12 = vshrl.u32 %v2834_v20, 16  ;;  %192 = vst.msk [vmem:[#allocation2 + $0x40] sm:$0xf] %vm183_vm2, %v180_v33  ;;  %v1744_v8 = vrot.slane %v1742_v14, 4  ;;  %v3663_v15 = vrot.slane %v1812_v3, 4  ;;  %v703_v51 = vrot.slane %v701_v56, 4 }
  0x9f   : > { %642 = vst.msk [vmem:[#allocation2] sm:$0xf] %vm641_vm12, %v609_v31  ;;  %v1431_v18 = vpop.permute.xlu1 %1430  ;;  %v421_v36 = vrot.slane %v4490_v9, 4  ;;  %v485_v35 = vld [vmem:[%s2887_s17 + $0x28] sm:$0xf]  ;;  %v580_v61 = vshrl.u32 %v484_v24, 16 }
  0xa0   : > { %1432 = vrot.lane.b32.xlu0 %v1397_v19, %s2847_s19  ;;  %1456 = vst.msk [vmem:[#allocation2 + $0x3c] sm:$0xf] %vm357_vm8, %v1431_v18  ;;  %v3661_v19 = vrot.slane %v1808_v7, 5  ;;  %v583_v31 = vshll.u32 %v484_v24, 16  ;;  %v1734_v1 = vrot.slane %v1732_v12, 4  ;;  %v1745_v57 = vor.u32 %v1744_v8, %v3659_v23 }
  0xa1   : > { %v423_v14 = vsel %vm2897_vm6, %v421_v36, %v422_v34  ;;  %v590_v24 = vshrl.u32 %v485_v35, 16  ;;  %v712_v7 = vsel %vm2971_vm11, %v703_v51, %v3666_v49  ;;  %v582_v3 = vrot.slane %v580_v61, 5  ;;  %v1535_v34 = vld [vmem:[%s2887_s17 + $0x30] sm:$0xf]  ;;  %v1705_v48 = vld [vmem:[%s2887_s17 + $0x34] sm:$0xf] }
  0xa2   : > { %v1429_v13 = vpop.permute.xlu0 %1428  ;;  %1658 = vrot.lane.b32.xlu1 %v1581_v16, %s2848_s20  ;;  %v693_v16 = vrot.slane %v3033_v47, 4  ;;  %v585_v33 = vrot.slane %v583_v31, 6  ;;  %v593_v20 = vshll.u32 %v485_v35, 16  ;;  %v1469_v9 = vld [vmem:[%s2887_s17 + $0x30] sm:$0xf]  ;;  %v1746_v36 = vrot.slane %v1745_v57, 4 }
  0xa3   : > { %1455 = vst.msk [vmem:[#allocation2 + $0x34] sm:$0xf] %vm357_vm8, %v1429_v13  ;;  %v592_v13 = vrot.slane %v590_v24, 5  ;;  %v831_v35 = vld [vmem:[%s2887_s17 + $0x10] sm:$0xf]  ;;  %v1628_v61 = vshll.u32 %v1535_v34, 16 }
  0xa4   : > { %1656 = vrot.lane.b32.xlu0 %v1571_v52, %s2848_s20  ;;  %v1655_v18 = vpop.permute.xlu1 %1654  ;;  %v702_v12 = vsel %vm2971_vm11, %v693_v16, %v701_v56  ;;  %v1735_v52 = vor.u32 %v1734_v1, %v3053_v27  ;;  %v586_v8 = vor.u32 %v585_v33, %v582_v3  ;;  %v595_v51 = vrot.slane %v593_v20, 6  ;;  %v2835_v56 = vld [vmem:[%s2887_s17 + $0x2c] sm:$0xf]  ;;  %v662_v24 = vld [vmem:[%s2887_s17 + $0x28] sm:$0xf] }
  0xa5   : > { %1686 = vst.msk [vmem:[#allocation2 + $0xc] sm:$0xf] %vm641_vm12, %v1655_v18  ;;  %v1632_v31 = vshrl.u32 %v1535_v34, 16  ;;  %v1622_v18 = vshrl.u32 %v2835_v56, 16  ;;  %v863_v57 = vrot.slane %v831_v35, 6  ;;  %v3707_v20 = vrot.slane %v1628_v61, 5 }
  0xa6   : > { %v1653_v54 = vpop.permute.xlu0 %1652  ;;  %448 = vrot.lane.b32.xlu1 %v426_v25, %s2846_s18  ;;  %v1736_v16 = vrot.slane %v1735_v52, 4  ;;  %v3702_v3 = vor.u32 %v595_v51, %v592_v13  ;;  %v3705_v33 = vld [vmem:[%s2887_s17 + $0x14] sm:$0xf]  ;;  %v3711_v52 = vld [vmem:[%s2887_s17 + $0x1c] sm:$0xf]  ;;  %v755_v13 = vshrl.u32 %v662_v24, 16 }
  0xa7   : > { %1685 = vst.msk [vmem:[#allocation2 + $0x4] sm:$0xf] %vm641_vm12, %v1653_v54  ;;  %v1751_v54 = vsel %vm2934_vm9, %v1746_v36, %v3550_v10  ;;  %v663_v36 = vld [vmem:[%s2887_s17 + $0x2c] sm:$0xf]  ;;  %v758_v51 = vshll.u32 %v662_v24, 16  ;;  %v4435_v61 = vrot.slane %v3705_v33, 6 }
  0xa8   : > { %446 = vrot.lane.b32.xlu0 %v423_v14, %s2846_s18  ;;  %v445_v47 = vpop.permute.xlu1 %444  ;;  %v1468_v14 = vld [vmem:[%s2887_s17 + $0x2c] sm:$0xf]  ;;  %v865_v56 = vrot.slane %v863_v57, 4 }
  0xa9   : > { %471 = vst.msk [vmem:[#allocation2 + $0x38] sm:$0xf] %vm463_vm10, %v445_v47  ;;  %v1634_v47 = vrot.slane %v1632_v31, 4 }
  0xaa   : > { %v443_v25 = vpop.permute.xlu0 %442  ;;  %789 = vrot.lane.b32.xlu1 %v712_v7, %s2849_s21  ;;  %v588_v7 = vrot.slane %v586_v8, 4 }
  0xab   : > { %470 = vst.msk [vmem:[#allocation2 + $0x30] sm:$0xf] %vm463_vm10, %v443_v25  ;;  %v1741_v25 = vsel %vm2934_vm9, %v1736_v16, %v3659_v23  ;;  %v4491_v23 = vrot.slane %v3061_v45, 6  ;;  %v3736_v45 = vld [vmem:[%s2887_s17 + $0x20] sm:$0xf] }
  0xac   : > { %787 = vrot.lane.b32.xlu0 %v702_v12, %s2849_s21  ;;  %v786_v27 = vpop.permute.xlu1 %785  ;;  %v1624_v12 = vrot.slane %v1622_v18, 4  ;;  %v597_v31 = vsel %vm2971_vm11, %v588_v7, %v3702_v3  ;;  %v757_v7 = vrot.slane %v755_v13, 5 }
  0xad   : > { %818 = vst.msk [vmem:[#allocation2 + $0x8] sm:$0xf] %vm816_vm13, %v786_v27  ;;  %v862_v18 = vrot.slane %v4491_v23, 4  ;;  %v937_v27 = vld [vmem:[%s2887_s17 + $0x10] sm:$0xf] }
  0xae   : > { %v784_v1 = vpop.permute.xlu0 %783  ;;  %1500 = vrot.lane.b32.xlu1 %v1469_v9, %s2846_s18  ;;  %v578_v9 = vrot.slane %v3071_v53, 4  ;;  %v1635_v53 = vor.u32 %v1634_v47, %v3707_v20  ;;  %v1625_v16 = vor.u32 %v1624_v12, %v3116_v50  ;;  %v760_v47 = vrot.slane %v758_v51, 6  ;;  %v3749_v51 = vld [vmem:[%s2887_s17 + $0x18] sm:$0xf] }
  0xaf   : > { %817 = vst.msk [vmem:[#allocation2] sm:$0xf] %vm816_vm13, %v784_v1  ;;  %v4437_v1 = vrot.slane %v3711_v52, 5  ;;  %v979_v50 = vshrl.u32 %v937_v27, 16  ;;  %v982_v12 = vshll.u32 %v937_v27, 16  ;;  %v1253_v44 = vrot.slane %v3749_v51, 7 }
  0xb0   : > { %1498 = vrot.lane.b32.xlu0 %v1468_v14, %s2846_s18  ;;  %v1497_v34 = vpop.permute.xlu1 %1496  ;;  %v587_v24 = vsel %vm2971_vm11, %v578_v9, %v586_v8  ;;  %v867_v8 = vsel %vm3079_vm14, %v865_v56, %v4435_v61  ;;  %v864_v9 = vsel %vm3079_vm14, %v862_v18, %v863_v57  ;;  %v1636_v13 = vrot.slane %v1635_v53, 4 }
  0xb1   : > { %1522 = vst.msk [vmem:[#allocation2 + $0x3c] sm:$0xf] %vm463_vm10, %v1497_v34  ;;  %v768_v34 = vshll.u32 %v663_v36, 16  ;;  %v1626_v23 = vrot.slane %v1625_v16, 4  ;;  %v1900_v27 = vrot.slane %v4437_v1, 4  ;;  %v3757_v57 = vor.u32 %v760_v47, %v757_v7 }
  0xb2   : > { %v1495_v35 = vpop.permute.xlu0 %1494  ;;  %1828 = vrot.lane.b32.xlu1 %v1751_v54, %s2849_s21  ;;  %v765_v54 = vshrl.u32 %v663_v36, 16  ;;  %v1221_v36 = vld [vmem:[%s2887_s17 + $0x14] sm:$0xf]  ;;  %v981_v16 = vrot.slane %v979_v50, 6  ;;  %v1798_v7 = vshll.u32 %v1705_v48, 16  ;;  %v1802_v47 = vshrl.u32 %v1705_v48, 16 }
  0xb3   : > { %1521 = vst.msk [vmem:[#allocation2 + $0x34] sm:$0xf] %vm463_vm10, %v1495_v35  ;;  %v770_v56 = vrot.slane %v768_v34, 6  ;;  %v1250_v61 = vrot.slane %v1221_v36, 7  ;;  %v4492_v34 = vrot.slane %v3369_v2, 7  ;;  %v1631_v2 = vsel %vm2934_vm9, %v1626_v23, %v3707_v20 }
  0xb4   : > { %1826 = vrot.lane.b32.xlu0 %v1741_v25, %s2849_s21  ;;  %v1825_v14 = vpop.permute.xlu1 %1824  ;;  %v938_v25 = vld [vmem:[%s2887_s17 + $0x14] sm:$0xf]  ;;  %v1971_v36 = vld [vmem:[%s2887_s17 + $0x1c] sm:$0xf]  ;;  %v763_v48 = vrot.slane %v3757_v57, 4  ;;  %v3792_v20 = vrot.slane %v1798_v7, 5 }
  0xb5   : > { %1856 = vst.msk [vmem:[#allocation2 + $0xc] sm:$0xf] %vm816_vm13, %v1825_v14  ;;  %v1901_v14 = vrot.slane %v3736_v45, 5  ;;  %v989_v18 = vshrl.u32 %v938_v25, 16  ;;  %v992_v53 = vshll.u32 %v938_v25, 16  ;;  %v1249_v25 = vrot.slane %v4492_v34, 4 }
  0xb6   : > { %v1823_v35 = vpop.permute.xlu0 %1822  ;;  %626 = vrot.lane.b32.xlu1 %v597_v31, %s2848_s20  ;;  %v1972_v23 = vld [vmem:[%s2887_s17 + $0x20] sm:$0xf]  ;;  %v1227_v7 = vld [vmem:[%s2887_s17 + $0x2c] sm:$0xf] }
  0xb7   : > { %1855 = vst.msk [vmem:[#allocation2 + $0x4] sm:$0xf] %vm816_vm13, %v1823_v35  ;;  %v767_v35 = vrot.slane %v765_v54, 5  ;;  %v1641_v54 = vsel %vm2934_vm9, %v1636_v13, %v3600_v60  ;;  %v1252_v13 = vrot.slane %v1250_v61, 4  ;;  %v1251_v34 = vsel %vm3287_vm5, %v1249_v25, %v1250_v61 }
  0xb8   : > { %624 = vrot.lane.b32.xlu0 %v587_v24, %s2848_s20  ;;  %v623_v31 = vpop.permute.xlu1 %622  ;;  %v984_v24 = vrot.slane %v982_v12, 7  ;;  %v1902_v12 = vsel %vm2897_vm6, %v1900_v27, %v1901_v14  ;;  %1289 = vst.msk [vmem:[#allocation2 + $0x14] sm:$0xf] %vm183_vm2, %v1251_v34  ;;  %v1804_v61 = vrot.slane %v1802_v47, 4  ;;  %v3805_v47 = vld [vmem:[%s2887_s17 + $0x30] sm:$0xf] }
  0xb9   : > { %649 = vst.msk [vmem:[#allocation2 + $0x38] sm:$0xf] %vm641_vm12, %v623_v31  ;;  %v2836_v31 = vld [vmem:[%s2887_s17 + $0x30] sm:$0xf]  ;;  %v2023_v34 = vshll.u32 %v1972_v23, 16 }
  0xba   : > { %v621_v37 = vpop.permute.xlu0 %620  ;;  %895 = vrot.lane.b32.xlu1 %v867_v8, %s2850_s22  ;;  %v1792_v1 = vshrl.u32 %v2836_v31, 16  ;;  %v991_v31 = vrot.slane %v989_v18, 6 }
  0xbb   : > { %648 = vst.msk [vmem:[#allocation2 + $0x30] sm:$0xf] %vm641_vm12, %v621_v37  ;;  %v4493_v37 = vrot.slane %v3112_v41, 5  ;;  %v985_v41 = vor.u32 %v984_v24, %v981_v16  ;;  %v753_v24 = vrot.slane %v3130_v29, 4 }
  0xbc   : > { %893 = vrot.lane.b32.xlu0 %v864_v9, %s2850_s22  ;;  %v892_v50 = vpop.permute.xlu1 %891  ;;  %v3781_v9 = vor.u32 %v770_v56, %v767_v35  ;;  %v2010_v35 = vshrl.u32 %v1971_v36, 16  ;;  %v2013_v56 = vshll.u32 %v1971_v36, 16 }
  0xbd   : > { %v1897_v8 = vrot.slane %v4493_v37, 4  ;;  %924 = vst.msk [vmem:[#allocation2 + $0x8] sm:$0xf] %vm922_vm15, %v892_v50  ;;  %v994_v37 = vrot.slane %v992_v53, 7  ;;  %v1254_v50 = vsel %vm3287_vm5, %v1252_v13, %v1253_v44  ;;  %v4494_v53 = vrot.slane %v3711_v52, 5 }
  0xbe   : > { %v890_v27 = vpop.permute.xlu0 %889  ;;  %1670 = vrot.lane.b32.xlu1 %v1641_v54, %s2848_s20  ;;  %1290 = vst.msk [vmem:[#allocation2 + $0x1c] sm:$0xf] %vm183_vm2, %v1254_v50  ;;  %v1794_v54 = vrot.slane %v1792_v1, 4  ;;  %v772_v36 = vsel %vm2971_vm11, %v763_v48, %v3781_v9  ;;  %v987_v13 = vrot.slane %v985_v41, 4  ;;  %v2020_v52 = vshrl.u32 %v1972_v23, 16 }
  0xbf   : > { %923 = vst.msk [vmem:[#allocation2] sm:$0xf] %vm922_vm15, %v890_v27  ;;  %v1899_v16 = vsel %vm2897_vm6, %v1897_v8, %v4494_v53  ;;  %v1805_v8 = vor.u32 %v1804_v61, %v3792_v20  ;;  %v2012_v29 = vrot.slane %v2010_v35, 5  ;;  %v2015_v1 = vrot.slane %v2013_v56, 6 }
  0xc0   : > { %1668 = vrot.lane.b32.xlu0 %v1631_v2, %s2848_s20  ;;  %v1667_v18 = vpop.permute.xlu1 %1666  ;;  %v3811_v2 = vor.u32 %v994_v37, %v991_v31  ;;  %v1268_v50 = vrot.slane %v1227_v7, 7  ;;  %v762_v48 = vsel %vm2971_vm11, %v753_v24, %v3757_v57  ;;  %v977_v31 = vrot.slane %v3163_v22, 4 }
  0xc1   : > { %1692 = vst.msk [vmem:[#allocation2 + $0x3c] sm:$0xf] %vm641_vm12, %v1667_v18  ;;  %v1795_v37 = vor.u32 %v1794_v54, %v3182_v63  ;;  %v4495_v56 = vrot.slane %v3445_v40, 7  ;;  %v1806_v53 = vrot.slane %v1805_v8, 4  ;;  %v2022_v57 = vrot.slane %v2020_v52, 5 }
  0xc2   : > { %v1665_v25 = vpop.permute.xlu0 %1664  ;;  %1930 = vrot.lane.b32.xlu1 %v1902_v12, %s2850_s22  ;;  %v1271_v12 = vrot.slane %v3805_v47, 7  ;;  %v996_v23 = vsel %vm3173_vm1, %v987_v13, %v3811_v2  ;;  %v1270_v35 = vrot.slane %v1268_v50, 4  ;;  %v2025_v24 = vrot.slane %v2023_v34, 6  ;;  %v837_v63 = vld [vmem:[%s2887_s17 + $0x28] sm:$0xf] }
  0xc3   : > { %1691 = vst.msk [vmem:[#allocation2 + $0x34] sm:$0xf] %vm641_vm12, %v1665_v25  ;;  %v1267_v18 = vrot.slane %v4495_v56, 4  ;;  %v986_v40 = vsel %vm3173_vm1, %v977_v31, %v985_v41  ;;  %v1796_v25 = vrot.slane %v1795_v37, 4  ;;  %v1811_v13 = vsel %vm2934_vm9, %v1806_v53, %v3661_v19  ;;  %v1115_v34 = vld [vmem:[%s2887_s17 + $0x10] sm:$0xf] }
  0xc4   : > { %1928 = vrot.lane.b32.xlu0 %v1899_v16, %s2850_s22  ;;  %v1927_v27 = vpop.permute.xlu1 %1926  ;;  %v2016_v16 = vor.u32 %v2015_v1, %v2012_v29  ;;  %v1272_v54 = vsel %vm3287_vm5, %v1270_v35, %v1271_v12  ;;  %v3848_v8 = vor.u32 %v2025_v24, %v2022_v57  ;;  %v881_v41 = vrot.slane %v837_v63, 6  ;;  %v3852_v1 = vld [vmem:[%s2887_s17 + $0x2c] sm:$0xf]  ;;  %v3862_v31 = vld [vmem:[%s2887_s17 + $0x34] sm:$0xf] }
  0xc5   : > { %1958 = vst.msk [vmem:[#allocation2 + $0xc] sm:$0xf] %vm922_vm15, %v1927_v27  ;;  %v1269_v7 = vsel %vm3287_vm5, %v1267_v18, %v1268_v50  ;;  %v1801_v27 = vsel %vm2934_vm9, %v1796_v25, %v3792_v20  ;;  %v2008_v50 = vrot.slane %v3222_v43, 4  ;;  %v1147_v20 = vrot.slane %v1115_v34, 7  ;;  %v943_v35 = vld [vmem:[%s2887_s17 + $0x28] sm:$0xf] }
  0xc6   : > { %v1925_v61 = vpop.permute.xlu0 %1924  ;;  %801 = vrot.lane.b32.xlu1 %v772_v36, %s2849_s21  ;;  %1296 = vst.msk [vmem:[#allocation2 + $0x4c] sm:$0xf] %vm183_vm2, %v1272_v54  ;;  %1295 = vst.msk [vmem:[#allocation2 + $0x44] sm:$0xf] %vm183_vm2, %v1269_v7  ;;  %v2018_v52 = vrot.slane %v2016_v16, 4  ;;  %v4496_v56 = vrot.slane %v3215_v21, 6 }
  0xc7   : > { %1957 = vst.msk [vmem:[#allocation2 + $0x4] sm:$0xf] %vm922_vm15, %v1925_v61  ;;  %v883_v61 = vrot.slane %v881_v41, 4  ;;  %v3874_v53 = vld [vmem:[%s2887_s17 + $0x14] sm:$0xf]  ;;  %v2017_v57 = vsel %vm2971_vm11, %v2008_v50, %v2016_v16  ;;  %v1039_v21 = vshrl.u32 %v943_v35, 16 }
  0xc8   : > { %799 = vrot.lane.b32.xlu0 %v762_v48, %s2849_s21  ;;  %v798_v22 = vpop.permute.xlu1 %797  ;;  %v2027_v37 = vsel %vm2971_vm11, %v2018_v52, %v3848_v8  ;;  %v880_v18 = vrot.slane %v4496_v56, 4  ;;  %v3880_v24 = vld [vmem:[%s2887_s17 + $0x38] sm:$0xf]  ;;  %v3885_v54 = vld [vmem:[%s2887_s17 + $0x1c] sm:$0xf]  ;;  %v1149_v25 = vrot.slane %v1147_v20, 4 }
  0xc9   : > { %824 = vst.msk [vmem:[#allocation2 + $0x38] sm:$0xf] %vm816_vm13, %v798_v22  ;;  %v1916_v22 = vrot.slane %v3862_v31, 5  ;;  %v944_v7 = vld [vmem:[%s2887_s17 + $0x2c] sm:$0xf]  ;;  %v2174_v31 = vrot.slane %v3885_v54, 6 }
  0xca   : > { %v796_v36 = vpop.permute.xlu0 %795  ;;  %1073 = vrot.lane.b32.xlu1 %v996_v23, %s2851_s4  ;;  %v4438_v23 = vrot.slane %v3852_v1, 6  ;;  %v882_v52 = vsel %vm3079_vm14, %v880_v18, %v881_v41  ;;  %v1041_v41 = vrot.slane %v1039_v21, 6  ;;  %v1978_v18 = vld [vmem:[%s2887_s17 + $0x38] sm:$0xf]  ;;  %v4498_v21 = vrot.slane %v3253_v62, 5 }
  0xcb   : > { %823 = vst.msk [vmem:[#allocation2 + $0x30] sm:$0xf] %vm816_vm13, %v796_v36  ;;  %v4439_v36 = vrot.slane %v3874_v53, 7  ;;  %v1918_v50 = vrot.slane %v1916_v22, 4  ;;  %v2083_v62 = vshll.u32 %v1978_v18, 16  ;;  %v4535_v42 = vrot.slane %v3874_v53, 7 }
  0xcc   : > { %1071 = vrot.lane.b32.xlu0 %v986_v40, %s2851_s4  ;;  %v1070_v29 = vpop.permute.xlu1 %1069  ;;  %v1042_v40 = vshll.u32 %v943_v35, 16  ;;  %v885_v16 = vsel %vm3079_vm14, %v883_v61, %v4438_v23  ;;  %v3905_v35 = vld [vmem:[%s2887_s17 + $0x20] sm:$0xf] }
  0xcd   : > { %1102 = vst.msk [vmem:[#allocation2 + $0x8] sm:$0xf] %vm1100_vm0, %v1070_v29  ;;  %v4497_v29 = vrot.slane %v3227_v46, 7  ;;  %v1052_v46 = vshll.u32 %v944_v7, 16  ;;  %v1151_v56 = vsel %vm3287_vm5, %v1149_v25, %v4439_v36 }
  0xce   : > { %v1068_v48 = vpop.permute.xlu0 %1067  ;;  %1840 = vrot.lane.b32.xlu1 %v1811_v13, %s2849_s21 }
  0xcf   : > { %1101 = vst.msk [vmem:[#allocation2] sm:$0xf] %vm1100_vm0, %v1068_v48  ;;  %v1146_v34 = vrot.slane %v4497_v29, 4  ;;  %v1919_v48 = vrot.slane %v3880_v24, 5  ;;  %v2177_v29 = vrot.slane %v3905_v35, 6 }
  0xd0   : > { %1838 = vrot.lane.b32.xlu0 %v1801_v27, %s2849_s21  ;;  %v1837_v43 = vpop.permute.xlu1 %1836  ;;  %v1977_v27 = vld [vmem:[%s2887_s17 + $0x34] sm:$0xf] }
  0xd1   : > { %1862 = vst.msk [vmem:[#allocation2 + $0x3c] sm:$0xf] %vm816_vm13, %v1837_v43  ;;  %v1044_v43 = vrot.slane %v1042_v40, 7  ;;  %v200_v40 = vld [vmem:[%s2887_s17 + $0x14] sm:$0xf]  ;;  %v1920_v25 = vsel %vm2897_vm6, %v1918_v50, %v1919_v48 }
  0xd2   : > { %v1835_v63 = vpop.permute.xlu0 %1834  ;;  %2104 = vrot.lane.b32.xlu1 %v2027_v37, %s2851_s4  ;;  %v1049_v37 = vshrl.u32 %v944_v7, 16  ;;  %v1915_v7 = vrot.slane %v4498_v21, 4  ;;  %v260_v23 = vshll.u32 %v200_v40, 16  ;;  %v264_v36 = vshrl.u32 %v200_v40, 16 }
  0xd3   : > { %1861 = vst.msk [vmem:[#allocation2 + $0x34] sm:$0xf] %vm816_vm13, %v1835_v63  ;;  %v2073_v63 = vshll.u32 %v1977_v27, 16 }
  0xd4   : > { %2102 = vrot.lane.b32.xlu0 %v2017_v57, %s2851_s4  ;;  %v2101_v13 = vpop.permute.xlu1 %2100  ;;  %v2070_v57 = vshrl.u32 %v1977_v27, 16 }
  0xd5   : > { %2132 = vst.msk [vmem:[#allocation2 + $0xc] sm:$0xf] %vm1100_vm0, %v2101_v13  ;;  %v2176_v13 = vrot.slane %v2174_v31, 4 }
  0xd6   : > { %v2099_v61 = vpop.permute.xlu0 %2098  ;;  %907 = vrot.lane.b32.xlu1 %v885_v16, %s2850_s22  ;;  %v1148_v16 = vsel %vm3287_vm5, %v1146_v34, %v1147_v20  ;;  %v1045_v20 = vor.u32 %v1044_v43, %v1041_v41  ;;  %v1054_v34 = vrot.slane %v1052_v46, 7  ;;  %v2072_v21 = vrot.slane %v2070_v57, 5 }
  0xd7   : > { %2131 = vst.msk [vmem:[#allocation2 + $0x4] sm:$0xf] %vm1100_vm0, %v2099_v61  ;;  %v2080_v61 = vshrl.u32 %v1978_v18, 16  ;;  %v4499_v41 = vrot.slane %v3295_v6, 6  ;;  %v266_v6 = vrot.slane %v264_v36, 4 }
  0xd8   : > { %905 = vrot.lane.b32.xlu0 %v882_v52, %s2850_s22  ;;  %v904_v54 = vpop.permute.xlu1 %903  ;;  %v1051_v52 = vrot.slane %v1049_v37, 6  ;;  %v1917_v37 = vsel %vm2897_vm6, %v1915_v7, %v1916_v22  ;;  %v1047_v18 = vrot.slane %v1045_v20, 4  ;;  %v2085_v22 = vrot.slane %v2083_v62, 6  ;;  %v1303_v62 = vld [vmem:[%s2887_s17 + $0x1c] sm:$0xf] }
  0xd9   : > { %930 = vst.msk [vmem:[#allocation2 + $0x38] sm:$0xf] %vm922_vm15, %v904_v54  ;;  %v2075_v54 = vrot.slane %v2073_v63, 6  ;;  %v2173_v43 = vrot.slane %v4499_v41, 4  ;;  %v2082_v63 = vrot.slane %v2080_v61, 5  ;;  %v3941_v7 = vrot.slane %v260_v23, 5 }
  0xda   : > { %v902_v27 = vpop.permute.xlu0 %901  ;;  %1179 = vrot.lane.b32.xlu1 %v1151_v56, %s2852_s27  ;;  %v2178_v56 = vsel %vm3079_vm14, %v2176_v13, %v2177_v29  ;;  %v3938_v57 = vor.u32 %v1054_v34, %v1051_v52  ;;  %v1037_v52 = vrot.slane %v3357_v32, 4  ;;  %v1121_v32 = vld [vmem:[%s2887_s17 + $0x28] sm:$0xf] }
  0xdb   : > { %929 = vst.msk [vmem:[#allocation2 + $0x30] sm:$0xf] %vm922_vm15, %v902_v27  ;;  %v2175_v13 = vsel %vm3079_vm14, %v2173_v43, %v2174_v31  ;;  %v176_v27 = vld [vmem:[%s2887_s17 + $0x10] sm:$0xf]  ;;  %v3957_v61 = vor.u32 %v2085_v22, %v2082_v63  ;;  %v267_v31 = vor.u32 %v266_v6, %v3941_v7  ;;  %v3974_v6 = vld [vmem:[%s2887_s17 + $0x2c] sm:$0xf] }
  0xdc   : > { %1177 = vrot.lane.b32.xlu0 %v1148_v16, %s2852_s27  ;;  %v1176_v50 = vpop.permute.xlu1 %1175  ;;  %v2076_v16 = vor.u32 %v2075_v54, %v2072_v21  ;;  %188 = vst.msk [vmem:[#allocation2 + $0x20] sm:$0xf] %vm183_vm2, %v176_v27  ;;  %v1056_v36 = vsel %vm3173_vm1, %v1047_v18, %v3938_v57  ;;  %v1223_v54 = vld [vmem:[%s2887_s17 + $0x1c] sm:$0xf]  ;;  %v1355_v18 = vshrl.u32 %v1303_v62, 16  ;;  %v4502_v27 = vld [vmem:[#allocation12_spill] sm:$0xff] }
  0xdd   : > { %1208 = vst.msk [vmem:[#allocation2 + $0x8] sm:$0xf] %vm1206_vm3, %v1176_v50  ;;  %v1046_v50 = vsel %vm3173_vm1, %v1037_v52, %v1045_v20  ;;  %v1256_v43 = vrot.slane %v1223_v54, 7  ;;  %v268_v22 = vrot.slane %v267_v31, 4  ;;  %v1255_v20 = vrot.slane %v1253_v44, 4  ;;  %v4501_v52 = vld [vmem:[#allocation13_spill] sm:$0xff] }
  0xde   : > { %v1174_v46 = vpop.permute.xlu0 %1173  ;;  %1942 = vrot.lane.b32.xlu1 %v1920_v25, %s2850_s22  ;;  %v177_v25 = vld [vmem:[%s2887_s17 + $0x14] sm:$0xf]  ;;  %v2078_v34 = vrot.slane %v2076_v16, 4 }
  0xdf   : > { %1207 = vst.msk [vmem:[#allocation2] sm:$0xf] %vm1206_vm3, %v1174_v46  ;;  %v1257_v44 = vsel %vm3287_vm5, %v1255_v20, %v1256_v43  ;;  %v4507_v20 = vld [vmem:[#allocation19_spill] sm:$0xff] }
  0xe0   : > { %1940 = vrot.lane.b32.xlu0 %v1917_v37, %s2850_s22  ;;  %v1939_v40 = vpop.permute.xlu1 %1938  ;;  %189 = vst.msk [vmem:[#allocation2 + $0x28] sm:$0xf] %vm183_vm2, %v177_v25  ;;  %v4500_v37 = vld [vmem:[#allocation17_spill] sm:$0xff]  ;;  %v2087_v63 = vsel %vm2971_vm11, %v2078_v34, %v3957_v61  ;;  %v4504_v34 = vld [vmem:[#allocation22_spill] sm:$0xff]  ;;  %1291 = vst.msk [vmem:[#allocation2 + $0x24] sm:$0xf] %vm183_vm2, %v1257_v44 }
  0xe1   : > { %1964 = vst.msk [vmem:[#allocation2 + $0x3c] sm:$0xf] %vm922_vm15, %v1939_v40  ;;  %v2068_v41 = vrot.slane %v4500_v37, 4  ;;  %v1258_v40 = vrot.slane %v1256_v43, 4  ;;  %v4505_v31 = vrot.slane %v4504_v34, 7  ;;  %v1357_v37 = vrot.slane %v1355_v18, 7 }
  0xe2   : > { %v1937_v23 = vpop.permute.xlu0 %1936  ;;  %2206 = vrot.lane.b32.xlu1 %v2178_v56, %s2852_s27  ;;  %v1165_v56 = vrot.slane %v1121_v32, 7  ;;  %v374_v44 = vld [vmem:[%s2887_s17 + $0x14] sm:$0xf] }
  0xe3   : > { %1963 = vst.msk [vmem:[#allocation2 + $0x34] sm:$0xf] %vm922_vm15, %v1937_v23  ;;  %v4503_v23 = vor.u32 %v4501_v52, %v4502_v27  ;;  %v1260_v51 = vsel %vm3287_vm5, %v1258_v40, %v4505_v31  ;;  %v1362_v34 = vrot.slane %v1357_v37, 4  ;;  %v4509_v31 = vld [vmem:[#allocation4_spill] sm:$0xff] }
  0xe4   : > { %2204 = vrot.lane.b32.xlu0 %v2175_v13, %s2852_s27  ;;  %v2203_v21 = vpop.permute.xlu1 %2202  ;;  %v2077_v13 = vsel %vm2971_vm11, %v2068_v41, %v2076_v16  ;;  %1292 = vst.msk [vmem:[#allocation2 + $0x2c] sm:$0xf] %vm183_vm2, %v1260_v51  ;;  %v4506_v16 = vld [vmem:[#allocation3_spill] sm:$0xff]  ;;  %v2837_v41 = vld [vmem:[%s2887_s17 + $0x20] sm:$0xf] }
  0xe5   : > { %2234 = vst.msk [vmem:[#allocation2 + $0xc] sm:$0xf] %vm1206_vm3, %v2203_v21  ;;  %v1168_v21 = vrot.slane %v3974_v6, 7  ;;  %v273_v54 = vsel %vm2934_vm9, %v268_v22, %v4506_v16  ;;  %v1358_v22 = vshll.u32 %v1303_v62, 16  ;;  %v4017_v51 = vld [vmem:[%s2887_s17 + $0x38] sm:$0xf] }
  0xe6   : > { %v2201_v46 = vpop.permute.xlu0 %2200  ;;  %1085 = vrot.lane.b32.xlu1 %v1056_v36, %s2851_s4  ;;  %v258_v36 = vrot.slane %v4503_v23, 4  ;;  %v2818_v18 = vld [vmem:[#allocation2] ss:$8 sps:$4 sm:$0xff]  }
  0xe7   : > { %2233 = vst.msk [vmem:[#allocation2 + $0x4] sm:$0xf] %vm1206_vm3, %v2201_v46  ;;  %v1367_v46 = vshll.u32 %v2837_v41, 16  ;;  %v4510_v16 = vld [vmem:[#allocation20_spill] sm:$0xff] }
  0xe8   : > { %1083 = vrot.lane.b32.xlu0 %v1046_v50, %s2851_s4  ;;  %v1082_v25 = vpop.permute.xlu1 %1081  ;;  %v1167_v50 = vrot.slane %v1165_v56, 4  ;;  %v263_v40 = vsel %vm2934_vm9, %v258_v36, %v3941_v7 }
  0xe9   : > { %1108 = vst.msk [vmem:[#allocation2 + $0x38] sm:$0xf] %vm1100_vm0, %v1082_v25  ;;  %v4508_v25 = vrot.slane %v4507_v20, 7  ;;  %v1369_v7 = vor.u32 %v1367_v46, %v4509_v31  ;;  %v480_v20 = vld [vmem:[%s2887_s17 + $0x14] sm:$0xf] }
  0xea   : > { %v1080_v32 = vpop.permute.xlu0 %1079  ;;  %2116 = vrot.lane.b32.xlu1 %v2087_v63, %s2851_s4  ;;  %v2151_v63 = vld [vmem:[%s2887_s17 + $0x34] sm:$0xf] }
  0xeb   : > { %1107 = vst.msk [vmem:[#allocation2 + $0x30] sm:$0xf] %vm1100_vm0, %v1080_v32  ;;  %v1164_v52 = vrot.slane %v4508_v25, 4  ;;  %v2192_v36 = vrot.slane %v2151_v63, 6  ;;  %v1370_v46 = vsel %vm2921_vm7, %v1362_v34, %v1369_v7  ;;  %v2195_v63 = vrot.slane %v4017_v51, 6  ;;  %v4511_v25 = vld [vmem:[#allocation21_spill] sm:$0xff] }
  0xec   : > { %2114 = vrot.lane.b32.xlu0 %v2077_v13, %s2851_s4  ;;  %v2113_v43 = vpop.permute.xlu1 %2112  ;;  %v1169_v13 = vsel %vm3287_vm5, %v1167_v50, %v1168_v21  ;;  %v1360_v50 = vor.u32 %v1358_v22, %v1357_v37  ;;  %v543_v34 = vshll.u32 %v480_v20, 16  ;;  %v1309_v31 = vld [vmem:[%s2887_s17 + $0x34] sm:$0xf]  ;;  %v1531_v7 = vld [vmem:[%s2887_s17 + $0x20] sm:$0xf] }
  0xed   : > { %2138 = vst.msk [vmem:[#allocation2 + $0x3c] sm:$0xf] %vm1100_vm0, %v2113_v43  ;;  %v1166_v32 = vsel %vm3287_vm5, %v1164_v52, %v1165_v56  ;;  %v2194_v43 = vrot.slane %v2192_v36, 4  ;;  %v4512_v52 = vrot.slane %v4511_v25, 6  ;;  %v1592_v25 = vshrl.u32 %v1531_v7, 16 }
  0xee   : > { %v2111_v27 = vpop.permute.xlu0 %2110  ;;  %334 = vrot.lane.b32.xlu1 %v273_v54, %s2847_s19  ;;  %v2820_v23 = vld [vmem:[#allocation2 + $0x4] ss:$8 sps:$4 sm:$0xff]   ;;  %v1353_v54 = vrot.slane %v4510_v16, 4 }
  0xef   : > { %2137 = vst.msk [vmem:[#allocation2 + $0x34] sm:$0xf] %vm1100_vm0, %v2111_v27  ;;  %2479 = vmatprep.mubr.bf16.mxu0 %v2820_v23  ;;  %v2191_v22 = vrot.slane %v4512_v52, 4  ;;  %v2196_v23 = vsel %vm3079_vm14, %v2194_v43, %v2195_v63  ;;  %v4515_v52 = vld [vmem:[#allocation5_spill] sm:$0xff] }
  0xf0   : > { %332 = vrot.lane.b32.xlu0 %v263_v40, %s2847_s19  ;;  %v331_v62 = vpop.permute.xlu1 %330  ;;  %2480 = vmatmul.mubr.bf16.vlgmr.msra.gmra.mrb[0].mxu0 %v2818_v18  ;;  %v410_v40 = vrot.slane %v374_v44, 5  ;;  %v1361_v37 = vsel %vm2921_vm7, %v1353_v54, %v1360_v50  ;;  %v540_v18 = vshrl.u32 %v480_v20, 16  ;;  %v206_v50 = vld [vmem:[%s2887_s17 + $0x2c] sm:$0x1]  ;;  %v1409_v20 = vshrl.u32 %v1309_v31, 16 }
  0xf1   : > { %361 = vst.msk [vmem:[#allocation2 + $0x18] sm:$0xf] %vm357_vm8, %v331_v62  ;;  %v2193_v44 = vsel %vm3079_vm14, %v2191_v22, %v2192_v36  ;;  %v545_v22 = vrot.slane %v543_v34, 6 }
  0xf2   : > { %v329_v41 = vpop.permute.xlu0 %328  ;;  %1191 = vrot.lane.b32.xlu1 %v1169_v13, %s2852_s27  ;;  %v412_v13 = vrot.slane %v410_v40, 4  ;;  %v542_v43 = vrot.slane %v540_v18, 5  ;;  %v1411_v47 = vrot.slane %v1409_v20, 7  ;;  %v1464_v20 = vld [vmem:[%s2887_s17 + $0x1c] sm:$0xf] }
  0xf3   : > { %360 = vst.msk [vmem:[#allocation2 + $0x10] sm:$0xf] %vm357_vm8, %v329_v41  ;;  %v182_v41 = vld [vmem:[%s2887_s17 + $0x28] sm:$0xf] }
  0xf4   : > { %1189 = vrot.lane.b32.xlu0 %v1166_v32, %s2852_s27  ;;  %v1188_v56 = vpop.permute.xlu1 %1187  ;;  %v4513_v32 = vld [vmem:[#allocation24_spill] sm:$0xff]  ;;  %194 = vst.msk [vmem:[#allocation2 + $0x50] sm:$0xf] %vm183_vm2, %v182_v41 }
  0xf5   : > { %1214 = vst.msk [vmem:[#allocation2 + $0x38] sm:$0xf] %vm1206_vm3, %v1188_v56  ;;  %v4514_v16 = vrot.slane %v4513_v32, 5  ;;  %v1588_v56 = vshll.u32 %v1531_v7, 16  ;;  %v320_v32 = vshll.u32 %v206_v50, 16 }
  0xf6   : > { %v1186_v27 = vpop.permute.xlu0 %1185  ;;  %1426 = vrot.lane.b32.xlu1 %v1370_v46, %s2847_s19  ;;  %v1465_v41 = vld [vmem:[%s2887_s17 + $0x20] sm:$0xf] }
  0xf7   : > { %1213 = vst.msk [vmem:[#allocation2 + $0x30] sm:$0xf] %vm1206_vm3, %v1186_v27  ;;  %v409_v54 = vrot.slane %v4514_v16, 4  ;;  %v4516_v27 = vrot.slane %v4515_v52, 5  ;;  %v4069_v34 = vrot.slane %v1588_v56, 5 }
  0xf8   : > { %1424 = vrot.lane.b32.xlu0 %v1361_v37, %s2847_s19  ;;  %v1423_v62 = vpop.permute.xlu1 %1422  ;;  %v1229_v37 = vld [vmem:[%s2887_s17 + $0x34] sm:$0x7] }
  0xf9   : > { %1452 = vst.msk [vmem:[#allocation2 + $0x1c] sm:$0xf] %vm357_vm8, %v1423_v62  ;;  %v414_v36 = vsel %vm2897_vm6, %v412_v13, %v4516_v27  ;;  %v1273_v62 = vrot.slane %v1271_v12, 4  ;;  %v411_v7 = vsel %vm2897_vm6, %v409_v54, %v410_v40  ;;  %v1412_v12 = vshll.u32 %v1309_v31, 16  ;;  %v4517_v31 = vld [vmem:[#allocation18_spill] sm:$0xff] }
  0xfa   : > { %v1421_v46 = vpop.permute.xlu0 %1420  ;;  %2218 = vrot.lane.b32.xlu1 %v2196_v23, %s2852_s27  ;;  %v1274_v23 = vrot.slane %v1229_v37, 7  ;;  %v538_v40 = vrot.slane %v3580_v55, 4  ;;  %v546_v54 = vor.u32 %v545_v22, %v542_v43  ;;  %v4518_v56 = vor.u32 %v4517_v31, %v3422_v58 }
  0xfb   : > { %1451 = vst.msk [vmem:[#allocation2 + $0x14] sm:$0xf] %vm357_vm8, %v1421_v46  ;;  %v658_v46 = vld [vmem:[%s2887_s17 + $0x18] sm:$0xf]  ;;  %v322_v37 = vrot.slane %v320_v32, 5  ;;  %v1407_v27 = vrot.slane %v3568_v11, 4  ;;  %v1414_v55 = vor.u32 %v1412_v12, %v1411_v47 }
  0xfc   : > { %2216 = vrot.lane.b32.xlu0 %v2193_v44, %s2852_s27  ;;  %v2215_v18 = vpop.permute.xlu1 %2214  ;;  %v1275_v16 = vsel %vm3287_vm5, %v1273_v62, %v1274_v23  ;;  %v1594_v44 = vrot.slane %v1592_v25, 4  ;;  %v318_v25 = vrot.slane %v4518_v56, 4  ;;  %v715_v22 = vshrl.u32 %v658_v46, 16  ;;  %v1701_v23 = vld [vmem:[%s2887_s17 + $0x24] sm:$0xf] }
  0xfd   : > { %2240 = vst.msk [vmem:[#allocation2 + $0x3c] sm:$0xf] %vm1206_vm3, %v2215_v18  ;;  %v718_v62 = vshll.u32 %v658_v46, 16  ;;  %v548_v11 = vrot.slane %v546_v54, 4  ;;  %v4520_v46 = vld [vmem:[#allocation25_spill] sm:$0xff] }
  0xfe   : > { %v2213_v13 = vpop.permute.xlu0 %2212  ;;  %440 = vrot.lane.b32.xlu1 %v414_v36, %s2846_s18  ;;  %1297 = vst.msk [vmem:[#allocation2 + $0x54] sm:$0xf] %vm183_vm2, %v1275_v16  ;;  %v1595_v43 = vor.u32 %v1594_v44, %v4069_v34  ;;  %v547_v36 = vsel %vm2971_vm11, %v538_v40, %v546_v54  ;;  %v323_v18 = vsel %vm2934_vm9, %v318_v25, %v322_v37  ;;  %v2821_v32 = vld [vmem:[#allocation2 + $0x30] ss:$8 sps:$4 sm:$0xff]   ;;  %v717_v12 = vrot.slane %v715_v22, 5 }
  0xff   : > { %2239 = vst.msk [vmem:[#allocation2 + $0x34] sm:$0xf] %vm1206_vm3, %v2213_v13  ;;  %v1415_v13 = vsel %vm2921_vm7, %v1407_v27, %v1414_v55  ;;  %v720_v44 = vrot.slane %v718_v62, 6  ;;  %v1762_v40 = vshrl.u32 %v1701_v23, 16  ;;  %v713_v25 = vrot.slane %v3666_v49, 4 }
 0x100   : > { %438 = vrot.lane.b32.xlu0 %v411_v7, %s2846_s18  ;;  %v437_v50 = vpop.permute.xlu1 %436  ;;  %v1596_v47 = vrot.slane %v1595_v43, 4  ;;  %v380_v37 = vld [vmem:[%s2887_s17 + $0x2c] sm:$0x1]  ;;  %v4523_v49 = vrot.slane %v3626_v59, 5 }
 0x101   : > { %467 = vst.msk [vmem:[#allocation2 + $0x18] sm:$0xf] %vm463_vm10, %v437_v50  ;;  %v4519_v50 = vld [vmem:[#allocation6_spill] sm:$0xff]  ;;  %v721_v55 = vor.u32 %v720_v44, %v717_v12 }
 0x102   : > { %v435_v52 = vpop.permute.xlu0 %434  ;;  %1492 = vrot.lane.b32.xlu1 %v1465_v41, %s2846_s18  ;;  %v1758_v41 = vshll.u32 %v1701_v23, 16  ;;  %v557_v26 = vsel %vm2971_vm11, %v548_v11, %v4519_v50  ;;  %v427_v62 = vrot.slane %v4523_v49, 4  ;;  %v1470_v12 = vld [vmem:[%s2887_s17 + $0x34] sm:$0xf]  ;;  %v4524_v50 = vld [vmem:[#allocation8_spill] sm:$0xff] }
 0x103   : > { %466 = vst.msk [vmem:[#allocation2 + $0x10] sm:$0xf] %vm463_vm10, %v435_v52  ;;  %v4522_v52 = vld [vmem:[#allocation7_spill] sm:$0xff]  ;;  %v722_v11 = vsel %vm2971_vm11, %v713_v25, %v721_v55 }
 0x104   : > { %1490 = vrot.lane.b32.xlu0 %v1464_v20, %s2846_s18  ;;  %v1489_v58 = vpop.permute.xlu1 %1488  ;;  %v4521_v20 = vor.u32 %v4520_v46, %v3504_v38  ;;  %v1601_v27 = vsel %vm2934_vm9, %v1596_v47, %v4522_v52  ;;  %v1760_v43 = vrot.slane %v1758_v41, 5  ;;  %v1537_v41 = vld [vmem:[%s2887_s17 + $0x38] sm:$0x1]  ;;  %v4525_v46 = vor.u32 %v3552_v17, %v3550_v10  ;;  %v4526_v52 = vld [vmem:[#allocation9_spill] sm:$0xff] }
 0x105   : > { %1518 = vst.msk [vmem:[#allocation2 + $0x1c] sm:$0xf] %vm463_vm10, %v1489_v58  ;;  %v428_v58 = vrot.slane %v380_v37, 5  ;;  %v1648_v37 = vshll.u32 %v1537_v41, 16  ;;  %v939_v17 = vld [vmem:[%s2887_s17 + $0x18] sm:$0xf] }
 0x106   : > { %v1487_v7 = vpop.permute.xlu0 %1486  ;;  %616 = vrot.lane.b32.xlu1 %v547_v36, %s2848_s20  ;;  %v2823_v16 = vld [vmem:[#allocation2 + $0x34] ss:$8 sps:$4 sm:$0xff]   ;;  %v1586_v31 = vrot.slane %v4521_v20, 4  ;;  %v1764_v36 = vrot.slane %v1762_v40, 4  ;;  %v1756_v20 = vrot.slane %v4525_v46, 4 }
 0x107   : > { %1517 = vst.msk [vmem:[#allocation2 + $0x14] sm:$0xf] %vm463_vm10, %v1487_v7  ;;  %2503 = vmatprep.mubr.bf16.mxu1 %v2823_v16  ;;  %v429_v59 = vsel %vm2897_vm6, %v427_v62, %v428_v58  ;;  %v598_v62 = vrot.slane %v3702_v3, 4 }
 0x108   : > { %344 = vrot.lane.b32.xlu0 %v323_v18, %s2847_s19  ;;  %v343_v54 = vpop.permute.xlu1 %342  ;;  %2504 = vmatmul.mubr.bf16.vlgmr.msra.gmra.mrb[0].mxu1 %v2821_v32  ;;  %v1591_v22 = vsel %vm2934_vm9, %v1586_v31, %v4069_v34  ;;  %v486_v18 = vld [vmem:[%s2887_s17 + $0x2c] sm:$0x3]  ;;  %v1765_v7 = vor.u32 %v1764_v36, %v1760_v43  ;;  %v723_v32 = vrot.slane %v721_v55, 4  ;;  %v4527_v55 = vrot.slane %v3705_v33, 6 }
 0x109   : > { %367 = vst.msk [vmem:[#allocation2 + $0x48] sm:$0xf] %vm357_vm8, %v343_v54  ;;  %v600_v16 = vshrl.u32 %v486_v18, 16  ;;  %v833_v54 = vld [vmem:[%s2887_s17 + $0x18] sm:$0xf]  ;;  %v1761_v49 = vsel %vm2934_vm9, %v1756_v20, %v1760_v43  ;;  %v4528_v33 = vor.u32 %v3602_v28, %v3600_v60  ;;  %v1002_v43 = vshll.u32 %v939_v17, 16 }
 0x10a   : > { %v341_v56 = vpop.permute.xlu0 %340  ;;  %1436 = vrot.lane.b32.xlu1 %v1415_v13, %s2847_s19  ;;  %v603_v13 = vshll.u32 %v486_v18, 16  ;;  %v1766_v44 = vrot.slane %v1765_v7, 4  ;;  %v868_v36 = vrot.slane %v4527_v55, 4  ;;  %v1707_v20 = vld [vmem:[%s2887_s17 + $0x3c] sm:$0x1]  ;;  %s2786_s19 = smul.u32 44, %s4543_s13 }
 0x10b   : > { %366 = vst.msk [vmem:[#allocation2 + $0x40] sm:$0xf] %vm357_vm8, %v341_v56  ;;  %v602_v31 = vrot.slane %v600_v16, 5  ;;  %v1646_v18 = vrot.slane %v4528_v33, 4  ;;  %v1973_v16 = vld [vmem:[%s2887_s17 + $0x24] sm:$0xf] }
 0x10c   : > { %618 = vrot.lane.b32.xlu0 %v557_v26, %s2848_s20  ;;  %v615_v38 = vpop.permute.xlu1 %614  ;;  %v732_v26 = vsel %vm2971_vm11, %v723_v32, %v4524_v50  ;;  %v605_v56 = vrot.slane %v603_v13, 6  ;;  %v999_v32 = vshrl.u32 %v939_v17, 16  ;;  %v2030_v50 = vshrl.u32 %v1973_v16, 16 }
 0x10d   : > { %645 = vst.msk [vmem:[#allocation2 + $0x18] sm:$0xf] %vm641_vm12, %v615_v38  ;;  %v869_v38 = vrot.slane %v833_v54, 6  ;;  %v1004_v54 = vrot.slane %v1002_v43, 7 }
 0x10e   : > { %v613_v23 = vpop.permute.xlu0 %612  ;;  %1662 = vrot.lane.b32.xlu1 %v1601_v27, %s2848_s20  ;;  %v1771_v27 = vsel %vm2934_vm9, %v1766_v44, %v4526_v52  ;;  %v606_v58 = vor.u32 %v605_v56, %v602_v31  ;;  %v4529_v31 = vld [vmem:[#allocation10_spill] sm:$0xff] }
 0x10f   : > { %644 = vst.msk [vmem:[#allocation2 + $0x10] sm:$0xf] %vm641_vm12, %v613_v23  ;;  %v871_v28 = vrot.slane %v869_v38, 4  ;;  %v4530_v56 = vrot.slane %v4529_v31, 6  ;;  %v4537_v31 = vrot.slane %v3852_v1, 6 }
 0x110   : > { %1660 = vrot.lane.b32.xlu0 %v1591_v22, %s2848_s20  ;;  %v1435_v34 = vpop.permute.xlu1 %1434  ;;  %v1871_v22 = vld [vmem:[%s2887_s17 + $0x24] sm:$0xf]  ;;  %v607_v60 = vsel %vm2971_vm11, %v598_v62, %v606_v58  ;;  %v2032_v62 = vrot.slane %v2030_v50, 5 }
 0x111   : > { %1458 = vst.msk [vmem:[#allocation2 + $0x4c] sm:$0xf] %vm357_vm8, %v1435_v34  ;;  %v1904_v7 = vrot.slane %v1871_v22, 5  ;;  %v664_v34 = vld [vmem:[%s2887_s17 + $0x30] sm:$0x3] }
 0x112   : > { %v1433_v47 = vpop.permute.xlu0 %1432  ;;  %791 = vrot.lane.b32.xlu1 %v722_v11, %s2849_s21  ;;  %v1650_v11 = vrot.slane %v1648_v37, 5  ;;  %v775_v13 = vshrl.u32 %v664_v34, 16  ;;  %v1903_v37 = vrot.slane %v1901_v14, 4 }
 0x113   : > { %1457 = vst.msk [vmem:[#allocation2 + $0x44] sm:$0xf] %vm357_vm8, %v1433_v47  ;;  %v778_v47 = vshll.u32 %v664_v34, 16  ;;  %v1906_v41 = vrot.slane %v1904_v7, 4 }
 0x114   : > { %450 = vrot.lane.b32.xlu0 %v429_v59, %s2846_s18  ;;  %v1659_v40 = vpop.permute.xlu1 %1658  ;;  %v870_v59 = vsel %vm3079_vm14, %v868_v36, %v869_v38  ;;  %v1651_v44 = vsel %vm2934_vm9, %v1646_v18, %v1650_v11  ;;  %v777_v52 = vrot.slane %v775_v13, 5  ;;  %v4531_v36 = vld [vmem:[#allocation11_spill] sm:$0xff]  ;;  %v1905_v14 = vsel %vm2897_vm6, %v1903_v37, %v1904_v7 }
 0x115   : > { %1688 = vst.msk [vmem:[#allocation2 + $0x1c] sm:$0xf] %vm641_vm12, %v1659_v40  ;;  %v1001_v40 = vrot.slane %v999_v32, 6  ;;  %v4532_v38 = vrot.slane %v4531_v36, 5  ;;  %v4533_v11 = vor.u32 %v3663_v15, %v3661_v19 }
 0x116   : > { %v1657_v25 = vpop.permute.xlu0 %1656  ;;  %1502 = vrot.lane.b32.xlu1 %v1470_v12, %s2846_s18 }
 0x117   : > { %1687 = vst.msk [vmem:[#allocation2 + $0x14] sm:$0xf] %vm641_vm12, %v1657_v25  ;;  %v873_v25 = vsel %vm3079_vm14, %v871_v28, %v4530_v56  ;;  %v1908_v22 = vsel %vm2897_vm6, %v1906_v41, %v4532_v38  ;;  %v1005_v17 = vor.u32 %v1004_v54, %v1001_v40  ;;  %v1816_v34 = vrot.slane %v4533_v11, 4  ;;  %v4534_v28 = vld [vmem:[#allocation14_spill] sm:$0xff]  ;;  %v4536_v54 = vld [vmem:[#allocation15_spill] sm:$0xff] }
 0x118   : > { %793 = vrot.lane.b32.xlu0 %v732_v26, %s2849_s21  ;;  %v449_v10 = vpop.permute.xlu1 %448  ;;  %v2033_v26 = vshll.u32 %v1973_v16, 16  ;;  %v1117_v16 = vld [vmem:[%s2887_s17 + $0x18] sm:$0xf]  ;;  %v839_v40 = vld [vmem:[%s2887_s17 + $0x30] sm:$0x3]  ;;  %v886_v56 = vrot.slane %v4537_v31, 4 }
 0x119   : > { %473 = vst.msk [vmem:[#allocation2 + $0x48] sm:$0xf] %vm463_vm10, %v449_v10  ;;  %v997_v10 = vrot.slane %v3811_v2, 4  ;;  %v1007_v43 = vrot.slane %v1005_v17, 4  ;;  %v1153_v41 = vrot.slane %v1117_v16, 7  ;;  %v1057_v16 = vrot.slane %v3938_v57, 4 }
 0x11a   : > { %v447_v23 = vpop.permute.xlu0 %446  ;;  %1832 = vrot.lane.b32.xlu1 %v1771_v27, %s2849_s21  ;;  %v780_v27 = vrot.slane %v778_v47, 6  ;;  %v2035_v58 = vrot.slane %v2033_v26, 6  ;;  %v2028_v47 = vrot.slane %v3848_v8, 4  ;;  %v2147_v8 = vld [vmem:[%s2887_s17 + $0x24] sm:$0xf] }
 0x11b   : > { %472 = vst.msk [vmem:[#allocation2 + $0x40] sm:$0xf] %vm463_vm10, %v447_v23  ;;  %v773_v23 = vrot.slane %v3781_v9, 4  ;;  %v1006_v2 = vsel %vm3173_vm1, %v997_v10, %v1005_v17  ;;  %v1016_v13 = vsel %vm3173_vm1, %v1007_v43, %v4534_v28  ;;  %v2180_v38 = vrot.slane %v2147_v8, 6 }
 0x11c   : > { %1830 = vrot.lane.b32.xlu0 %v1761_v49, %s2849_s21  ;;  %v790_v3 = vpop.permute.xlu1 %789  ;;  %v1818_v49 = vshll.u32 %v1707_v20, 16  ;;  %v781_v33 = vor.u32 %v780_v27, %v777_v52  ;;  %v2036_v32 = vor.u32 %v2035_v58, %v2032_v62  ;;  %v1979_v20 = vld [vmem:[%s2887_s17 + $0x3c] sm:$0x3]  ;;  %v1921_v27 = vrot.slane %v1919_v48, 4 }
 0x11d   : > { %820 = vst.msk [vmem:[#allocation2 + $0x18] sm:$0xf] %vm816_vm13, %v790_v3  ;;  %v2093_v10 = vshll.u32 %v1979_v20, 16 }
 0x11e   : > { %v788_v12 = vpop.permute.xlu0 %787  ;;  %897 = vrot.lane.b32.xlu1 %v870_v59, %s2850_s22  ;;  %v1820_v59 = vrot.slane %v1818_v49, 5  ;;  %v782_v9 = vsel %vm2971_vm11, %v773_v23, %v781_v33  ;;  %v2038_v15 = vrot.slane %v2036_v32, 4  ;;  %v2037_v53 = vsel %vm2971_vm11, %v2028_v47, %v2036_v32 }
 0x11f   : > { %819 = vst.msk [vmem:[#allocation2 + $0x10] sm:$0xf] %vm816_vm13, %v788_v12  ;;  %v1155_v49 = vrot.slane %v1153_v41, 4  ;;  %v2095_v23 = vrot.slane %v2093_v10, 6  ;;  %v2197_v47 = vrot.slane %v2195_v63, 4 }
 0x120   : > { %628 = vrot.lane.b32.xlu0 %v607_v60, %s2848_s20  ;;  %v1501_v46 = vpop.permute.xlu1 %1500  ;;  %v1821_v19 = vsel %vm2934_vm9, %v1816_v34, %v1820_v59  ;;  %v2047_v50 = vsel %vm2971_vm11, %v2038_v15, %v4536_v54  ;;  %v2179_v34 = vrot.slane %v2177_v29, 4  ;;  %v2153_v29 = vld [vmem:[%s2887_s17 + $0x3c] sm:$0x3] }
 0x121   : > { %1524 = vst.msk [vmem:[#allocation2 + $0x4c] sm:$0xf] %vm463_vm10, %v1501_v46  ;;  %v1877_v46 = vld [vmem:[%s2887_s17 + $0x3c] sm:$0x1] }
 0x122   : > { %v1499_v55 = vpop.permute.xlu0 %1498  ;;  %1672 = vrot.lane.b32.xlu1 %v1651_v44, %s2848_s20  ;;  %v1152_v44 = vrot.slane %v4535_v42, 4  ;;  %v1922_v36 = vrot.slane %v1877_v46, 5  ;;  %v2181_v15 = vsel %vm3079_vm14, %v2179_v34, %v2180_v38 }
 0x123   : > { %1523 = vst.msk [vmem:[#allocation2 + $0x44] sm:$0xf] %vm463_vm10, %v1499_v55  ;;  %v945_v55 = vld [vmem:[%s2887_s17 + $0x30] sm:$0x7] }
 0x124   : > { %899 = vrot.lane.b32.xlu0 %v873_v25, %s2850_s22  ;;  %v1829_v45 = vpop.permute.xlu1 %1828  ;;  %v887_v25 = vrot.slane %v839_v40, 6  ;;  %v1154_v52 = vsel %vm3287_vm5, %v1152_v44, %v1153_v41  ;;  %v1059_v62 = vshrl.u32 %v945_v55, 16  ;;  %v1062_v58 = vshll.u32 %v945_v55, 16 }
 0x125   : > { %1858 = vst.msk [vmem:[#allocation2 + $0x1c] sm:$0xf] %vm816_vm13, %v1829_v45  ;;  %v1923_v48 = vsel %vm2897_vm6, %v1921_v27, %v1922_v36  ;;  %v2182_v45 = vrot.slane %v2180_v38, 4  ;;  %v1170_v44 = vrot.slane %v1168_v21, 4  ;;  %vm2583_vm6 = vcmask 519168  }
 0x126   : > { %v1827_v18 = vpop.permute.xlu0 %1826  ;;  %1934 = vrot.lane.b32.xlu1 %v1908_v22, %s2850_s22  ;;  %v2090_v22 = vshrl.u32 %v1979_v20, 16  ;;  %v888_v17 = vsel %vm3079_vm14, %v886_v56, %v887_v25  ;;  %v1061_v59 = vrot.slane %v1059_v62, 6  ;;  %v1064_v4 = vrot.slane %v1062_v58, 7 }
 0x127   : > { %1857 = vst.msk [vmem:[#allocation2 + $0x14] sm:$0xf] %vm816_vm13, %v1827_v18  ;;  %v4538_v18 = vld [vmem:[#allocation16_spill] sm:$0xff] }
 0x128   : > { %1932 = vrot.lane.b32.xlu0 %v1905_v14, %s2850_s22  ;;  %v627_v7 = vpop.permute.xlu1 %626  ;;  %v2092_v14 = vrot.slane %v2090_v22, 5 }
 0x129   : > { %651 = vst.msk [vmem:[#allocation2 + $0x48] sm:$0xf] %vm641_vm12, %v627_v7  ;;  %v4540_v7 = vld [vmem:[#allocation23_spill] sm:$0xff] }
 0x12a   : > { %v625_v3 = vpop.permute.xlu0 %624  ;;  %1075 = vrot.lane.b32.xlu1 %v1006_v2, %s2851_s4  ;;  %v4539_v2 = vrot.slane %v4538_v18, 7 }
 0x12b   : > { %650 = vst.msk [vmem:[#allocation2 + $0x40] sm:$0xf] %vm641_vm12, %v625_v3  ;;  %v2088_v3 = vrot.slane %v3957_v61, 4 }
 0x12c   : > { %803 = vrot.lane.b32.xlu0 %v782_v9, %s2849_s21  ;;  %v896_v60 = vpop.permute.xlu1 %895  ;;  %v1157_v11 = vsel %vm3287_vm5, %v1155_v49, %v4539_v2  ;;  %v4541_v9 = vrot.slane %v4540_v7, 6 }
 0x12d   : > { %926 = vst.msk [vmem:[#allocation2 + $0x18] sm:$0xf] %vm922_vm15, %v896_v60  ;;  %v1065_v60 = vor.u32 %v1064_v4, %v1061_v59 }
 0x12e   : > { %v894_v12 = vpop.permute.xlu0 %893  ;;  %1842 = vrot.lane.b32.xlu1 %v1821_v19, %s2849_s21  ;;  %v2184_v43 = vsel %vm3079_vm14, %v2182_v45, %v4541_v9  ;;  %v2096_v19 = vor.u32 %v2095_v23, %v2092_v14 }
 0x12f   : > { %925 = vst.msk [vmem:[#allocation2 + $0x10] sm:$0xf] %vm922_vm15, %v894_v12  ;;  %v2198_v12 = vrot.slane %v2153_v29, 6  ;;  %v1066_v57 = vsel %vm3173_vm1, %v1057_v16, %v1065_v60 }
 0x130   : > { %1077 = vrot.lane.b32.xlu0 %v1016_v13, %s2851_s4  ;;  %v1671_v26 = vpop.permute.xlu1 %1670  ;;  %v1123_v13 = vld [vmem:[%s2887_s17 + $0x30] sm:$0x7]  ;;  %v2097_v61 = vsel %vm2971_vm11, %v2088_v3, %v2096_v19 }
 0x131   : > { %1694 = vst.msk [vmem:[#allocation2 + $0x4c] sm:$0xf] %vm641_vm12, %v1671_v26  ;;  %v1171_v41 = vrot.slane %v1123_v13, 7  ;;  %v2199_v30 = vsel %vm3079_vm14, %v2197_v47, %v2198_v12 }
 0x132   : > { %v1669_v37 = vpop.permute.xlu0 %1668  ;;  %2108 = vrot.lane.b32.xlu1 %v2047_v50, %s2851_s4 }
 0x133   : > { %1693 = vst.msk [vmem:[#allocation2 + $0x44] sm:$0xf] %vm641_vm12, %v1669_v37  ;;  %v1172_v39 = vsel %vm3287_vm5, %v1170_v44, %v1171_v41 }
 0x134   : > { %2106 = vrot.lane.b32.xlu0 %v2037_v53, %s2851_s4  ;;  %v1931_v1 = vpop.permute.xlu1 %1930 }
 0x135   : > { %1960 = vst.msk [vmem:[#allocation2 + $0x1c] sm:$0xf] %vm922_vm15, %v1931_v1 }
 0x136   : > { %v1929_v24 = vpop.permute.xlu0 %1928  ;;  %1181 = vrot.lane.b32.xlu1 %v1154_v52, %s2852_s27 }
 0x137   : > { %1959 = vst.msk [vmem:[#allocation2 + $0x14] sm:$0xf] %vm922_vm15, %v1929_v24 }
 0x138   : > { %909 = vrot.lane.b32.xlu0 %v888_v17, %s2850_s22  ;;  %v802_v33 = vpop.permute.xlu1 %801 }
 0x139   : > { %826 = vst.msk [vmem:[#allocation2 + $0x48] sm:$0xf] %vm816_vm13, %v802_v33 }
 0x13a   : > { %v800_v32 = vpop.permute.xlu0 %799  ;;  %1944 = vrot.lane.b32.xlu1 %v1923_v48, %s2850_s22  ;;  %s4361_s22 = scalar_lea.vmem %s4400_s3, %s2786_s19 }
 0x13b   : > { %825 = vst.msk [vmem:[#allocation2 + $0x40] sm:$0xf] %vm816_vm13, %v800_v32 }
 0x13c   : > { %1183 = vrot.lane.b32.xlu0 %v1157_v11, %s2852_s27  ;;  %v1074_v35 = vpop.permute.xlu1 %1073 }
 0x13d   : > { %1104 = vst.msk [vmem:[#allocation2 + $0x18] sm:$0xf] %vm1100_vm0, %v1074_v35 }
 0x13e   : > { %v1072_v28 = vpop.permute.xlu0 %1071  ;;  %2210 = vrot.lane.b32.xlu1 %v2184_v43, %s2852_s27 }
 0x13f   : > { %1103 = vst.msk [vmem:[#allocation2 + $0x10] sm:$0xf] %vm1100_vm0, %v1072_v28 }
 0x140   : > { %2208 = vrot.lane.b32.xlu0 %v2181_v15, %s2852_s27  ;;  %v1841_v42 = vpop.permute.xlu1 %1840 }
 0x141   : > { %1864 = vst.msk [vmem:[#allocation2 + $0x4c] sm:$0xf] %vm816_vm13, %v1841_v42 }
 0x142   : > { %v1839_v40 = vpop.permute.xlu0 %1838  ;;  %2118 = vrot.lane.b32.xlu1 %v2097_v61, %s2851_s4 }
 0x143   : > { %1863 = vst.msk [vmem:[#allocation2 + $0x44] sm:$0xf] %vm816_vm13, %v1839_v40 }
 0x144   : > { %1087 = vrot.lane.b32.xlu0 %v1066_v57, %s2851_s4  ;;  %v2105_v51 = vpop.permute.xlu1 %2104 }
 0x145   : > { %2134 = vst.msk [vmem:[#allocation2 + $0x1c] sm:$0xf] %vm1100_vm0, %v2105_v51 }
 0x146   : > { %v2103_v63 = vpop.permute.xlu0 %2102  ;;  %2220 = vrot.lane.b32.xlu1 %v2199_v30, %s2852_s27 }
 0x147   : > { %2133 = vst.msk [vmem:[#allocation2 + $0x14] sm:$0xf] %vm1100_vm0, %v2103_v63 }
 0x148   : > { %1193 = vrot.lane.b32.xlu0 %v1172_v39, %s2852_s27  ;;  %v908_v6 = vpop.permute.xlu1 %907 }
 0x149   : > { %932 = vst.msk [vmem:[#allocation2 + $0x48] sm:$0xf] %vm922_vm15, %v908_v6 }
 0x14a   : > { %v906_v0 = vpop.permute.xlu0 %905 }
 0x14b   : > { %931 = vst.msk [vmem:[#allocation2 + $0x40] sm:$0xf] %vm922_vm15, %v906_v0 }
 0x14c   : > { %v1180_v21 = vpop.permute.xlu1 %1179 }
 0x14d   : > { %1210 = vst.msk [vmem:[#allocation2 + $0x18] sm:$0xf] %vm1206_vm3, %v1180_v21 }
 0x14e   : > { %v1178_v54 = vpop.permute.xlu0 %1177 }
 0x14f   : > { %1209 = vst.msk [vmem:[#allocation2 + $0x10] sm:$0xf] %vm1206_vm3, %v1178_v54 }
 0x150   : > { %v1943_v5 = vpop.permute.xlu1 %1942 }
 0x151   : > { %1966 = vst.msk [vmem:[#allocation2 + $0x4c] sm:$0xf] %vm922_vm15, %v1943_v5 }
 0x152   : > { %v1941_v50 = vpop.permute.xlu0 %1940 }
 0x153   : > { %1965 = vst.msk [vmem:[#allocation2 + $0x44] sm:$0xf] %vm922_vm15, %v1941_v50 }
 0x154   : > { %v2207_v26 = vpop.permute.xlu1 %2206 }
 0x155   : > { %2236 = vst.msk [vmem:[#allocation2 + $0x1c] sm:$0xf] %vm1206_vm3, %v2207_v26 }
 0x156   : > { %v2205_v46 = vpop.permute.xlu0 %2204 }
 0x157   : > { %2235 = vst.msk [vmem:[#allocation2 + $0x14] sm:$0xf] %vm1206_vm3, %v2205_v46 }
 0x158   : > { %v1086_v8 = vpop.permute.xlu1 %1085 }
 0x159   : > { %1110 = vst.msk [vmem:[#allocation2 + $0x48] sm:$0xf] %vm1100_vm0, %v1086_v8  ;;  %v4353_v8 = vld [vmem:[%s4399_s2] ss:$0 sm:$0xff] }
 0x15a   : > { %v1084_v20 = vpop.permute.xlu0 %1083 }
 0x15b   : > { %1109 = vst.msk [vmem:[#allocation2 + $0x40] sm:$0xf] %vm1100_vm0, %v1084_v20 }
 0x15c   : > { %v2117_v53 = vpop.permute.xlu1 %2116  ;;  %v2247_v31 = vld [vmem:[#allocation2 + $0x18] sm:$0xff] }
 0x15d   : > { %2140 = vst.msk [vmem:[#allocation2 + $0x4c] sm:$0xf] %vm1100_vm0, %v2117_v53 }
 0x15e   : > { %v2115_v56 = vpop.permute.xlu0 %2114  ;;  %v2246_v25 = vld [vmem:[#allocation2 + $0x10] sm:$0xff] }
 0x15f   : > { %v2824_v37 = vld [vmem:[#allocation2 + $0x14] ss:$8 sps:$4 sm:$0xff]   ;;  %2139 = vst.msk [vmem:[#allocation2 + $0x44] sm:$0xf] %vm1100_vm0, %v2115_v56  ;;  %v2667_v52 = vcombine.low %v2246_v25, %v2247_v31 }
 0x160   : > { %2487 = vmatprep.mubr.bf16.mxu0 %v2824_v37  ;;  %v335_v27 = vpop.permute.xlu1 %334 }
 0x161   : > { %363 = vst.msk [vmem:[#allocation2 + $0x28] sm:$0xf] %vm357_vm8, %v335_v27  ;;  %2488 = vmatmul.mubr.bf16.gmra.mrb[4].mxu0 %v2667_v52 }
 0x162   : > { %v333_v55 = vpop.permute.xlu0 %332 }
 0x163   : > { %362 = vst.msk [vmem:[#allocation2 + $0x20] sm:$0xf] %vm357_vm8, %v333_v55 }
 0x164   : > { %v1192_v36 = vpop.permute.xlu1 %1191 }
 0x165   : > { %1216 = vst.msk [vmem:[#allocation2 + $0x48] sm:$0xf] %vm1206_vm3, %v1192_v36 }
 0x166   : > { %v1190_v38 = vpop.permute.xlu0 %1189 }
 0x167   : > { %1215 = vst.msk [vmem:[#allocation2 + $0x40] sm:$0xf] %vm1206_vm3, %v1190_v38 }
 0x168   : > { %v1427_v22 = vpop.permute.xlu1 %1426 }
 0x169   : > { %1454 = vst.msk [vmem:[#allocation2 + $0x2c] sm:$0xf] %vm357_vm8, %v1427_v22 }
 0x16a   : > { %v1425_v10 = vpop.permute.xlu0 %1424 }
 0x16b   : > { %1453 = vst.msk [vmem:[#allocation2 + $0x24] sm:$0xf] %vm357_vm8, %v1425_v10 }
 0x16c   : > { %v2219_v1 = vpop.permute.xlu1 %2218 }
 0x16d   : > { %2242 = vst.msk [vmem:[#allocation2 + $0x4c] sm:$0xf] %vm1206_vm3, %v2219_v1 }
 0x16e   : > { %v2217_v17 = vpop.permute.xlu0 %2216 }
 0x16f   : > { %2241 = vst.msk [vmem:[#allocation2 + $0x44] sm:$0xf] %vm1206_vm3, %v2217_v17 }
 0x170   : > { %v441_v49 = vpop.permute.xlu1 %440 }
 0x171   : > { %469 = vst.msk [vmem:[#allocation2 + $0x28] sm:$0xf] %vm463_vm10, %v441_v49 }
 0x172   : > { %v439_v62 = vpop.permute.xlu0 %438 }
 0x173   : > { %468 = vst.msk [vmem:[#allocation2 + $0x20] sm:$0xf] %vm463_vm10, %v439_v62 }
 0x174   : > { %v1493_v58 = vpop.permute.xlu1 %1492  ;;  %v2253_v24 = vld [vmem:[#allocation2 + $0x48] sm:$0xff] }
 0x175   : > { %1520 = vst.msk [vmem:[#allocation2 + $0x2c] sm:$0xf] %vm463_vm10, %v1493_v58 }
 0x176   : > { %v1491_v48 = vpop.permute.xlu0 %1490  ;;  %v2252_v45 = vld [vmem:[#allocation2 + $0x40] sm:$0xff] }
 0x177   : > { %v2826_v14 = vld [vmem:[#allocation2 + $0x44] ss:$8 sps:$4 sm:$0xff]   ;;  %1519 = vst.msk [vmem:[#allocation2 + $0x24] sm:$0xf] %vm463_vm10, %v1491_v48  ;;  %v2673_v23 = vcombine.low %v2252_v45, %v2253_v24 }
 0x178   : > { %2511 = vmatprep.mubr.bf16.mxu1 %v2826_v14  ;;  %v617_v33 = vpop.permute.xlu1 %616 }
 0x179   : > { %646 = vst.msk [vmem:[#allocation2 + $0x20] sm:$0xf] %vm641_vm12, %v617_v33  ;;  %2512 = vmatmul.mubr.bf16.gmra.mrb[4].mxu1 %v2673_v23 }
 0x17a   : > { %v345_v18 = vpop.permute.xlu0 %344 }
 0x17b   : > { %368 = vst.msk [vmem:[#allocation2 + $0x50] sm:$0xf] %vm357_vm8, %v345_v18 }
 0x17c   : > { %v1437_v2 = vpop.permute.xlu1 %1436 }
 0x17d   : > { %1459 = vst.msk [vmem:[#allocation2 + $0x54] sm:$0xf] %vm357_vm8, %v1437_v2 }
 0x17e   : > { %v619_v11 = vpop.permute.xlu0 %618 }
 0x17f   : > { %647 = vst.msk [vmem:[#allocation2 + $0x28] sm:$0xf] %vm641_vm12, %v619_v11 }
 0x180   : > { %v1663_v34 = vpop.permute.xlu1 %1662 }
 0x181   : > { %1690 = vst.msk [vmem:[#allocation2 + $0x2c] sm:$0xf] %vm641_vm12, %v1663_v34 }
 0x182   : > { %v1661_v59 = vpop.permute.xlu0 %1660 }
 0x183   : > { %1689 = vst.msk [vmem:[#allocation2 + $0x24] sm:$0xf] %vm641_vm12, %v1661_v59 }
 0x184   : > { %v792_v4 = vpop.permute.xlu1 %791 }
 0x185   : > { %821 = vst.msk [vmem:[#allocation2 + $0x20] sm:$0xf] %vm816_vm13, %v792_v4 }
 0x186   : > { %v451_v32 = vpop.permute.xlu0 %450 }
 0x187   : > { %474 = vst.msk [vmem:[#allocation2 + $0x50] sm:$0xf] %vm463_vm10, %v451_v32 }
 0x188   : > { %v1503_v7 = vpop.permute.xlu1 %1502 }
 0x189   : > { %1525 = vst.msk [vmem:[#allocation2 + $0x54] sm:$0xf] %vm463_vm10, %v1503_v7 }
 0x18a   : > { %v794_v9 = vpop.permute.xlu0 %793 }
 0x18b   : > { %822 = vst.msk [vmem:[#allocation2 + $0x28] sm:$0xf] %vm816_vm13, %v794_v9 }
 0x18c   : > { %v1833_v43 = vpop.permute.xlu1 %1832 }
 0x18d   : > { %1860 = vst.msk [vmem:[#allocation2 + $0x2c] sm:$0xf] %vm816_vm13, %v1833_v43 }
 0x18e   : > { %v1831_v3 = vpop.permute.xlu0 %1830 }
 0x18f   : > { %1859 = vst.msk [vmem:[#allocation2 + $0x24] sm:$0xf] %vm816_vm13, %v1831_v3 }
 0x190   : > { %v898_v19 = vpop.permute.xlu1 %897 }
 0x191   : > { %927 = vst.msk [vmem:[#allocation2 + $0x20] sm:$0xf] %vm922_vm15, %v898_v19 }
 0x192   : > { %v629_v35 = vpop.permute.xlu0 %628 }
 0x193   : > { %652 = vst.msk [vmem:[#allocation2 + $0x50] sm:$0xf] %vm641_vm12, %v629_v35 }
 0x194   : > { %v1673_v29 = vpop.permute.xlu1 %1672 }
 0x195   : > { %1695 = vst.msk [vmem:[#allocation2 + $0x54] sm:$0xf] %vm641_vm12, %v1673_v29 }
 0x196   : > { %v900_v15 = vpop.permute.xlu0 %899 }
 0x197   : > { %928 = vst.msk [vmem:[#allocation2 + $0x28] sm:$0xf] %vm922_vm15, %v900_v15 }
 0x198   : > { %v1935_v16 = vpop.permute.xlu1 %1934 }
 0x199   : > { %1962 = vst.msk [vmem:[#allocation2 + $0x2c] sm:$0xf] %vm922_vm15, %v1935_v16 }
 0x19a   : > { %v1933_v60 = vpop.permute.xlu0 %1932 }
 0x19b   : > { %1961 = vst.msk [vmem:[#allocation2 + $0x24] sm:$0xf] %vm922_vm15, %v1933_v60 }
 0x19c   : > { %v1076_v28 = vpop.permute.xlu1 %1075 }
 0x19d   : > { %1105 = vst.msk [vmem:[#allocation2 + $0x20] sm:$0xf] %vm1100_vm0, %v1076_v28 }
 0x19e   : > { %v804_v13 = vpop.permute.xlu0 %803 }
 0x19f   : > { %827 = vst.msk [vmem:[#allocation2 + $0x50] sm:$0xf] %vm816_vm13, %v804_v13 }
 0x1a0   : > { %v1843_v61 = vpop.permute.xlu1 %1842 }
 0x1a1   : > { %1865 = vst.msk [vmem:[#allocation2 + $0x54] sm:$0xf] %vm816_vm13, %v1843_v61 }
 0x1a2   : > { %v1078_v47 = vpop.permute.xlu0 %1077 }
 0x1a3   : > { %1106 = vst.msk [vmem:[#allocation2 + $0x28] sm:$0xf] %vm1100_vm0, %v1078_v47 }
 0x1a4   : > { %v2109_v12 = vpop.permute.xlu1 %2108 }
 0x1a5   : > { %2136 = vst.msk [vmem:[#allocation2 + $0x2c] sm:$0xf] %vm1100_vm0, %v2109_v12 }
 0x1a6   : > { %v2107_v42 = vpop.permute.xlu0 %2106 }
 0x1a7   : > { %2135 = vst.msk [vmem:[#allocation2 + $0x24] sm:$0xf] %vm1100_vm0, %v2107_v42 }
 0x1a8   : > { %v1182_v57 = vpop.permute.xlu1 %1181 }
 0x1a9   : > { %1211 = vst.msk [vmem:[#allocation2 + $0x20] sm:$0xf] %vm1206_vm3, %v1182_v57 }
 0x1aa   : > { %v910_v44 = vpop.permute.xlu0 %909 }
 0x1ab   : > { %933 = vst.msk [vmem:[#allocation2 + $0x50] sm:$0xf] %vm922_vm15, %v910_v44 }
 0x1ac   : > { %v1945_v41 = vpop.permute.xlu1 %1944 }
 0x1ad   : > { %1967 = vst.msk [vmem:[#allocation2 + $0x54] sm:$0xf] %vm922_vm15, %v1945_v41 }
 0x1ae   : > { %v1184_v40 = vpop.permute.xlu0 %1183 }
 0x1af   : > { %1212 = vst.msk [vmem:[#allocation2 + $0x28] sm:$0xf] %vm1206_vm3, %v1184_v40 }
 0x1b0   : > { %v2211_v30 = vpop.permute.xlu1 %2210 }
 0x1b1   : > { %2238 = vst.msk [vmem:[#allocation2 + $0x2c] sm:$0xf] %vm1206_vm3, %v2211_v30 }
 0x1b2   : > { %v2209_v51 = vpop.permute.xlu0 %2208 }
 0x1b3   : > { %2237 = vst.msk [vmem:[#allocation2 + $0x24] sm:$0xf] %vm1206_vm3, %v2209_v51 }
 0x1b4   : > { %v2119_v39 = vpop.permute.xlu1 %2118 }
 0x1b5   : > { %2141 = vst.msk [vmem:[#allocation2 + $0x54] sm:$0xf] %vm1100_vm0, %v2119_v39 }
 0x1b6   : > { %v1088_v63 = vpop.permute.xlu0 %1087  ;;  %v2830_v54 = vld [vmem:[#allocation2 + $0x20] ss:$8 sps:$4 sm:$0xff]  }
 0x1b7   : > { %1111 = vst.msk [vmem:[#allocation2 + $0x50] sm:$0xf] %vm1100_vm0, %v1088_v63 }
 0x1b8   : > { %v2221_v6 = vpop.permute.xlu1 %2220 }
 0x1b9   : > { %2243 = vst.msk [vmem:[#allocation2 + $0x54] sm:$0xf] %vm1206_vm3, %v2221_v6 }
 0x1ba   : > { %v1194_v0 = vpop.permute.xlu0 %1193  ;;  %v2828_v21 = vld [vmem:[#allocation2 + $0x24] ss:$8 sps:$4 sm:$0xff]  }
 0x1bb   : > { %1217 = vst.msk [vmem:[#allocation2 + $0x50] sm:$0xf] %vm1206_vm3, %v1194_v0  ;;  %2495 = vmatprep.mubr.bf16.mxu0 %v2828_v21 }
 0x1bc   : > { %2496 = vmatmul.mubr.bf16.gmra.mrb[8].mxu0 %v2830_v54 }
 0x1c2   : > { %v2254_v5 = vld [vmem:[#allocation2 + $0x50] sm:$0xff] }
 0x1c3   : > { %v2676_v50 = vcombine.high %v2254_v5, %v2254_v5  ;;  %v2675_v26 = vcombine.low %v2254_v5, %v2254_v5  ;;  %v2733_v46 = vpop.f32.mrb[0].mxu0 }
 0x1c4   : > { %v2734_v20 = vpop.f32.mrb[1].mxu0 }
 0x1c5   : > { %2519 = vmatprep.mubr.bf16.mxu1 %v2676_v50  ;;  %v2735_v53 = vadd.f32 %v2734_v20, %v2733_v46  ;;  %v2736_v31 = vpop.f32.mrb[2].mxu0 }
 0x1c6   : > { %2520 = vmatmul.mubr.bf16.gmra.mrb[8].mxu1 %v2675_v26  ;;  %v2737_v56 = vpop.f32.mrb[3].mxu0 }
 0x1c7   : > { %v2482_v25 = vadd.f32 %v2735_v53, %v4353_v8  ;;  %v2738_v37 = vadd.f32 %v2737_v56, %v2736_v31 }
 0x1c9   : > { %v2527_v52 = vmax.f32 %v2482_v25, 0.0  ;;  %v2485_v27 = vadd.f32 %v2738_v37, %v4353_v8 }
 0x1cb   : > { %v2706_v55 = vpack.c.bf16 %v2527_v52, %v2527_v52  ;;  %v2528_v36 = vmax.f32 %v2485_v27, 0.0 }
 0x1cd   : > { %2584 = vst.msk [vmem:[%s4361_s22] sm:$0xf] %vm2583_vm6, %v2706_v55  ;;  %v2707_v38 = vpack.c.bf16 %v2528_v36, %v2528_v36 }
 0x1cf   : > { %2585 = vst.msk [vmem:[%s4361_s22 + $0x4] sm:$0xf] %vm2583_vm6, %v2707_v38 }
 0x1db   : > { %v2751_v22 = vpop.f32.mrb[0].mxu1 }
 0x1dc   : > { %v2752_v10 = vpop.f32.mrb[1].mxu1 }
 0x1dd   : > { %v2753_v1 = vadd.f32 %v2752_v10, %v2751_v22  ;;  %v2754_v17 = vpop.f32.mrb[2].mxu1 }
 0x1de   : > { %v2755_v49 = vpop.f32.mrb[3].mxu1 }
 0x1df   : > { %v2506_v62 = vadd.f32 %v2753_v1, %v4353_v8  ;;  %v2756_v58 = vadd.f32 %v2755_v49, %v2754_v17 }
 0x1e1   : > { %v2533_v24 = vmax.f32 %v2506_v62, 0.0  ;;  %v2509_v48 = vadd.f32 %v2756_v58, %v4353_v8 }
 0x1e3   : > { %v2712_v45 = vpack.c.bf16 %v2533_v24, %v2533_v24  ;;  %v2534_v14 = vmax.f32 %v2509_v48, 0.0 }
 0x1e5   : > { %2590 = vst.msk [vmem:[%s4361_s22 + $0x18] sm:$0xf] %vm2583_vm6, %v2712_v45  ;;  %v2713_v23 = vpack.c.bf16 %v2534_v14, %v2534_v14 }
 0x1e7   : > { %2591 = vst.msk [vmem:[%s4361_s22 + $0x1c] sm:$0xf] %vm2583_vm6, %v2713_v23 }
 0x234   : > { %v2739_v33 = vpop.f32.mrb[4].mxu0 }
 0x235   : > { %v2740_v18 = vpop.f32.mrb[5].mxu0 }
 0x236   : > { %v2741_v2 = vadd.f32 %v2740_v18, %v2739_v33  ;;  %v2742_v11 = vpop.f32.mrb[6].mxu0 }
 0x237   : > { %v2743_v34 = vpop.f32.mrb[7].mxu0 }
 0x238   : > { %v2490_v59 = vadd.f32 %v2741_v2, %v4353_v8  ;;  %v2744_v4 = vadd.f32 %v2743_v34, %v2742_v11 }
 0x23a   : > { %v2529_v32 = vmax.f32 %v2490_v59, 0.0  ;;  %v2493_v7 = vadd.f32 %v2744_v4, %v4353_v8 }
 0x23c   : > { %v2708_v9 = vpack.c.bf16 %v2529_v32, %v2529_v32  ;;  %v2530_v43 = vmax.f32 %v2493_v7, 0.0 }
 0x23e   : > { %2586 = vst.msk [vmem:[%s4361_s22 + $0x8] sm:$0xf] %vm2583_vm6, %v2708_v9  ;;  %v2709_v3 = vpack.c.bf16 %v2530_v43, %v2530_v43 }
 0x240   : > { %2587 = vst.msk [vmem:[%s4361_s22 + $0xc] sm:$0xf] %vm2583_vm6, %v2709_v3 }
 0x24c   : > { %v2757_v19 = vpop.f32.mrb[4].mxu1 }
 0x24d   : > { %v2758_v35 = vpop.f32.mrb[5].mxu1 }
 0x24e   : > { %v2759_v29 = vadd.f32 %v2758_v35, %v2757_v19  ;;  %v2760_v15 = vpop.f32.mrb[6].mxu1 }
 0x24f   : > { %v2761_v16 = vpop.f32.mrb[7].mxu1 }
 0x250   : > { %v2514_v60 = vadd.f32 %v2759_v29, %v4353_v8  ;;  %v2762_v28 = vadd.f32 %v2761_v16, %v2760_v15 }
 0x252   : > { %v2535_v13 = vmax.f32 %v2514_v60, 0.0  ;;  %v2517_v61 = vadd.f32 %v2762_v28, %v4353_v8 }
 0x254   : > { %v2714_v47 = vpack.c.bf16 %v2535_v13, %v2535_v13  ;;  %v2536_v12 = vmax.f32 %v2517_v61, 0.0 }
 0x256   : > { %2592 = vst.msk [vmem:[%s4361_s22 + $0x20] sm:$0xf] %vm2583_vm6, %v2714_v47  ;;  %v2715_v42 = vpack.c.bf16 %v2536_v12, %v2536_v12 }
 0x258   : > { %2593 = vst.msk [vmem:[%s4361_s22 + $0x24] sm:$0xf] %vm2583_vm6, %v2715_v42 }
 0x28f   : > { %v2745_v57 = vpop.f32.mrb[8].mxu0 }
 0x290   : > { %v2746_v44 = vpop.f32.mrb[9].mxu0 }
 0x291   : > { %v2747_v41 = vadd.f32 %v2746_v44, %v2745_v57  ;;  %v2748_v40 = vpop.f32.mrb[10].mxu0 }
 0x292   : > { %v2749_v30 = vpop.f32.mrb[11].mxu0 }
 0x293   : > { %v2498_v51 = vadd.f32 %v2747_v41, %v4353_v8  ;;  %v2750_v39 = vadd.f32 %v2749_v30, %v2748_v40 }
 0x295   : > { %v2531_v63 = vmax.f32 %v2498_v51, 0.0  ;;  %v2501_v6 = vadd.f32 %v2750_v39, %v4353_v8 }
 0x297   : > { %v2710_v0 = vpack.c.bf16 %v2531_v63, %v2531_v63  ;;  %v2532_v21 = vmax.f32 %v2501_v6, 0.0 }
 0x299   : > { %v2763_v54 = vpop.f32.mrb[8].mxu1  ;;  %2588 = vst.msk [vmem:[%s4361_s22 + $0x10] sm:$0xf] %vm2583_vm6, %v2710_v0  ;;  %v2711_v5 = vpack.c.bf16 %v2532_v21, %v2532_v21 }
 0x29a   : > { %v2764_v50 = vpop.f32.mrb[9].mxu1 }
 0x29b   : > { %v2765_v26 = vadd.f32 %v2764_v50, %v2763_v54  ;;  %v2766_v46 = vpop.f32.mrb[10].mxu1  ;;  %2589 = vst.msk [vmem:[%s4361_s22 + $0x14] sm:$0xf] %vm2583_vm6, %v2711_v5 }
 0x29c   : > { %v2767_v20 = vpop.f32.mrb[11].mxu1 }
 0x29d   : > { %v2522_v53 = vadd.f32 %v2765_v26, %v4353_v8 }
 0x29f   : > { %v2537_v31 = vmax.f32 %v2522_v53, 0.0 }
 0x2a1   : > { %v2716_v56 = vpack.c.bf16 %v2537_v31, %v2537_v31 }
 0x2a3   : > { %2594 = vst.msk [vmem:[%s4361_s22 + $0x28] sm:$0xf] %vm2583_vm6, %v2716_v56 }
 0x2a4 PF: > { %s13_s12 = sadd.s32 1, %s2844_s12  }
 0x2a5   : > { %p10_p4 = scmp.ge.s32.totalorder %s13_s12, 4  }
 0x2a7   :  { %12 = sbr.rel (!%p10_p4) target bundleno = 1 (0x1), region = 62 }

// kernel: _lambda_.9
= control target key start
LH: loop header
LB: loop body
LE: loop exit
PB: predicated region body
PF: predicated region fallthrough
CT: control target
= control target key end

     0   :  { %s1265_s12 = smov 0   ;;  %s1551_s0 = inlined_call_operand.vmem [shape: bf16[2,42,64], index: 0, kind: input, shape index: {}]   ;;  %s1552_s1 = inlined_call_operand.vmem [shape: bf16[576,64], index: 1, kind: input, shape index: {}]   ;;  %s1553_s2 = inlined_call_operand.vmem [shape: f32[1,64], index: 2, kind: input, shape index: {}]   ;;  %s1554_s3 = inlined_call_operand.vmem [shape: bf16[2,24,64], index: 3, kind: output, shape index: {}]  }
   0x1 LB: > { %s1034_s13 = sadd.s32 4294967295, %s1242_s12   ;;  %p1038_p0 = scmp.ge.s32.totalorder %s1242_s12, 1  ;;  %s1242_s12 = sphi %s1265_s12, %s13_s12  }
   0x2   : > { %p137_p1 = scmp.lt.s32.totalorder %s1242_s12, 3 }
   0x4   : > { %p138_p2 = pnand %p1038_p0, %p137_p1 }
   0x5   : > { %p161_p3 = scmp.lt.s32.totalorder (!%p138_p2), %s1034_s13, 1  ;;  %vm268_vm0 = vcmask (!%p138_p2), 1040384   ;;  %vm269_vm1 = vcmask (!%p138_p2), 1044484   ;;  %v1188_v0 = vld [vmem:[%s1552_s1 + $0x40] sm:$0xff] (!%p138_p2)   ;;  %v1190_v3 = vld [vmem:[%s1552_s1 + $0x48] sm:$0xff] (!%p138_p2)   ;;  %vm175_vm3 = vcmask (!%p138_p2), 519168  }
   0x6   : > { %141 = sbr.rel (%p138_p2) target bundleno = 400 (0x190), region = 32  ;;  %1103 = vmatprep.subr.bf16.mxu0 (!%p138_p2), %v1188_v0  ;;  %v1189_v1 = vld [vmem:[%s1552_s1] sm:$0xff] (!%p138_p2)   ;;  %vm1281_vm2 = vmor (!%p138_p2), %vm268_vm0, %vm269_vm1  ;;  %vm183_vm4 = vsmask.f32 (!%p138_p2), 3328  ;;  %vm184_vm5 = vsmask.f32 (!%p138_p2), 7440 }
   0x7   : > { %1104 = vmatpush3.bf16.msra.mxu0 (!%p138_p2), %v1189_v1  ;;  %v1191_v4 = vld [vmem:[%s1552_s1 + $0x8] sm:$0xff] (!%p138_p2)   ;;  %s1244_s26 = smov (!%p138_p2), 64   ;;  %vm386_vm6 = vsmask.f32 (!%p138_p2), 1280  ;;  %vm387_vm7 = vsmask.f32 (!%p138_p2), 5392  ;;  %vm1343_vm8 = vmor (!%p138_p2), %vm183_vm4, %vm184_vm5 }
   0x8   : > { %1105 = vmatprep.subr.bf16.mxu0 (!%p138_p2), %v1190_v3  ;;  %v1192_v26 = vld [vmem:[%s1552_s1 + $0xc0] sm:$0xff] (!%p138_p2)   ;;  %v1194_v43 = vld [vmem:[%s1552_s1 + $0x50] sm:$0xff] (!%p138_p2)   ;;  %v1196_v1 = vld [vmem:[%s1552_s1 + $0xc8] sm:$0xff] (!%p138_p2)   ;;  %vm241_vm9 = vcmask (!%p138_p2), 1042432   ;;  %vm242_vm10 = vcmask (!%p138_p2), 1046532   ;;  %vm363_vm0 = vcmask (!%p138_p2), 1041408  }
   0x9   : > { %v1193_v31 = vld [vmem:[%s1552_s1 + $0x80] sm:$0xff] (!%p138_p2)   ;;  %1131 = vmatprep.subr.bf16.mxu1 (!%p138_p2), %v1192_v26  ;;  %v1195_v53 = vld [vmem:[%s1552_s1 + $0x10] sm:$0xff] (!%p138_p2)   ;;  %vm1357_vm11 = vmor (!%p138_p2), %vm386_vm6, %vm387_vm7  ;;  %vm297_vm12 = vsmask.f32 (!%p138_p2), 256  ;;  %vm298_vm13 = vsmask.f32 (!%p138_p2), 4368 }
   0xa   : > { %1132 = vmatpush3.bf16.msra.mxu1 (!%p138_p2), %v1193_v31  ;;  %vm1380_vm14 = vmor (!%p138_p2), %vm297_vm12, %vm298_vm13  ;;  %vm364_vm1 = vcmask (!%p138_p2), 1045508   ;;  %vm229_vm4 = vcmask (!%p138_p2), 1043968   ;;  %vm809_vm5 = vcmask (!%p138_p2), 523264  }
   0xb   : > { %1106 = vmatpush3.bf16.msra.mxu0 (!%p138_p2), %v1191_v4  ;;  %1133 = vmatprep.subr.bf16.mxu1 (!%p138_p2), %v1196_v1  ;;  %vm1392_vm15 = vmor (!%p138_p2), %vm241_vm9, %vm242_vm10 }
   0xc   : > { %1107 = vmatprep.subr.bf16.mxu0 (!%p138_p2), %v1194_v43 }
   0xd   : > { %s1568_s13 = smov (!%p161_p3, %s1034_s13), 1 }
   0xe   : > { %s1177_s18 = smul.u32 24, %s1568_s13 }
   0xf   : > { %1108 = vmatpush3.bf16.msra.mxu0 %v1195_v53  ;;  %s1178_s19 = smul.u32 12, %s1568_s13 }
  0x10   : > { %s1292_s23 = scalar_lea.vmem %s1551_s0, %s1177_s18 }
  0x11   : > { %v338_v5 = vld [vmem:[%s1292_s23 + $0x8] sm:$0xf]  ;;  %v260_v6 = vld [vmem:[%s1292_s23] sm:$0x8]  ;;  %v261_v7 = vld [vmem:[%s1292_s23 + $0x4] sm:$0xf]  ;;  %s170_s22 = scalar_lea.vmem %s1554_s3, %s1178_s19 }
  0x12   : > { %345 = vrot.lane.b32.xlu1 %v338_v5, %s1244_s26  ;;  %v1042_v8 = vrot.slane %v260_v6, 11  ;;  %v273_v9 = vrot.slane %v261_v7, 7  ;;  %v439_v10 = vld [vmem:[%s1292_s23 + $0x4] sm:$0x8]  ;;  %v440_v11 = vld [vmem:[%s1292_s23 + $0x8] sm:$0xf] }
  0x13   : > { %v441_v12 = vld [vmem:[%s1292_s23 + $0xc] sm:$0xf]  ;;  %v442_v13 = vld [vmem:[%s1292_s23 + $0x10] sm:$0x7]  ;;  %v1045_v14 = vrot.slane %v439_v10, 11  ;;  %v449_v15 = vrot.slane %v440_v11, 7 }
  0x14   : > { %v274_v16 = vsel %vm1281_vm2, %v1042_v8, %v273_v9  ;;  %v452_v17 = vrot.slane %v441_v12, 7  ;;  %v455_v18 = vrot.slane %v442_v13, 7  ;;  %v337_v19 = vld [vmem:[%s1292_s23 + $0x4] sm:$0xf]  ;;  %v262_v20 = vld [vmem:[%s1292_s23 + $0x8] sm:$0xf] }
  0x15   : > { %v450_v21 = vsel %vm1281_vm2, %v1045_v14, %v449_v15  ;;  %v451_v22 = vrot.slane %v449_v15, 4  ;;  %343 = vrot.lane.b32.xlu0 %v337_v19, %s1244_s26  ;;  %v275_v23 = vrot.slane %v273_v9, 4  ;;  %v276_v24 = vrot.slane %v262_v20, 7  ;;  %v179_v25 = vld [vmem:[%s1292_s23] sm:$0xf]  ;;  %v1197_v13 = vld [vmem:[%s1552_s1 + $0x88] sm:$0xff]  }
  0x16   : > { %v454_v27 = vrot.slane %v452_v17, 4  ;;  %460 = vst.msk [vmem:[#allocation2 + $0x10] sm:$0xf] %vm175_vm3, %v450_v21  ;;  %281 = vrot.lane.b32.xlu1 %v274_v16, %s1244_s26  ;;  %v180_v28 = vld [vmem:[%s1292_s23 + $0x4] sm:$0xf]  ;;  %v187_v29 = vshrl.u32 %v179_v25, 16  ;;  %1134 = vmatpush3.bf16.msra.mxu1 %v1197_v13 }
  0x17   : > { %v190_v30 = vshll.u32 %v179_v25, 16  ;;  %v453_v32 = vsel %vm1281_vm2, %v451_v22, %v452_v17  ;;  %v277_v33 = vsel %vm1281_vm2, %v275_v23, %v276_v24  ;;  %v196_v34 = vshll.u32 %v180_v28, 16  ;;  %v383_v36 = vld [vmem:[%s1292_s23 + $0x8] sm:$0xf]  ;;  %v384_v37 = vld [vmem:[%s1292_s23 + $0xc] sm:$0xf] }
  0x18   : > { %v200_v35 = vshrl.u32 %v180_v28, 16  ;;  %v456_v38 = vsel %vm1281_vm2, %v454_v27, %v455_v18  ;;  %461 = vst.msk [vmem:[#allocation2 + $0x24] sm:$0xf] %vm175_vm3, %v453_v32  ;;  %v189_v39 = vrot.slane %v187_v29, 4  ;;  %v399_v41 = vshrl.u32 %v383_v36, 16  ;;  %v1198_v28 = vld [vmem:[%s1552_s1 + $0x58] sm:$0xff]  }
  0x19   : > { %v192_v40 = vrot.slane %v190_v30, 5  ;;  %v181_v42 = vld [vmem:[%s1292_s23 + $0x8] sm:$0xf]  ;;  %462 = vst.msk [vmem:[#allocation2 + $0x38] sm:$0xf] %vm175_vm3, %v456_v38  ;;  %v198_v44 = vrot.slane %v196_v34, 5  ;;  %1109 = vmatprep.subr.bf16.mxu0 %v1198_v28 }
  0x1a   : > { %v402_v45 = vshll.u32 %v383_v36, 16  ;;  %v409_v46 = vshrl.u32 %v384_v37, 16  ;;  %v412_v47 = vshll.u32 %v384_v37, 16  ;;  %v382_v48 = vld [vmem:[%s1292_s23 + $0x4] sm:$0xc]  ;;  %283 = vrot.lane.b32.xlu1 %v277_v33, %s1244_s26  ;;  %v401_v50 = vrot.slane %v399_v41, 6 }
  0x1b   : > { %v193_v49 = vor.u32 %v192_v40, %v189_v39  ;;  %v202_v51 = vrot.slane %v200_v35, 4  ;;  %v206_v52 = vshll.u32 %v181_v42, 16  ;;  %v210_v58 = vshrl.u32 %v181_v42, 16  ;;  %v263_v59 = vld [vmem:[%s1292_s23 + $0xc] sm:$0x7]  ;;  %v1215_v28 = vld [vmem:[%s1552_s1 + $0x38] sm:$0xff]  }
  0x1c   : > { %v404_v55 = vrot.slane %v402_v45, 7  ;;  %v411_v56 = vrot.slane %v409_v46, 6  ;;  %v414_v57 = vrot.slane %v412_v47, 7  ;;  %v390_v63 = vshrl.u32 %v382_v48, 16  ;;  %v182_v0 = vld [vmem:[%s1292_s23 + $0xc] sm:$0x1] }
  0x1d   : > { %v194_v60 = vrot.slane %v193_v49, 4  ;;  %v203_v61 = vor.u32 %v202_v51, %v198_v44  ;;  %v208_v62 = vrot.slane %v206_v52, 5  ;;  %v393_v5 = vshll.u32 %v382_v48, 16  ;;  %v385_v7 = vld [vmem:[%s1292_s23 + $0x10] sm:$0x7] }
  0x1e   : > { %v405_v3 = vor.u32 %v404_v55, %v401_v50  ;;  %v415_v4 = vor.u32 %v414_v57, %v411_v56  ;;  %v278_v6 = vrot.slane %v276_v24, 4  ;;  %v392_v11 = vrot.slane %v390_v63, 6  ;;  %v294_v22 = vld [vmem:[%s1292_s23 + $0x4] sm:$0xf]  ;;  %v295_v27 = vld [vmem:[%s1292_s23 + $0x8] sm:$0xf] }
  0x1f   : > { %v199_v8 = vsel %vm1343_vm8, %v194_v60, %v198_v44  ;;  %v204_v10 = vrot.slane %v203_v61, 4  ;;  %v279_v12 = vrot.slane %v263_v59, 7  ;;  %v395_v15 = vrot.slane %v393_v5, 7  ;;  %v233_v41 = vld [vmem:[%s1292_s23] sm:$0xe]  ;;  %v1199_v50 = vld [vmem:[%s1552_s1 + $0x18] sm:$0xff]  }
  0x20   : > { %220 = vrot.lane.b32.xlu0 %v199_v8, %s1244_s26  ;;  %v407_v14 = vrot.slane %v405_v3, 4  ;;  %v212_v16 = vrot.slane %v210_v58, 4  ;;  %v216_v17 = vshll.u32 %v182_v0, 16  ;;  %v417_v20 = vrot.slane %v415_v4, 4  ;;  %v234_v45 = vld [vmem:[%s1292_s23 + $0x4] sm:$0xf]  ;;  %1110 = vmatpush3.bf16.msra.mxu0 %v1199_v50 }
  0x21   : > { %v209_v18 = vsel %vm1343_vm8, %v204_v10, %v208_v62  ;;  %v280_v19 = vsel %vm1281_vm2, %v278_v6, %v279_v12  ;;  %v419_v21 = vshrl.u32 %v385_v7, 16  ;;  %v396_v24 = vor.u32 %v395_v15, %v392_v11  ;;  %v1200_v52 = vld [vmem:[%s1552_s1 + $0xd0] sm:$0xff]   ;;  %v293_v53 = vld [vmem:[%s1292_s23] sm:$0x8]  ;;  %v339_v54 = vld [vmem:[%s1292_s23 + $0xc] sm:$0xf] }
  0x22   : > { %v416_v23 = vsel %vm1357_vm11, %v407_v14, %v415_v4  ;;  %v213_v25 = vor.u32 %v212_v16, %v208_v62  ;;  %v218_v26 = vrot.slane %v216_v17, 5  ;;  %v422_v2 = vshll.u32 %v385_v7, 16  ;;  %v1201_v58 = vld [vmem:[%s1552_s1 + $0x90] sm:$0xff]   ;;  %1135 = vmatprep.subr.bf16.mxu1 %v1200_v52  ;;  %v1202_v60 = vld [vmem:[%s1552_s1 + $0x60] sm:$0xff]   ;;  %v235_v63 = vld [vmem:[%s1292_s23 + $0x8] sm:$0xf] }
  0x23   : > { %429 = vrot.lane.b32.xlu1 %v416_v23, %s1244_s26  ;;  %v421_v29 = vrot.slane %v419_v21, 6  ;;  %v397_v30 = vrot.slane %v396_v24, 4  ;;  %v306_v32 = vshrl.u32 %v294_v22, 16  ;;  %v315_v33 = vshrl.u32 %v295_v27, 16  ;;  %1136 = vmatpush3.bf16.msra.mxu1 %v1201_v58  ;;  %v1203_v0 = vld [vmem:[%s1552_s1 + $0x20] sm:$0xff]   ;;  %v1205_v7 = vld [vmem:[%s1552_s1 + $0x98] sm:$0xff]   ;;  %vm1447_vm2 = vmor %vm363_vm0, %vm364_vm1 }
  0x24   : > { %222 = vrot.lane.b32.xlu0 %v209_v18, %s1244_s26  ;;  %v214_v31 = vrot.slane %v213_v25, 4  ;;  %v424_v34 = vrot.slane %v422_v2, 7  ;;  %v318_v35 = vshll.u32 %v295_v27, 16  ;;  %v1041_v46 = vrot.slane %v233_v41, 9  ;;  %1111 = vmatprep.subr.bf16.mxu0 %v1202_v60  ;;  %v172_v5 = vld [vmem:[%s1292_s23] sm:$0xf] }
  0x25   : > { %v406_v36 = vsel %vm1357_vm11, %v397_v30, %v405_v3  ;;  %v308_v38 = vrot.slane %v306_v32, 7  ;;  %v1384_v39 = vrot.slane %v315_v33, 7  ;;  %v246_v49 = vrot.slane %v234_v45, 5  ;;  %v1204_v3 = vld [vmem:[%s1552_s1 + $0xd8] sm:$0xff]   ;;  %1112 = vmatpush3.bf16.msra.mxu0 %v1203_v0  ;;  %176 = vst.msk [vmem:[#allocation2] sm:$0xf] %vm175_vm3, %v172_v5 }
  0x26   : > { %v425_v40 = vor.u32 %v424_v34, %v421_v29  ;;  %v219_v47 = vsel %vm1343_vm8, %v214_v31, %v218_v26  ;;  %v309_v55 = vshll.u32 %v294_v22, 16  ;;  %v301_v57 = vshrl.u32 %v293_v53, 16  ;;  %1137 = vmatprep.subr.bf16.mxu1 %v1204_v3  ;;  %v1206_v8 = vld [vmem:[%s1552_s1 + $0x68] sm:$0xff]   ;;  %v1208_v16 = vld [vmem:[%s1552_s1 + $0xe0] sm:$0xff]   ;;  %v1211_v21 = vld [vmem:[%s1552_s1 + $0x30] sm:$0xff]  }
  0x27   : > { %285 = vrot.lane.b32.xlu1 %v280_v19, %s1244_s26  ;;  %v313_v42 = vrot.slane %v308_v38, 4  ;;  %v320_v43 = vor.u32 %v318_v35, %v1384_v39  ;;  %v247_v56 = vsel %vm1392_vm15, %v1041_v46, %v246_v49  ;;  %v248_v61 = vrot.slane %v246_v49, 4  ;;  %v356_v9 = vld [vmem:[%s1292_s23 + $0x8] sm:$0xf]  ;;  %1138 = vmatpush3.bf16.msra.mxu1 %v1205_v7  ;;  %v357_v10 = vld [vmem:[%s1292_s23 + $0xc] sm:$0xf] }
  0x28   : > { %427 = vrot.lane.b32.xlu0 %v406_v36, %s1244_s26  ;;  %v426_v48 = vsel %vm1357_vm11, %v417_v20, %v425_v40  ;;  %257 = vst.msk [vmem:[#allocation2 + $0x4] sm:$0xf] %vm175_vm3, %v247_v56  ;;  %v311_v59 = vor.u32 %v309_v55, %v308_v38  ;;  %v1043_v62 = vrot.slane %v301_v57, 11  ;;  %v249_v1 = vrot.slane %v235_v63, 5  ;;  %1113 = vmatprep.subr.bf16.mxu0 %v1206_v8  ;;  %v1207_v14 = vld [vmem:[%s1552_s1 + $0x28] sm:$0xff]   ;;  %v1209_v18 = vld [vmem:[%s1552_s1 + $0xa0] sm:$0xff]  }
  0x29   : > { %v321_v51 = vsel %vm1380_vm14, %v313_v42, %v320_v43  ;;  %v368_v12 = vrot.slane %v356_v9, 6  ;;  %v371_v13 = vrot.slane %v357_v10, 6  ;;  %v173_v17 = vld [vmem:[%s1292_s23 + $0x4] sm:$0xf]  ;;  %1114 = vmatpush3.bf16.msra.mxu0 %v1207_v14  ;;  %1139 = vmatprep.subr.bf16.mxu1 %v1208_v16  ;;  %v1210_v20 = vld [vmem:[%s1552_s1 + $0x70] sm:$0xff]   ;;  %v1212_v22 = vld [vmem:[%s1552_s1 + $0xe8] sm:$0xff]  }
  0x2a   : > { %335 = vst.msk [vmem:[#allocation2 + $0x1c] sm:$0xf] %vm175_vm3, %v321_v51  ;;  %v312_v4 = vsel %vm1380_vm14, %v1043_v62, %v311_v59  ;;  %v250_v6 = vsel %vm1392_vm15, %v248_v61, %v249_v1  ;;  %177 = vst.msk [vmem:[#allocation2 + $0x14] sm:$0xf] %vm175_vm3, %v173_v17  ;;  %1115 = vmatprep.subr.bf16.mxu0 %v1210_v20  ;;  %v355_v23 = vld [vmem:[%s1292_s23 + $0x4] sm:$0xc] }
  0x2b   : > { %431 = vrot.lane.b32.xlu1 %v426_v48, %s1244_s26  ;;  %334 = vst.msk [vmem:[#allocation2 + $0x8] sm:$0xf] %vm175_vm3, %v312_v4  ;;  %258 = vst.msk [vmem:[#allocation2 + $0x18] sm:$0xf] %vm175_vm3, %v250_v6  ;;  %v370_v15 = vrot.slane %v368_v12, 4  ;;  %1140 = vmatpush3.bf16.msra.mxu1 %v1209_v18  ;;  %v1044_v24 = vrot.slane %v355_v23, 10 }
  0x2c   : > { %224 = vrot.lane.b32.xlu0 %v219_v47, %s1244_s26  ;;  %1141 = vmatprep.subr.bf16.mxu1 %v1212_v22  ;;  %v1213_v25 = vld [vmem:[%s1552_s1 + $0xa8] sm:$0xff]   ;;  %v1214_v26 = vld [vmem:[%s1552_s1 + $0x78] sm:$0xff]   ;;  %v251_v29 = vrot.slane %v249_v1, 4  ;;  %v1216_v2 = vld [vmem:[%s1552_s1 + $0xf0] sm:$0xff]   ;;  %v373_v38 = vrot.slane %v371_v13, 4  ;;  %v322_v47 = vrot.slane %v1384_v39, 4 }
  0x2d   : > { %v372_v19 = vsel %vm1447_vm2, %v370_v15, %v371_v13  ;;  %1116 = vmatpush3.bf16.msra.mxu0 %v1211_v21  ;;  %v369_v27 = vsel %vm1447_vm2, %v1044_v24, %v368_v12  ;;  %v236_v30 = vld [vmem:[%s1292_s23 + $0xc] sm:$0x1]  ;;  %v174_v31 = vld [vmem:[%s1292_s23 + $0x8] sm:$0xf]  ;;  %v1217_v33 = vld [vmem:[%s1552_s1 + $0xb0] sm:$0xff]  }
  0x2e   : > { %380 = vst.msk [vmem:[#allocation2 + $0x20] sm:$0xf] %vm175_vm3, %v372_v19  ;;  %379 = vst.msk [vmem:[#allocation2 + $0xc] sm:$0xf] %vm175_vm3, %v369_v27  ;;  %1117 = vmatprep.subr.bf16.mxu0 %v1214_v26  ;;  %v252_v32 = vrot.slane %v236_v30, 5  ;;  %v1221_v34 = vld [vmem:[%s1552_s1 + $0x100] sm:$0xff]  }
  0x2f   : > { %1142 = vmatpush3.bf16.msra.mxu1 %v1213_v25  ;;  %178 = vst.msk [vmem:[#allocation2 + $0x28] sm:$0xf] %vm175_vm3, %v174_v31  ;;  %v1222_v36 = vld [vmem:[%s1552_s1 + $0xf8] sm:$0xff]   ;;  %v358_v40 = vld [vmem:[%s1292_s23 + $0x10] sm:$0x3]  ;;  %v1227_v62 = vld [vmem:[%s1552_s1 + $0x108] sm:$0xff]  }
  0x30   : > { %347 = vrot.lane.b32.xlu0 %v339_v54, %s1244_s26  ;;  %1143 = vmatprep.subr.bf16.mxu1 %v1216_v2  ;;  %v253_v35 = vsel %vm1392_vm15, %v251_v29, %v252_v32  ;;  %v296_v41 = vld [vmem:[%s1292_s23 + $0xc] sm:$0xf]  ;;  %v374_v42 = vrot.slane %v358_v40, 6  ;;  %v1223_v44 = vld [vmem:[%s1552_s1 + $0xb8] sm:$0xff]   ;;  %v1229_v3 = vld [vmem:[%s1552_s1 + $0x110] sm:$0xff]  }
  0x31   : > { %1118 = vmatpush3.bf16.msra.mxu0 %v1215_v28  ;;  %259 = vst.msk [vmem:[#allocation2 + $0x2c] sm:$0xf] %vm175_vm3, %v253_v35  ;;  %v324_v43 = vshrl.u32 %v296_v41, 16  ;;  %v327_v45 = vshll.u32 %v296_v41, 16  ;;  %v1234_v7 = vld [vmem:[#allocation2 + $0x10] ss:$20 sps:$4 sm:$0xff]  }
  0x32   : > { %1165 = vmatprep.subr.bf16.mxu0 %v1221_v34  ;;  %v375_v46 = vsel %vm1447_vm2, %v373_v38, %v374_v42  ;;  %v1232_v8 = vld [vmem:[%s1552_s1 + $0x118] sm:$0xff]   ;;  %v1046_v17 = vld [vmem:[%s1553_s2] ss:$0 sm:$0xff] }
  0x33   : > { %1144 = vmatpush3.bf16.msra.mxu1 %v1217_v33  ;;  %v326_v48 = vrot.slane %v324_v43, 7  ;;  %381 = vst.msk [vmem:[#allocation2 + $0x34] sm:$0xf] %vm175_vm3, %v375_v46  ;;  %v1235_v12 = vld [vmem:[#allocation2 + $0x38] ss:$0 sps:$4 sm:$0xff]  }
  0x34   : > { %1145 = vmatprep.subr.bf16.mxu1 %v1222_v36 }
  0x35   : > { %v329_v49 = vor.u32 %v327_v45, %v326_v48 }
  0x37   : > { %1146 = vmatpush3.bf16.msra.mxu1 %v1223_v44  ;;  %v330_v50 = vsel %vm1380_vm14, %v322_v47, %v329_v49 }
  0x38   : > { %336 = vst.msk [vmem:[#allocation2 + $0x30] sm:$0xf] %vm175_vm3, %v330_v50 }
  0x84   : > { %v346_v51 = vpop.permute.xlu1 %345 }
  0x85   : > { %353 = vst.msk [vmem:[#allocation2 + $0x1c] sm:$0xf] %vm229_vm4, %v346_v51 }
  0x87   : > { %v344_v52 = vpop.permute.xlu0 %343 }
  0x88   : > { %v282_v53 = vpop.permute.xlu1 %281  ;;  %352 = vst.msk [vmem:[#allocation2 + $0x8] sm:$0xf] %vm229_vm4, %v344_v52 }
  0x89   : > { %290 = vst.msk [vmem:[#allocation2 + $0x4] sm:$0xf] %vm229_vm4, %v282_v53 }
  0x8c   : > { %v284_v39 = vpop.permute.xlu1 %283 }
  0x8d   : > { %291 = vst.msk [vmem:[#allocation2 + $0x18] sm:$0xf] %vm229_vm4, %v284_v39 }
  0x8f   : > { %v1224_v0 = vld [vmem:[#allocation2 + $0x8] ss:$20 sps:$4 sm:$0xff]  }
  0x92   : > { %v221_v55 = vpop.permute.xlu0 %220 }
  0x93   : > { %230 = vst.msk [vmem:[#allocation2] sm:$0xf] %vm229_vm4, %v221_v55 }
  0x94   : > { %v1220_v61 = vld [vmem:[#allocation2 + $0x4] ss:$20 sps:$4 sm:$0xff]  }
  0x95   : > { %v430_v37 = vpop.permute.xlu1 %429  ;;  %848 = vmatprep.mubr.bf16.mxu0 %v1220_v61 }
  0x96   : > { %437 = vst.msk [vmem:[#allocation2 + $0x20] sm:$0xf] %vm229_vm4, %v430_v37  ;;  %v223_v54 = vpop.permute.xlu0 %222 }
  0x97   : > { %231 = vst.msk [vmem:[#allocation2 + $0x14] sm:$0xf] %vm229_vm4, %v223_v54 }
  0x99   : > { %v286_v56 = vpop.permute.xlu1 %285 }
  0x9a   : > { %v428_v57 = vpop.permute.xlu0 %427  ;;  %292 = vst.msk [vmem:[#allocation2 + $0x2c] sm:$0xf] %vm229_vm4, %v286_v56 }
  0x9b   : > { %436 = vst.msk [vmem:[#allocation2 + $0xc] sm:$0xf] %vm229_vm4, %v428_v57 }
  0x9d   : > { %v432_v58 = vpop.permute.xlu1 %431 }
  0x9e   : > { %v225_v59 = vpop.permute.xlu0 %224  ;;  %v1218_v60 = vld [vmem:[#allocation2] ss:$20 sps:$4 sm:$0xff]   ;;  %438 = vst.msk [vmem:[#allocation2 + $0x34] sm:$0xf] %vm229_vm4, %v432_v58 }
  0x9f   : > { %232 = vst.msk [vmem:[#allocation2 + $0x28] sm:$0xf] %vm229_vm4, %v225_v59  ;;  %849 = vmatmul.mubr.bf16.vlgmr.msra.gmra.mrb[0].mxu0 %v1218_v60 }
  0xa0   : > { %1166 = vmatpush3.bf16.msra.mxu0 %v1221_v34 }
  0xa1   : > { %1167 = vmatprep.subr.bf16.mxu0 %v1227_v62 }
  0xa2   : > { %v348_v63 = vpop.permute.xlu0 %347  ;;  %v1226_v1 = vld [vmem:[#allocation2 + $0xc] ss:$20 sps:$4 sm:$0xff]  }
  0xa3   : > { %354 = vst.msk [vmem:[#allocation2 + $0x30] sm:$0xf] %vm229_vm4, %v348_v63  ;;  %896 = vmatprep.mubr.bf16.mxu1 %v1226_v1 }
  0xa4   : > { %897 = vmatmul.mubr.bf16.vlgmr.msra.gmra.mrb[0].mxu1 %v1224_v0  ;;  %1168 = vmatpush3.bf16.msra.mxu0 %v1227_v62 }
  0xa5   : > { %1169 = vmatprep.subr.bf16.mxu0 %v1229_v3 }
  0xa6   : > { %v469_v4 = vld [vmem:[#allocation2 + $0x28] sm:$0xff] }
  0xa7   : > { %v1053_v5 = vcombine.high %v469_v4, %v469_v4  ;;  %v1052_v6 = vcombine.low %v469_v4, %v469_v4 }
  0xa8   : > { %1170 = vmatpush3.bf16.msra.mxu0 %v1229_v3 }
  0xa9   : > { %856 = vmatprep.mubr.bf16.mxu0 %v1053_v5  ;;  %1171 = vmatprep.subr.bf16.mxu0 %v1232_v8 }
  0xaa   : > { %857 = vmatmul.mubr.bf16.gmra.mrb[4].mxu0 %v1052_v6  ;;  %v470_v9 = vld [vmem:[#allocation2 + $0x30] sm:$0xff] }
  0xab   : > { %v1055_v10 = vcombine.high %v470_v9, %v470_v9  ;;  %v1054_v11 = vcombine.low %v470_v9, %v470_v9  ;;  %1173 = vmatprep.mubr.msk.bf16.mxu0 %vm809_vm5, %v1234_v7 }
  0xac   : > { %1172 = vmatpush3.bf16.msra.mxu0 %v1232_v8 }
  0xad   : > { %904 = vmatprep.mubr.bf16.mxu1 %v1055_v10 }
  0xae   : > { %905 = vmatmul.mubr.bf16.gmra.mrb[4].mxu1 %v1054_v11 }
  0xb2   : > { %1174 = vmatmul.mubr.msk.bf16.vlgmr.msra.gmra.mrb[8].mxu0 %vm809_vm5, %v1235_v12 }
 0x172   : > { %v1119_v13 = vpop.f32.mrb[0].mxu0 }
 0x173   : > { %v1120_v14 = vpop.f32.mrb[1].mxu0 }
 0x174   : > { %v1121_v15 = vadd.f32 %v1120_v14, %v1119_v13  ;;  %v1122_v16 = vpop.f32.mrb[2].mxu0 }
 0x175   : > { %v1123_v18 = vpop.f32.mrb[3].mxu0 }
 0x176   : > { %v1124_v19 = vadd.f32 %v1123_v18, %v1122_v16  ;;  %v851_v22 = vadd.f32 %v1121_v15, %v1046_v17 }
 0x177   : > { %v1147_v20 = vpop.f32.mrb[0].mxu1 }
 0x178   : > { %v1148_v21 = vpop.f32.mrb[1].mxu1  ;;  %v854_v26 = vadd.f32 %v1124_v19, %v1046_v17 }
 0x179   : > { %v1149_v23 = vadd.f32 %v1148_v21, %v1147_v20  ;;  %v1150_v24 = vpop.f32.mrb[2].mxu1 }
 0x17a   : > { %v1151_v25 = vpop.f32.mrb[3].mxu1 }
 0x17b   : > { %v1152_v27 = vadd.f32 %v1151_v25, %v1150_v24  ;;  %v899_v28 = vadd.f32 %v1149_v23, %v851_v22 }
 0x17d   : > { %v1125_v29 = vpop.f32.mrb[4].mxu0  ;;  %v902_v30 = vadd.f32 %v1152_v27, %v854_v26 }
 0x17e   : > { %v1126_v2 = vpop.f32.mrb[5].mxu0 }
 0x17f   : > { %v1127_v31 = vadd.f32 %v1126_v2, %v1125_v29  ;;  %v1128_v32 = vpop.f32.mrb[6].mxu0 }
 0x180   : > { %v1129_v33 = vpop.f32.mrb[7].mxu0 }
 0x181   : > { %v1153_v34 = vpop.f32.mrb[4].mxu1  ;;  %v859_v36 = vadd.f32 %v1127_v31, %v1046_v17 }
 0x182   : > { %v1154_v35 = vpop.f32.mrb[5].mxu1 }
 0x183   : > { %v1155_v38 = vadd.f32 %v1154_v35, %v1153_v34  ;;  %v1156_v40 = vpop.f32.mrb[6].mxu1 }
 0x184   : > { %v1157_v41 = vpop.f32.mrb[7].mxu1 }
 0x185   : > { %v907_v42 = vadd.f32 %v1155_v38, %v859_v36  ;;  %v1175_v43 = vpop.f32.mrb[8].mxu0 }
 0x186   : > { %v946_v45 = vpop.f32.mrb[9].mxu0 }
 0x187   : > { %v955_v44 = vadd.f32 %v1175_v43, %v907_v42  ;;  %v947_v46 = vadd.f32 %v946_v45, %v899_v28  ;;  %v1176_v47 = vpop.f32.mrb[10].mxu0 }
 0x188   : > { %v949_v48 = vpop.f32.mrb[11].mxu0 }
 0x189   : > { %v962_v49 = vmax.f32 %v955_v44, 0.0  ;;  %v960_v50 = vmax.f32 %v947_v46, 0.0  ;;  %v950_v51 = vadd.f32 %v949_v48, %v902_v30 }
 0x18b   : > { %v1102_v52 = vpack.c.bf16 %v962_v49, %v962_v49  ;;  %v1100_v53 = vpack.c.bf16 %v960_v50, %v960_v50  ;;  %v961_v39 = vmax.f32 %v950_v51, 0.0 }
 0x18d   : > { %978 = vst.msk [vmem:[%s170_s22 + $0x8] sm:$0xf] %vm175_vm3, %v1102_v52  ;;  %976 = vst.msk [vmem:[%s170_s22] sm:$0xf] %vm175_vm3, %v1100_v53  ;;  %v1101_v55 = vpack.c.bf16 %v961_v39, %v961_v39 }
 0x18f   : > { %977 = vst.msk [vmem:[%s170_s22 + $0x4] sm:$0xf] %vm175_vm3, %v1101_v55 }
 0x190 PF: > { %s13_s12 = sadd.s32 1, %s1242_s12  }
 0x191   : > { %p10_p4 = scmp.ge.s32.totalorder %s13_s12, 4  }
 0x193   :  { %12 = sbr.rel (!%p10_p4) target bundleno = 1 (0x1), region = 62 }

// kernel: _lambda_.13
= control target key start
LH: loop header
LB: loop body
LE: loop exit
PB: predicated region body
PF: predicated region fallthrough
CT: control target
= control target key end

     0   :  { %s242_s6 = smov 0   ;;  %s259_s0 = inlined_call_operand.vmem [shape: bf16[2,4,4,64], index: 0, kind: input, shape index: {}]   ;;  %s260_s1 = inlined_call_operand.vmem [shape: f32[2,4,4,1], index: 1, kind: output, shape index: {}]  }
   0x1 LB: > { %s203_s7 = sadd.s32 4294967295, %s230_s6   ;;  %p207_p0 = scmp.ge.s32.totalorder %s230_s6, 1  ;;  %s230_s6 = sphi %s242_s6, %s11_s6  }
   0x2   : > { %p87_p1 = scmp.lt.s32.totalorder %s230_s6, 3 }
   0x4   : > { %p88_p2 = pnand %p207_p0, %p87_p1 }
   0x5   : > { %p107_p3 = scmp.lt.s32.totalorder (!%p88_p2), %s203_s7, 1  ;;  %vm125_vm0 = vcmask (!%p88_p2), 519168   ;;  %vm143_vm1 = vcmask (!%p88_p2), 3072  }
   0x6   : > { %91 = sbr.rel (%p88_p2) target bundleno = 169 (0xa9), region = 24 }
   0xd   : > { %s262_s7 = smov (!%p107_p3, %s203_s7), 1 }
   0xe   : > { %s214_s8 = sshll.u32 %s262_s7, 3  ;;  %s215_s12 = sshll.u32 %s262_s7, 4 }
   0xf   : > { %s111_s11 = scalar_lea.vmem %s259_s0, %s214_s8  ;;  %s116_s15 = scalar_lea.vmem %s260_s1, %s215_s12 }
  0x10   : > { %v119_v0 = vld [vmem:[%s111_s11 + $0x4] sm:$0x3]  ;;  %v117_v1 = vld [vmem:[%s111_s11] sm:$0x3]  ;;  %v120_v2 = vld [vmem:[%s111_s11 + $0x6] sm:$0x3] }
  0x11   : > { %v123_v3 = vunpack.c.l.bf16 %v119_v0  ;;  %v121_v4 = vunpack.c.l.bf16 %v117_v1  ;;  %v124_v5 = vunpack.c.l.bf16 %v120_v2  ;;  %v118_v6 = vld [vmem:[%s111_s11 + $0x2] sm:$0x3] }
  0x12   : > { %v122_v7 = vunpack.c.l.bf16 %v118_v6 }
  0x13   : > { %v132_v8 = vsel %vm125_vm0, %v123_v3, 0.0  ;;  %v126_v9 = vsel %vm125_vm0, %v121_v4, 0.0  ;;  %v135_v10 = vsel %vm125_vm0, %v124_v5, 0.0 }
  0x14   : > { %133 = vadd.xlane.f32.xlu1 %v132_v8  ;;  %127 = vadd.xlane.f32.xlu0 %v126_v9  ;;  %v129_v11 = vsel %vm125_vm0, %v122_v7, 0.0 }
  0x18   : > { %136 = vadd.xlane.f32.xlu1 %v135_v10  ;;  %130 = vadd.xlane.f32.xlu0 %v129_v11 }
  0xa1   : > { %v134_v12 = vpop.xlane.xlu1 %133  ;;  %v128_v13 = vpop.xlane.xlu0 %127 }
  0xa2   : > { %v141_v14 = vmul.f32 0.015625, %v134_v12  ;;  %v139_v15 = vmul.f32 0.015625, %v128_v13 }
  0xa4   : > { %146 = vst.msk [vmem:[%s116_s15 + $0x8] sm:$0xf] %vm143_vm1, %v141_v14  ;;  %144 = vst.msk [vmem:[%s116_s15] sm:$0xf] %vm143_vm1, %v139_v15 }
  0xa5   : > { %v137_v16 = vpop.xlane.xlu1 %136  ;;  %v131_v17 = vpop.xlane.xlu0 %130 }
  0xa6   : > { %v142_v18 = vmul.f32 0.015625, %v137_v16  ;;  %v140_v19 = vmul.f32 0.015625, %v131_v17 }
  0xa8   : > { %147 = vst.msk [vmem:[%s116_s15 + $0xc] sm:$0xf] %vm143_vm1, %v142_v18  ;;  %145 = vst.msk [vmem:[%s116_s15 + $0x4] sm:$0xf] %vm143_vm1, %v140_v19 }
  0xa9 PF: > { %s11_s6 = sadd.s32 1, %s230_s6  }
  0xaa   : > { %p8_p4 = scmp.ge.s32.totalorder %s11_s6, 4  }
  0xac   :  { %10 = sbr.rel (!%p8_p4) target bundleno = 1 (0x1), region = 54 }

// kernel: _lambda_.10
= control target key start
LH: loop header
LB: loop body
LE: loop exit
PB: predicated region body
PF: predicated region fallthrough
CT: control target
= control target key end

     0   :  { %s1343_s15 = smov 0   ;;  %s1636_s0 = inlined_call_operand.vmem [shape: bf16[2,42,64], index: 0, kind: input, shape index: {}]   ;;  %s1637_s1 = inlined_call_operand.vmem [shape: bf16[576,64], index: 1, kind: input, shape index: {}]   ;;  %s1638_s2 = inlined_call_operand.vmem [shape: f32[1,64], index: 2, kind: input, shape index: {}]   ;;  %s1639_s3 = inlined_call_operand.vmem [shape: bf16[2,24,64], index: 3, kind: input, shape index: {}]   ;;  %s1640_s4 = inlined_call_operand.vmem [shape: bf16[2,24,64], index: 4, kind: output, shape index: {}]  }
   0x1 LB: > { %s1102_s16 = sadd.s32 4294967295, %s1315_s15   ;;  %p1106_p0 = scmp.ge.s32.totalorder %s1315_s15, 1  ;;  %s1315_s15 = sphi %s1343_s15, %s14_s15  }
   0x2   : > { %p172_p1 = scmp.lt.s32.totalorder %s1315_s15, 3 }
   0x4   : > { %p173_p2 = pnand %p1106_p0, %p172_p1 }
   0x5   : > { %p203_p3 = scmp.lt.s32.totalorder (!%p173_p2), %s1102_s16, 1  ;;  %vm315_vm0 = vcmask (!%p173_p2), 1040384   ;;  %vm316_vm1 = vcmask (!%p173_p2), 1044484   ;;  %v1261_v0 = vld [vmem:[%s1637_s1 + $0x40] sm:$0xff] (!%p173_p2)   ;;  %v1263_v3 = vld [vmem:[%s1637_s1 + $0x48] sm:$0xff] (!%p173_p2)   ;;  %vm222_vm3 = vcmask (!%p173_p2), 519168  }
   0x6   : > { %176 = sbr.rel (%p173_p2) target bundleno = 402 (0x192), region = 36  ;;  %1176 = vmatprep.subr.bf16.mxu0 (!%p173_p2), %v1261_v0  ;;  %v1262_v1 = vld [vmem:[%s1637_s1] sm:$0xff] (!%p173_p2)   ;;  %vm1359_vm2 = vmor (!%p173_p2), %vm315_vm0, %vm316_vm1  ;;  %vm230_vm4 = vsmask.f32 (!%p173_p2), 3328  ;;  %vm231_vm5 = vsmask.f32 (!%p173_p2), 7440 }
   0x7   : > { %1177 = vmatpush3.bf16.msra.mxu0 (!%p173_p2), %v1262_v1  ;;  %v1264_v4 = vld [vmem:[%s1637_s1 + $0x8] sm:$0xff] (!%p173_p2)   ;;  %s1317_s29 = smov (!%p173_p2), 64   ;;  %vm433_vm6 = vsmask.f32 (!%p173_p2), 1280  ;;  %vm434_vm7 = vsmask.f32 (!%p173_p2), 5392  ;;  %vm1421_vm8 = vmor (!%p173_p2), %vm230_vm4, %vm231_vm5 }
   0x8   : > { %1178 = vmatprep.subr.bf16.mxu0 (!%p173_p2), %v1263_v3  ;;  %v1265_v26 = vld [vmem:[%s1637_s1 + $0xc0] sm:$0xff] (!%p173_p2)   ;;  %v1267_v43 = vld [vmem:[%s1637_s1 + $0x50] sm:$0xff] (!%p173_p2)   ;;  %v1269_v1 = vld [vmem:[%s1637_s1 + $0xc8] sm:$0xff] (!%p173_p2)   ;;  %vm288_vm9 = vcmask (!%p173_p2), 1042432   ;;  %vm289_vm10 = vcmask (!%p173_p2), 1046532   ;;  %vm410_vm0 = vcmask (!%p173_p2), 1041408  }
   0x9   : > { %v1266_v31 = vld [vmem:[%s1637_s1 + $0x80] sm:$0xff] (!%p173_p2)   ;;  %1204 = vmatprep.subr.bf16.mxu1 (!%p173_p2), %v1265_v26  ;;  %v1268_v53 = vld [vmem:[%s1637_s1 + $0x10] sm:$0xff] (!%p173_p2)   ;;  %vm1435_vm11 = vmor (!%p173_p2), %vm433_vm6, %vm434_vm7  ;;  %vm344_vm12 = vsmask.f32 (!%p173_p2), 256  ;;  %vm345_vm13 = vsmask.f32 (!%p173_p2), 4368 }
   0xa   : > { %1205 = vmatpush3.bf16.msra.mxu1 (!%p173_p2), %v1266_v31  ;;  %vm1458_vm14 = vmor (!%p173_p2), %vm344_vm12, %vm345_vm13  ;;  %vm411_vm1 = vcmask (!%p173_p2), 1045508   ;;  %vm276_vm4 = vcmask (!%p173_p2), 1043968   ;;  %vm856_vm5 = vcmask (!%p173_p2), 523264  }
   0xb   : > { %1179 = vmatpush3.bf16.msra.mxu0 (!%p173_p2), %v1264_v4  ;;  %1206 = vmatprep.subr.bf16.mxu1 (!%p173_p2), %v1269_v1  ;;  %vm1470_vm15 = vmor (!%p173_p2), %vm288_vm9, %vm289_vm10 }
   0xc   : > { %1180 = vmatprep.subr.bf16.mxu0 (!%p173_p2), %v1267_v43 }
   0xd   : > { %s1654_s16 = smov (!%p203_p3, %s1102_s16), 1 }
   0xe   : > { %s1250_s21 = smul.u32 24, %s1654_s16 }
   0xf   : > { %1181 = vmatpush3.bf16.msra.mxu0 %v1268_v53  ;;  %s1251_s25 = smul.u32 12, %s1654_s16 }
  0x10   : > { %s1370_s26 = scalar_lea.vmem %s1636_s0, %s1250_s21 }
  0x11   : > { %v385_v5 = vld [vmem:[%s1370_s26 + $0x8] sm:$0xf]  ;;  %v307_v6 = vld [vmem:[%s1370_s26] sm:$0x8]  ;;  %v308_v7 = vld [vmem:[%s1370_s26 + $0x4] sm:$0xf]  ;;  %s212_s30 = scalar_lea.vmem %s1639_s3, %s1251_s25  ;;  %s217_s7 = scalar_lea.vmem %s1640_s4, %s1251_s25 }
  0x12   : > { %392 = vrot.lane.b32.xlu1 %v385_v5, %s1317_s29  ;;  %v1111_v8 = vrot.slane %v307_v6, 11  ;;  %v320_v9 = vrot.slane %v308_v7, 7  ;;  %v486_v10 = vld [vmem:[%s1370_s26 + $0x4] sm:$0x8]  ;;  %v487_v11 = vld [vmem:[%s1370_s26 + $0x8] sm:$0xf] }
  0x13   : > { %v488_v12 = vld [vmem:[%s1370_s26 + $0xc] sm:$0xf]  ;;  %v489_v13 = vld [vmem:[%s1370_s26 + $0x10] sm:$0x7]  ;;  %v1114_v14 = vrot.slane %v486_v10, 11  ;;  %v496_v15 = vrot.slane %v487_v11, 7 }
  0x14   : > { %v321_v16 = vsel %vm1359_vm2, %v1111_v8, %v320_v9  ;;  %v499_v17 = vrot.slane %v488_v12, 7  ;;  %v502_v18 = vrot.slane %v489_v13, 7  ;;  %v384_v19 = vld [vmem:[%s1370_s26 + $0x4] sm:$0xf]  ;;  %v309_v20 = vld [vmem:[%s1370_s26 + $0x8] sm:$0xf] }
  0x15   : > { %v497_v21 = vsel %vm1359_vm2, %v1114_v14, %v496_v15  ;;  %v498_v22 = vrot.slane %v496_v15, 4  ;;  %390 = vrot.lane.b32.xlu0 %v384_v19, %s1317_s29  ;;  %v322_v23 = vrot.slane %v320_v9, 4  ;;  %v323_v24 = vrot.slane %v309_v20, 7  ;;  %v226_v25 = vld [vmem:[%s1370_s26] sm:$0xf]  ;;  %v1270_v13 = vld [vmem:[%s1637_s1 + $0x88] sm:$0xff]  }
  0x16   : > { %v501_v27 = vrot.slane %v499_v17, 4  ;;  %507 = vst.msk [vmem:[#allocation2 + $0x10] sm:$0xf] %vm222_vm3, %v497_v21  ;;  %328 = vrot.lane.b32.xlu1 %v321_v16, %s1317_s29  ;;  %v227_v28 = vld [vmem:[%s1370_s26 + $0x4] sm:$0xf]  ;;  %v234_v29 = vshrl.u32 %v226_v25, 16  ;;  %1207 = vmatpush3.bf16.msra.mxu1 %v1270_v13 }
  0x17   : > { %v237_v30 = vshll.u32 %v226_v25, 16  ;;  %v500_v32 = vsel %vm1359_vm2, %v498_v22, %v499_v17  ;;  %v324_v33 = vsel %vm1359_vm2, %v322_v23, %v323_v24  ;;  %v243_v34 = vshll.u32 %v227_v28, 16  ;;  %v430_v36 = vld [vmem:[%s1370_s26 + $0x8] sm:$0xf]  ;;  %v431_v37 = vld [vmem:[%s1370_s26 + $0xc] sm:$0xf] }
  0x18   : > { %v247_v35 = vshrl.u32 %v227_v28, 16  ;;  %v503_v38 = vsel %vm1359_vm2, %v501_v27, %v502_v18  ;;  %508 = vst.msk [vmem:[#allocation2 + $0x24] sm:$0xf] %vm222_vm3, %v500_v32  ;;  %v236_v39 = vrot.slane %v234_v29, 4  ;;  %v446_v41 = vshrl.u32 %v430_v36, 16  ;;  %v1271_v28 = vld [vmem:[%s1637_s1 + $0x58] sm:$0xff]  }
  0x19   : > { %v239_v40 = vrot.slane %v237_v30, 5  ;;  %v228_v42 = vld [vmem:[%s1370_s26 + $0x8] sm:$0xf]  ;;  %509 = vst.msk [vmem:[#allocation2 + $0x38] sm:$0xf] %vm222_vm3, %v503_v38  ;;  %v245_v44 = vrot.slane %v243_v34, 5  ;;  %1182 = vmatprep.subr.bf16.mxu0 %v1271_v28 }
  0x1a   : > { %v449_v45 = vshll.u32 %v430_v36, 16  ;;  %v456_v46 = vshrl.u32 %v431_v37, 16  ;;  %v459_v47 = vshll.u32 %v431_v37, 16  ;;  %v429_v48 = vld [vmem:[%s1370_s26 + $0x4] sm:$0xc]  ;;  %330 = vrot.lane.b32.xlu1 %v324_v33, %s1317_s29  ;;  %v448_v50 = vrot.slane %v446_v41, 6 }
  0x1b   : > { %v240_v49 = vor.u32 %v239_v40, %v236_v39  ;;  %v249_v51 = vrot.slane %v247_v35, 4  ;;  %v253_v52 = vshll.u32 %v228_v42, 16  ;;  %v257_v58 = vshrl.u32 %v228_v42, 16  ;;  %v310_v59 = vld [vmem:[%s1370_s26 + $0xc] sm:$0x7]  ;;  %v1288_v28 = vld [vmem:[%s1637_s1 + $0x38] sm:$0xff]  }
  0x1c   : > { %v451_v55 = vrot.slane %v449_v45, 7  ;;  %v458_v56 = vrot.slane %v456_v46, 6  ;;  %v461_v57 = vrot.slane %v459_v47, 7  ;;  %v437_v63 = vshrl.u32 %v429_v48, 16  ;;  %v229_v0 = vld [vmem:[%s1370_s26 + $0xc] sm:$0x1] }
  0x1d   : > { %v241_v60 = vrot.slane %v240_v49, 4  ;;  %v250_v61 = vor.u32 %v249_v51, %v245_v44  ;;  %v255_v62 = vrot.slane %v253_v52, 5  ;;  %v440_v5 = vshll.u32 %v429_v48, 16  ;;  %v432_v7 = vld [vmem:[%s1370_s26 + $0x10] sm:$0x7] }
  0x1e   : > { %v452_v3 = vor.u32 %v451_v55, %v448_v50  ;;  %v462_v4 = vor.u32 %v461_v57, %v458_v56  ;;  %v325_v6 = vrot.slane %v323_v24, 4  ;;  %v439_v11 = vrot.slane %v437_v63, 6  ;;  %v341_v22 = vld [vmem:[%s1370_s26 + $0x4] sm:$0xf]  ;;  %v342_v27 = vld [vmem:[%s1370_s26 + $0x8] sm:$0xf] }
  0x1f   : > { %v246_v8 = vsel %vm1421_vm8, %v241_v60, %v245_v44  ;;  %v251_v10 = vrot.slane %v250_v61, 4  ;;  %v326_v12 = vrot.slane %v310_v59, 7  ;;  %v442_v15 = vrot.slane %v440_v5, 7  ;;  %v280_v41 = vld [vmem:[%s1370_s26] sm:$0xe]  ;;  %v1272_v50 = vld [vmem:[%s1637_s1 + $0x18] sm:$0xff]  }
  0x20   : > { %267 = vrot.lane.b32.xlu0 %v246_v8, %s1317_s29  ;;  %v454_v14 = vrot.slane %v452_v3, 4  ;;  %v259_v16 = vrot.slane %v257_v58, 4  ;;  %v263_v17 = vshll.u32 %v229_v0, 16  ;;  %v464_v20 = vrot.slane %v462_v4, 4  ;;  %v281_v45 = vld [vmem:[%s1370_s26 + $0x4] sm:$0xf]  ;;  %1183 = vmatpush3.bf16.msra.mxu0 %v1272_v50 }
  0x21   : > { %v256_v18 = vsel %vm1421_vm8, %v251_v10, %v255_v62  ;;  %v327_v19 = vsel %vm1359_vm2, %v325_v6, %v326_v12  ;;  %v466_v21 = vshrl.u32 %v432_v7, 16  ;;  %v443_v24 = vor.u32 %v442_v15, %v439_v11  ;;  %v1273_v52 = vld [vmem:[%s1637_s1 + $0xd0] sm:$0xff]   ;;  %v340_v53 = vld [vmem:[%s1370_s26] sm:$0x8]  ;;  %v386_v54 = vld [vmem:[%s1370_s26 + $0xc] sm:$0xf] }
  0x22   : > { %v463_v23 = vsel %vm1435_vm11, %v454_v14, %v462_v4  ;;  %v260_v25 = vor.u32 %v259_v16, %v255_v62  ;;  %v265_v26 = vrot.slane %v263_v17, 5  ;;  %v469_v2 = vshll.u32 %v432_v7, 16  ;;  %v1274_v58 = vld [vmem:[%s1637_s1 + $0x90] sm:$0xff]   ;;  %1208 = vmatprep.subr.bf16.mxu1 %v1273_v52  ;;  %v1275_v60 = vld [vmem:[%s1637_s1 + $0x60] sm:$0xff]   ;;  %v282_v63 = vld [vmem:[%s1370_s26 + $0x8] sm:$0xf] }
  0x23   : > { %476 = vrot.lane.b32.xlu1 %v463_v23, %s1317_s29  ;;  %v468_v29 = vrot.slane %v466_v21, 6  ;;  %v444_v30 = vrot.slane %v443_v24, 4  ;;  %v353_v32 = vshrl.u32 %v341_v22, 16  ;;  %v362_v33 = vshrl.u32 %v342_v27, 16  ;;  %1209 = vmatpush3.bf16.msra.mxu1 %v1274_v58  ;;  %v1276_v0 = vld [vmem:[%s1637_s1 + $0x20] sm:$0xff]   ;;  %v1278_v7 = vld [vmem:[%s1637_s1 + $0x98] sm:$0xff]   ;;  %vm1525_vm2 = vmor %vm410_vm0, %vm411_vm1 }
  0x24   : > { %269 = vrot.lane.b32.xlu0 %v256_v18, %s1317_s29  ;;  %v261_v31 = vrot.slane %v260_v25, 4  ;;  %v471_v34 = vrot.slane %v469_v2, 7  ;;  %v365_v35 = vshll.u32 %v342_v27, 16  ;;  %v1110_v46 = vrot.slane %v280_v41, 9  ;;  %1184 = vmatprep.subr.bf16.mxu0 %v1275_v60  ;;  %v219_v5 = vld [vmem:[%s1370_s26] sm:$0xf] }
  0x25   : > { %v453_v36 = vsel %vm1435_vm11, %v444_v30, %v452_v3  ;;  %v355_v38 = vrot.slane %v353_v32, 7  ;;  %v1462_v39 = vrot.slane %v362_v33, 7  ;;  %v293_v49 = vrot.slane %v281_v45, 5  ;;  %v1277_v3 = vld [vmem:[%s1637_s1 + $0xd8] sm:$0xff]   ;;  %1185 = vmatpush3.bf16.msra.mxu0 %v1276_v0  ;;  %223 = vst.msk [vmem:[#allocation2] sm:$0xf] %vm222_vm3, %v219_v5 }
  0x26   : > { %v472_v40 = vor.u32 %v471_v34, %v468_v29  ;;  %v266_v47 = vsel %vm1421_vm8, %v261_v31, %v265_v26  ;;  %v356_v55 = vshll.u32 %v341_v22, 16  ;;  %v348_v57 = vshrl.u32 %v340_v53, 16  ;;  %1210 = vmatprep.subr.bf16.mxu1 %v1277_v3  ;;  %v1279_v8 = vld [vmem:[%s1637_s1 + $0x68] sm:$0xff]   ;;  %v1281_v16 = vld [vmem:[%s1637_s1 + $0xe0] sm:$0xff]   ;;  %v1284_v21 = vld [vmem:[%s1637_s1 + $0x30] sm:$0xff]  }
  0x27   : > { %332 = vrot.lane.b32.xlu1 %v327_v19, %s1317_s29  ;;  %v360_v42 = vrot.slane %v355_v38, 4  ;;  %v367_v43 = vor.u32 %v365_v35, %v1462_v39  ;;  %v294_v56 = vsel %vm1470_vm15, %v1110_v46, %v293_v49  ;;  %v295_v61 = vrot.slane %v293_v49, 4  ;;  %v403_v9 = vld [vmem:[%s1370_s26 + $0x8] sm:$0xf]  ;;  %1211 = vmatpush3.bf16.msra.mxu1 %v1278_v7  ;;  %v404_v10 = vld [vmem:[%s1370_s26 + $0xc] sm:$0xf] }
  0x28   : > { %474 = vrot.lane.b32.xlu0 %v453_v36, %s1317_s29  ;;  %v473_v48 = vsel %vm1435_vm11, %v464_v20, %v472_v40  ;;  %304 = vst.msk [vmem:[#allocation2 + $0x4] sm:$0xf] %vm222_vm3, %v294_v56  ;;  %v358_v59 = vor.u32 %v356_v55, %v355_v38  ;;  %v1112_v62 = vrot.slane %v348_v57, 11  ;;  %v296_v1 = vrot.slane %v282_v63, 5  ;;  %1186 = vmatprep.subr.bf16.mxu0 %v1279_v8  ;;  %v1280_v14 = vld [vmem:[%s1637_s1 + $0x28] sm:$0xff]   ;;  %v1282_v18 = vld [vmem:[%s1637_s1 + $0xa0] sm:$0xff]  }
  0x29   : > { %v368_v51 = vsel %vm1458_vm14, %v360_v42, %v367_v43  ;;  %v415_v12 = vrot.slane %v403_v9, 6  ;;  %v418_v13 = vrot.slane %v404_v10, 6  ;;  %v220_v17 = vld [vmem:[%s1370_s26 + $0x4] sm:$0xf]  ;;  %1187 = vmatpush3.bf16.msra.mxu0 %v1280_v14  ;;  %1212 = vmatprep.subr.bf16.mxu1 %v1281_v16  ;;  %v1283_v20 = vld [vmem:[%s1637_s1 + $0x70] sm:$0xff]   ;;  %v1285_v22 = vld [vmem:[%s1637_s1 + $0xe8] sm:$0xff]  }
  0x2a   : > { %382 = vst.msk [vmem:[#allocation2 + $0x1c] sm:$0xf] %vm222_vm3, %v368_v51  ;;  %v359_v4 = vsel %vm1458_vm14, %v1112_v62, %v358_v59  ;;  %v297_v6 = vsel %vm1470_vm15, %v295_v61, %v296_v1  ;;  %224 = vst.msk [vmem:[#allocation2 + $0x14] sm:$0xf] %vm222_vm3, %v220_v17  ;;  %1188 = vmatprep.subr.bf16.mxu0 %v1283_v20  ;;  %v402_v23 = vld [vmem:[%s1370_s26 + $0x4] sm:$0xc] }
  0x2b   : > { %478 = vrot.lane.b32.xlu1 %v473_v48, %s1317_s29  ;;  %381 = vst.msk [vmem:[#allocation2 + $0x8] sm:$0xf] %vm222_vm3, %v359_v4  ;;  %305 = vst.msk [vmem:[#allocation2 + $0x18] sm:$0xf] %vm222_vm3, %v297_v6  ;;  %v417_v15 = vrot.slane %v415_v12, 4  ;;  %1213 = vmatpush3.bf16.msra.mxu1 %v1282_v18  ;;  %v1113_v24 = vrot.slane %v402_v23, 10 }
  0x2c   : > { %271 = vrot.lane.b32.xlu0 %v266_v47, %s1317_s29  ;;  %1214 = vmatprep.subr.bf16.mxu1 %v1285_v22  ;;  %v1286_v25 = vld [vmem:[%s1637_s1 + $0xa8] sm:$0xff]   ;;  %v1287_v26 = vld [vmem:[%s1637_s1 + $0x78] sm:$0xff]   ;;  %v298_v29 = vrot.slane %v296_v1, 4  ;;  %v1289_v2 = vld [vmem:[%s1637_s1 + $0xf0] sm:$0xff]   ;;  %v420_v38 = vrot.slane %v418_v13, 4  ;;  %v369_v47 = vrot.slane %v1462_v39, 4 }
  0x2d   : > { %v419_v19 = vsel %vm1525_vm2, %v417_v15, %v418_v13  ;;  %1189 = vmatpush3.bf16.msra.mxu0 %v1284_v21  ;;  %v416_v27 = vsel %vm1525_vm2, %v1113_v24, %v415_v12  ;;  %v283_v30 = vld [vmem:[%s1370_s26 + $0xc] sm:$0x1]  ;;  %v221_v31 = vld [vmem:[%s1370_s26 + $0x8] sm:$0xf]  ;;  %v1290_v33 = vld [vmem:[%s1637_s1 + $0xb0] sm:$0xff]  }
  0x2e   : > { %427 = vst.msk [vmem:[#allocation2 + $0x20] sm:$0xf] %vm222_vm3, %v419_v19  ;;  %426 = vst.msk [vmem:[#allocation2 + $0xc] sm:$0xf] %vm222_vm3, %v416_v27  ;;  %1190 = vmatprep.subr.bf16.mxu0 %v1287_v26  ;;  %v299_v32 = vrot.slane %v283_v30, 5  ;;  %v1294_v34 = vld [vmem:[%s1637_s1 + $0x100] sm:$0xff]  }
  0x2f   : > { %1215 = vmatpush3.bf16.msra.mxu1 %v1286_v25  ;;  %225 = vst.msk [vmem:[#allocation2 + $0x28] sm:$0xf] %vm222_vm3, %v221_v31  ;;  %v1295_v36 = vld [vmem:[%s1637_s1 + $0xf8] sm:$0xff]   ;;  %v405_v40 = vld [vmem:[%s1370_s26 + $0x10] sm:$0x3]  ;;  %v1300_v62 = vld [vmem:[%s1637_s1 + $0x108] sm:$0xff]  }
  0x30   : > { %394 = vrot.lane.b32.xlu0 %v386_v54, %s1317_s29  ;;  %1216 = vmatprep.subr.bf16.mxu1 %v1289_v2  ;;  %v300_v35 = vsel %vm1470_vm15, %v298_v29, %v299_v32  ;;  %v343_v41 = vld [vmem:[%s1370_s26 + $0xc] sm:$0xf]  ;;  %v421_v42 = vrot.slane %v405_v40, 6  ;;  %v1296_v44 = vld [vmem:[%s1637_s1 + $0xb8] sm:$0xff]   ;;  %v1302_v3 = vld [vmem:[%s1637_s1 + $0x110] sm:$0xff]  }
  0x31   : > { %1191 = vmatpush3.bf16.msra.mxu0 %v1288_v28  ;;  %306 = vst.msk [vmem:[#allocation2 + $0x2c] sm:$0xf] %vm222_vm3, %v300_v35  ;;  %v371_v43 = vshrl.u32 %v343_v41, 16  ;;  %v374_v45 = vshll.u32 %v343_v41, 16  ;;  %v1307_v7 = vld [vmem:[#allocation2 + $0x10] ss:$20 sps:$4 sm:$0xff]  }
  0x32   : > { %1238 = vmatprep.subr.bf16.mxu0 %v1294_v34  ;;  %v422_v46 = vsel %vm1525_vm2, %v420_v38, %v421_v42  ;;  %v1305_v8 = vld [vmem:[%s1637_s1 + $0x118] sm:$0xff]   ;;  %v1115_v17 = vld [vmem:[%s1638_s2] ss:$0 sm:$0xff] }
  0x33   : > { %1217 = vmatpush3.bf16.msra.mxu1 %v1290_v33  ;;  %v373_v48 = vrot.slane %v371_v43, 7  ;;  %428 = vst.msk [vmem:[#allocation2 + $0x34] sm:$0xf] %vm222_vm3, %v422_v46  ;;  %v1308_v12 = vld [vmem:[#allocation2 + $0x38] ss:$0 sps:$4 sm:$0xff]   ;;  %v1173_v38 = vld [vmem:[%s212_s30] sm:$0xff]  }
  0x34   : > { %1218 = vmatprep.subr.bf16.mxu1 %v1295_v36  ;;  %v1009_v36 = vld [vmem:[%s212_s30 + $0x8] sm:$0xf] }
  0x35   : > { %v376_v49 = vor.u32 %v374_v45, %v373_v48  ;;  %v1012_v46 = vunpack.c.l.bf16 %v1009_v36 }
  0x37   : > { %1219 = vmatpush3.bf16.msra.mxu1 %v1296_v44  ;;  %v377_v50 = vsel %vm1458_vm14, %v369_v47, %v376_v49  ;;  %v1174_v47 = vunpack.c.l.bf16 %v1173_v38 }
  0x38   : > { %383 = vst.msk [vmem:[#allocation2 + $0x30] sm:$0xf] %vm222_vm3, %v377_v50 }
  0x84   : > { %v393_v51 = vpop.permute.xlu1 %392 }
  0x85   : > { %400 = vst.msk [vmem:[#allocation2 + $0x1c] sm:$0xf] %vm276_vm4, %v393_v51 }
  0x87   : > { %v391_v52 = vpop.permute.xlu0 %390 }
  0x88   : > { %v329_v53 = vpop.permute.xlu1 %328  ;;  %399 = vst.msk [vmem:[#allocation2 + $0x8] sm:$0xf] %vm276_vm4, %v391_v52  ;;  %v1175_v52 = vunpack.c.h.bf16 %v1173_v38 }
  0x89   : > { %337 = vst.msk [vmem:[#allocation2 + $0x4] sm:$0xf] %vm276_vm4, %v329_v53 }
  0x8c   : > { %v331_v39 = vpop.permute.xlu1 %330 }
  0x8d   : > { %338 = vst.msk [vmem:[#allocation2 + $0x18] sm:$0xf] %vm276_vm4, %v331_v39 }
  0x8f   : > { %v1297_v0 = vld [vmem:[#allocation2 + $0x8] ss:$20 sps:$4 sm:$0xff]  }
  0x92   : > { %v268_v55 = vpop.permute.xlu0 %267 }
  0x93   : > { %277 = vst.msk [vmem:[#allocation2] sm:$0xf] %vm276_vm4, %v268_v55 }
  0x94   : > { %v1293_v61 = vld [vmem:[#allocation2 + $0x4] ss:$20 sps:$4 sm:$0xff]  }
  0x95   : > { %v477_v37 = vpop.permute.xlu1 %476  ;;  %895 = vmatprep.mubr.bf16.mxu0 %v1293_v61 }
  0x96   : > { %484 = vst.msk [vmem:[#allocation2 + $0x20] sm:$0xf] %vm276_vm4, %v477_v37  ;;  %v270_v54 = vpop.permute.xlu0 %269 }
  0x97   : > { %278 = vst.msk [vmem:[#allocation2 + $0x14] sm:$0xf] %vm276_vm4, %v270_v54 }
  0x99   : > { %v333_v56 = vpop.permute.xlu1 %332 }
  0x9a   : > { %v475_v57 = vpop.permute.xlu0 %474  ;;  %339 = vst.msk [vmem:[#allocation2 + $0x2c] sm:$0xf] %vm276_vm4, %v333_v56 }
  0x9b   : > { %483 = vst.msk [vmem:[#allocation2 + $0xc] sm:$0xf] %vm276_vm4, %v475_v57 }
  0x9d   : > { %v479_v58 = vpop.permute.xlu1 %478 }
  0x9e   : > { %v272_v59 = vpop.permute.xlu0 %271  ;;  %v1291_v60 = vld [vmem:[#allocation2] ss:$20 sps:$4 sm:$0xff]   ;;  %485 = vst.msk [vmem:[#allocation2 + $0x34] sm:$0xf] %vm276_vm4, %v479_v58 }
  0x9f   : > { %279 = vst.msk [vmem:[#allocation2 + $0x28] sm:$0xf] %vm276_vm4, %v272_v59  ;;  %896 = vmatmul.mubr.bf16.vlgmr.msra.gmra.mrb[0].mxu0 %v1291_v60 }
  0xa0   : > { %1239 = vmatpush3.bf16.msra.mxu0 %v1294_v34 }
  0xa1   : > { %1240 = vmatprep.subr.bf16.mxu0 %v1300_v62 }
  0xa2   : > { %v395_v63 = vpop.permute.xlu0 %394  ;;  %v1299_v1 = vld [vmem:[#allocation2 + $0xc] ss:$20 sps:$4 sm:$0xff]  }
  0xa3   : > { %401 = vst.msk [vmem:[#allocation2 + $0x30] sm:$0xf] %vm276_vm4, %v395_v63  ;;  %943 = vmatprep.mubr.bf16.mxu1 %v1299_v1 }
  0xa4   : > { %944 = vmatmul.mubr.bf16.vlgmr.msra.gmra.mrb[0].mxu1 %v1297_v0  ;;  %1241 = vmatpush3.bf16.msra.mxu0 %v1300_v62 }
  0xa5   : > { %1242 = vmatprep.subr.bf16.mxu0 %v1302_v3 }
  0xa6   : > { %v516_v4 = vld [vmem:[#allocation2 + $0x28] sm:$0xff] }
  0xa7   : > { %v1122_v5 = vcombine.high %v516_v4, %v516_v4  ;;  %v1121_v6 = vcombine.low %v516_v4, %v516_v4 }
  0xa8   : > { %1243 = vmatpush3.bf16.msra.mxu0 %v1302_v3 }
  0xa9   : > { %903 = vmatprep.mubr.bf16.mxu0 %v1122_v5  ;;  %1244 = vmatprep.subr.bf16.mxu0 %v1305_v8 }
  0xaa   : > { %904 = vmatmul.mubr.bf16.gmra.mrb[4].mxu0 %v1121_v6  ;;  %v517_v9 = vld [vmem:[#allocation2 + $0x30] sm:$0xff] }
  0xab   : > { %v1124_v10 = vcombine.high %v517_v9, %v517_v9  ;;  %v1123_v11 = vcombine.low %v517_v9, %v517_v9  ;;  %1246 = vmatprep.mubr.msk.bf16.mxu0 %vm856_vm5, %v1307_v7 }
  0xac   : > { %1245 = vmatpush3.bf16.msra.mxu0 %v1305_v8 }
  0xad   : > { %951 = vmatprep.mubr.bf16.mxu1 %v1124_v10 }
  0xae   : > { %952 = vmatmul.mubr.bf16.gmra.mrb[4].mxu1 %v1123_v11 }
  0xb2   : > { %1247 = vmatmul.mubr.msk.bf16.vlgmr.msra.gmra.mrb[8].mxu0 %vm856_vm5, %v1308_v12 }
 0x172   : > { %v1192_v13 = vpop.f32.mrb[0].mxu0 }
 0x173   : > { %v1193_v14 = vpop.f32.mrb[1].mxu0 }
 0x174   : > { %v1194_v15 = vadd.f32 %v1193_v14, %v1192_v13  ;;  %v1195_v16 = vpop.f32.mrb[2].mxu0 }
 0x175   : > { %v1196_v18 = vpop.f32.mrb[3].mxu0 }
 0x176   : > { %v1197_v19 = vadd.f32 %v1196_v18, %v1195_v16  ;;  %v898_v22 = vadd.f32 %v1194_v15, %v1115_v17 }
 0x177   : > { %v1220_v20 = vpop.f32.mrb[0].mxu1 }
 0x178   : > { %v1221_v21 = vpop.f32.mrb[1].mxu1  ;;  %v901_v26 = vadd.f32 %v1197_v19, %v1115_v17 }
 0x179   : > { %v1222_v23 = vadd.f32 %v1221_v21, %v1220_v20  ;;  %v1223_v24 = vpop.f32.mrb[2].mxu1 }
 0x17a   : > { %v1224_v25 = vpop.f32.mrb[3].mxu1 }
 0x17b   : > { %v1225_v27 = vadd.f32 %v1224_v25, %v1223_v24  ;;  %v946_v28 = vadd.f32 %v1222_v23, %v898_v22 }
 0x17d   : > { %v1198_v29 = vpop.f32.mrb[4].mxu0  ;;  %v949_v30 = vadd.f32 %v1225_v27, %v901_v26 }
 0x17e   : > { %v1199_v2 = vpop.f32.mrb[5].mxu0 }
 0x17f   : > { %v1200_v31 = vadd.f32 %v1199_v2, %v1198_v29  ;;  %v1201_v32 = vpop.f32.mrb[6].mxu0 }
 0x180   : > { %v1202_v33 = vpop.f32.mrb[7].mxu0 }
 0x181   : > { %v1226_v34 = vpop.f32.mrb[4].mxu1  ;;  %v906_v40 = vadd.f32 %v1200_v31, %v1115_v17 }
 0x182   : > { %v1227_v35 = vpop.f32.mrb[5].mxu1 }
 0x183   : > { %v1228_v41 = vadd.f32 %v1227_v35, %v1226_v34  ;;  %v1229_v42 = vpop.f32.mrb[6].mxu1 }
 0x184   : > { %v1230_v43 = vpop.f32.mrb[7].mxu1 }
 0x185   : > { %v954_v45 = vadd.f32 %v1228_v41, %v906_v40  ;;  %v1248_v44 = vpop.f32.mrb[8].mxu0 }
 0x186   : > { %v993_v48 = vpop.f32.mrb[9].mxu0 }
 0x187   : > { %v1002_v49 = vadd.f32 %v1248_v44, %v954_v45  ;;  %v994_v50 = vadd.f32 %v993_v48, %v946_v28  ;;  %v1249_v51 = vpop.f32.mrb[10].mxu0 }
 0x188   : > { %v996_v53 = vpop.f32.mrb[11].mxu0 }
 0x189   : > { %v1015_v39 = vadd.f32 %v1012_v46, %v1002_v49  ;;  %v1013_v55 = vadd.f32 %v1174_v47, %v994_v50  ;;  %v997_v37 = vadd.f32 %v996_v53, %v949_v30 }
 0x18b   : > { %v1018_v54 = vmax.f32 %v1015_v39, 0.0  ;;  %v1016_v56 = vmax.f32 %v1013_v55, 0.0  ;;  %v1014_v57 = vadd.f32 %v1175_v52, %v997_v37 }
 0x18d   : > { %v1171_v58 = vpack.c.bf16 %v1018_v54, %v1018_v54  ;;  %v1169_v59 = vpack.c.bf16 %v1016_v56, %v1016_v56  ;;  %v1017_v60 = vmax.f32 %v1014_v57, 0.0 }
 0x18f   : > { %1034 = vst.msk [vmem:[%s217_s7 + $0x8] sm:$0xf] %vm222_vm3, %v1171_v58  ;;  %1032 = vst.msk [vmem:[%s217_s7] sm:$0xf] %vm222_vm3, %v1169_v59  ;;  %v1170_v61 = vpack.c.bf16 %v1017_v60, %v1017_v60 }
 0x191   : > { %1033 = vst.msk [vmem:[%s217_s7 + $0x4] sm:$0xf] %vm222_vm3, %v1170_v61 }
 0x192 PF: > { %s14_s15 = sadd.s32 1, %s1315_s15  }
 0x193   : > { %p11_p4 = scmp.ge.s32.totalorder %s14_s15, 4  }
 0x195   :  { %13 = sbr.rel (!%p11_p4) target bundleno = 1 (0x1), region = 69 }

</bundles_post_ra>
